<compile_context>
chip_gen: v7x
topology: tpu7x:2x2x1
jax: 0.10.0
libtpu: 0.0.40
codegen_flags: <defaults>
</compile_context>

<pallas_src>
import jax
import jax.numpy as jnp
from jax.experimental import pallas as pl
from jax.experimental.pallas import tpu as pltpu


# ----------------------------------------------------------------------------
# In-kernel helper: accumulate a dilated-3x3 (or 1x1) conv from flat lane
# slices of the spatially padded, channel-major input.
#   xp_ref : (Cin, HW + 2*pad)  bf16   flat-padded feature map (one image)
#   w_ref  : (n_taps_total, Cout, Cin) bf16  (tap-major stacked weights)
#   yrow/xrow : (1, HW) f32     spatial coordinates of each lane position
# ----------------------------------------------------------------------------
def _accumulate_taps(xp_ref, yrow, xrow, w_ref, tap_offset, ntaps, dil, H, W, pad):
    HW = H * W
    z = None
    for t in range(ntaps):
        if ntaps == 1:
            dy = dx = 0
        else:
            ky, kx = divmod(t, 3)
            dy, dx = (ky - 1) * dil, (kx - 1) * dil
        s = dy * W + dx                                   # flat shift (static)
        xs = xp_ref[:, pad + s: pad + s + HW]             # (Cin, HW) bf16
        part = jnp.dot(w_ref[tap_offset + t], xs,
                       preferred_element_type=jnp.float32)  # (Cout, HW) f32
        if dy != 0 or dx != 0:
            ok = ((yrow + dy >= 0.0) & (yrow + dy <= H - 1.0) &
                  (xrow + dx >= 0.0) & (xrow + dx <= W - 1.0))
            part = jnp.where(ok, part, 0.0)               # zero out-of-image taps
        z = part if z is None else z + part
    return z


# ----------------------------------------------------------------------------
# Kernel A: down_conv = 3x3 conv (dil=1) + folded BN + PReLU
# ----------------------------------------------------------------------------
def _make_down_kernel(H, W, pad, cout):
    HW = H * W

    def kernel(xp_ref, yx_ref, w_ref, b_ref, alpha_ref, o_ref):
        yrow = yx_ref[0:1, :]
        xrow = yx_ref[1:2, :]
        z = _accumulate_taps(xp_ref, yrow, xrow, w_ref, 0, 9, 1, H, W, pad)
        z = z + b_ref[...]                                # (cout, 1) broadcast
        a = alpha_ref[0]
        o_ref[...] = jnp.where(z >= 0.0, z, a * z)

    return kernel


def down_conv(x_flat, coords, w_taps, bias, alpha, *, H, W):
    """x_flat: (N, Cin, H*W) bf16 ; w_taps: (9, Cout, Cin) bf16."""
    N, cin, HW = x_flat.shape
    cout = w_taps.shape[1]
    pad = W + 1
    L = HW + 2 * pad
    xpad = jnp.pad(x_flat, ((0, 0), (0, 0), (pad, pad)))
    flops = 2 * N * HW * 9 * cin * cout
    bytes_acc = N * cin * L * 2 + int(w_taps.size) * 2 + N * cout * HW * 4
    return pl.pallas_call(
        _make_down_kernel(H, W, pad, cout),
        out_shape=jax.ShapeDtypeStruct((N, cout, HW), jnp.float32),
        grid=(N,),
        in_specs=[
            pl.BlockSpec((None, cin, L), lambda n: (n, 0, 0)),
            pl.BlockSpec(coords.shape, lambda n: (0, 0)),
            pl.BlockSpec(w_taps.shape, lambda n: (0, 0, 0)),
            pl.BlockSpec(bias.shape, lambda n: (0, 0)),
            pl.BlockSpec(memory_space=pltpu.MemorySpace.SMEM),
        ],
        out_specs=pl.BlockSpec((None, cout, HW), lambda n: (n, 0, 0)),
        compiler_params=pltpu.CompilerParams(dimension_semantics=("parallel",)),
        cost_estimate=pl.CostEstimate(flops=int(flops), transcendentals=0,
                                      bytes_accessed=int(bytes_acc)),
    )(xpad, coords, w_taps, bias, alpha)


# ----------------------------------------------------------------------------
# Kernel B: 1x1 conv + folded BN + PReLU (conv5 on the pooled map)
# ----------------------------------------------------------------------------
def _pointwise_kernel(x_ref, w_ref, b_ref, alpha_ref, o_ref):
    z = jnp.dot(w_ref[...], x_ref[...], preferred_element_type=jnp.float32)
    z = z + b_ref[...]
    a = alpha_ref[0]
    o_ref[...] = jnp.where(z >= 0.0, z, a * z)


def pointwise_conv_prelu(x, w, bias, alpha):
    """x: (N, Cin, M) bf16 ; w: (Cout, Cin) bf16 -> (N, Cout, M) f32."""
    N, cin, M = x.shape
    cout = w.shape[0]
    tm = 2048 if M % 2048 == 0 else M                     # M = 128*128 here
    grid = (N, M // tm)
    flops = 2 * N * M * cin * cout
    bytes_acc = N * cin * M * 2 + N * cout * M * 4 + int(w.size) * 2
    return pl.pallas_call(
        _pointwise_kernel,
        out_shape=jax.ShapeDtypeStruct((N, cout, M), jnp.float32),
        grid=grid,
        in_specs=[
            pl.BlockSpec((None, cin, tm), lambda n, j: (n, 0, j)),
            pl.BlockSpec(w.shape, lambda n, j: (0, 0)),
            pl.BlockSpec(bias.shape, lambda n, j: (0, 0)),
            pl.BlockSpec(memory_space=pltpu.MemorySpace.SMEM),
        ],
        out_specs=pl.BlockSpec((None, cout, tm), lambda n, j: (n, 0, j)),
        compiler_params=pltpu.CompilerParams(
            dimension_semantics=("parallel", "parallel")),
        cost_estimate=pl.CostEstimate(flops=int(flops), transcendentals=0,
                                      bytes_accessed=int(bytes_acc)),
    )(x, w, bias, alpha)


# ----------------------------------------------------------------------------
# Kernel C: conv1 (1x1) + conv2/3/4 (3x3 dil 2/4/6) + conv5 merge + fuse,
# all fused; the concat is never materialized (fuse matmul decomposed per
# branch and accumulated in-register).
# ----------------------------------------------------------------------------
def _make_branches_fuse_kernel(H, W, pad, dd, cout):
    HW = H * W
    branch_cfg = ((1, 1), (9, 2), (9, 4), (9, 6))        # (n_taps, dilation)

    def kernel(xp_ref, c5_ref, yx_ref, wb_ref, bb_ref, wf_ref, bf_ref,
               al_ref, o_ref):
        yrow = yx_ref[0:1, :]
        xrow = yx_ref[1:2, :]
        acc = jnp.zeros((cout, HW), jnp.float32)
        tap = 0
        for b, (ntaps, dil) in enumerate(branch_cfg):
            z = _accumulate_taps(xp_ref, yrow, xrow, wb_ref, tap, ntaps, dil,
                                 H, W, pad)               # (dd, HW) f32
            tap += ntaps
            z = z + bb_ref[b]                             # folded bias
            a = al_ref[b]
            cb = jnp.where(z >= 0.0, z, a * z).astype(jnp.bfloat16)  # PReLU
            acc = acc + jnp.dot(wf_ref[b], cb,
                                preferred_element_type=jnp.float32)
        # conv5 branch (pool -> 1x1 -> upsample done upstream): fuse matmul only
        acc = acc + jnp.dot(wf_ref[4], c5_ref[...],
                            preferred_element_type=jnp.float32)
        zf = acc + bf_ref[...]
        af = al_ref[4]
        o_ref[...] = jnp.where(zf >= 0.0, zf, af * zf)

    return kernel


def branches_fuse(feat_flat, c5_flat, coords, wb, bb, wf, bf, alphas, *, H, W):
    """feat_flat: (N, in_dim, HW) bf16 ; c5_flat: (N, dd, HW) bf16
       wb: (28, dd, in_dim) bf16 ; bb: (4, dd, 1) f32
       wf: (5, in_dim, dd) bf16  ; bf: (in_dim, 1) f32 ; alphas: (8,) f32."""
    N, cin, HW = feat_flat.shape
    _, cout, dd = wf.shape
    pad = 6 * W + 6                                       # max dilation halo
    L = HW + 2 * pad
    xpad = jnp.pad(feat_flat, ((0, 0), (0, 0), (pad, pad)))
    flops = 2 * N * HW * (28 * dd * cin + 5 * cout * dd)
    bytes_acc = (N * cin * L * 2 + N * dd * HW * 2 + int(wb.size) * 2 +
                 int(wf.size) * 2 + N * cout * HW * 4)
    return pl.pallas_call(
        _make_branches_fuse_kernel(H, W, pad, dd, cout),
        out_shape=jax.ShapeDtypeStruct((N, cout, HW), jnp.float32),
        grid=(N,),
        in_specs=[
            pl.BlockSpec((None, cin, L), lambda n: (n, 0, 0)),
            pl.BlockSpec((None, dd, HW), lambda n: (n, 0, 0)),
            pl.BlockSpec(coords.shape, lambda n: (0, 0)),
            pl.BlockSpec(wb.shape, lambda n: (0, 0, 0)),
            pl.BlockSpec(bb.shape, lambda n: (0, 0, 0)),
            pl.BlockSpec(wf.shape, lambda n: (0, 0, 0)),
            pl.BlockSpec(bf.shape, lambda n: (0, 0)),
            pl.BlockSpec(memory_space=pltpu.MemorySpace.SMEM),
        ],
        out_specs=pl.BlockSpec((None, cout, HW), lambda n: (n, 0, 0)),
        compiler_params=pltpu.CompilerParams(dimension_semantics=("parallel",)),
        cost_estimate=pl.CostEstimate(flops=int(flops), transcendentals=0,
                                      bytes_accessed=int(bytes_acc)),
    )(xpad, c5_flat, coords, wb, bb, wf, bf, alphas)


# ----------------------------------------------------------------------------
# JAX glue: adaptive avg-pool / bilinear (align_corners=True) matrices
# ----------------------------------------------------------------------------
def adaptive_pool_matrix(in_size, out_size):
    i = jnp.arange(out_size)
    starts = (i * in_size) // out_size
    ends = ((i + 1) * in_size + out_size - 1) // out_size
    idx = jnp.arange(in_size)
    mask = (idx[None, :] >= starts[:, None]) & (idx[None, :] < ends[:, None])
    counts = (ends - starts).astype(jnp.float32)[:, None]
    return mask.astype(jnp.float32) / counts


def bilinear_matrix(in_size, out_size):
    if out_size == 1:
        src = jnp.zeros((1,), jnp.float32)
    else:
        src = jnp.arange(out_size, dtype=jnp.float32) * ((in_size - 1) / (out_size - 1))
    i0 = jnp.clip(jnp.floor(src).astype(jnp.int32), 0, in_size - 1)
    i1 = jnp.clip(i0 + 1, 0, in_size - 1)
    w1 = src - i0.astype(jnp.float32)
    w0 = 1.0 - w1
    rows = jnp.arange(out_size)
    B = jnp.zeros((out_size, in_size), jnp.float32)
    B = B.at[rows, i0].add(w0)
    B = B.at[rows, i1].add(w1)
    return B


# ----------------------------------------------------------------------------
# Parameter init (PyTorch-layout, synthetic) + BN folding / kernel prep
# ----------------------------------------------------------------------------
def init_conv_block(key, cin, cout, k):
    ks = jax.random.split(key, 6)
    return dict(
        w=0.1 * jax.random.normal(ks[0], (cout, cin, k, k), jnp.float32),
        b=0.1 * jax.random.normal(ks[1], (cout,), jnp.float32),
        gamma=1.0 + 0.1 * jax.random.normal(ks[2], (cout,), jnp.float32),
        beta=0.1 * jax.random.normal(ks[3], (cout,), jnp.float32),
        mean=0.1 * jax.random.normal(ks[4], (cout,), jnp.float32),
        var=1.0 + 0.1 * jnp.abs(jax.random.normal(ks[5], (cout,), jnp.float32)),
        alpha=jnp.float32(0.25),                           # nn.PReLU() default
    )


def _fold_bn(p, eps=1e-5):
    scale = p['gamma'] / jnp.sqrt(p['var'] + eps)
    w = p['w'] * scale[:, None, None, None]               # scale folded into W
    bias = (p['b'] - p['mean']) * scale + p['beta']
    return w, bias


def _taps(w4d):
    # (Cout, Cin, kh, kw) -> (kh*kw, Cout, Cin), tap order (ky, kx) row-major
    co, ci, kh, kw = w4d.shape
    return jnp.transpose(w4d, (2, 3, 0, 1)).reshape(kh * kw, co, ci)


def prepare_params(raw):
    prep = {}
    w, b = _fold_bn(raw['down'])
    prep['down'] = dict(w=_taps(w).astype(jnp.bfloat16),
                        b=b.reshape(-1, 1),
                        alpha=jnp.reshape(raw['down']['alpha'], (1,)))

    wb, bb, alphas = [], [], []
    for name in ('conv1', 'conv2', 'conv3', 'conv4'):
        w, b = _fold_bn(raw[name])
        wb.append(_taps(w))
        bb.append(b)
        alphas.append(raw[name]['alpha'])
    prep['wb'] = jnp.concatenate(wb, axis=0).astype(jnp.bfloat16)   # (28,dd,in)
    prep['bb'] = jnp.stack(bb, axis=0)[:, :, None]                  # (4,dd,1)

    w, b = _fold_bn(raw['conv5'])
    prep['conv5'] = dict(w=w[:, :, 0, 0].astype(jnp.bfloat16),
                         b=b.reshape(-1, 1),
                         alpha=jnp.reshape(raw['conv5']['alpha'], (1,)))

    w, b = _fold_bn(raw['fuse'])
    wf2 = w[:, :, 0, 0]                                    # (in_dim, 5*dd)
    in_dim, five_dd = wf2.shape
    dd = five_dd // 5
    prep['wf'] = jnp.transpose(wf2.reshape(in_dim, 5, dd), (1, 0, 2)) \
                    .astype(jnp.bfloat16)                  # (5, in_dim, dd)
    prep['bf'] = b.reshape(-1, 1)
    alphas.append(raw['fuse']['alpha'])
    prep['alphas'] = jnp.concatenate(
        [jnp.stack(alphas).astype(jnp.float32), jnp.zeros((3,), jnp.float32)])
    return prep


# ----------------------------------------------------------------------------
# PAFEM forward
# ----------------------------------------------------------------------------
def pafem_forward(x_nchw, prep, *, pool_size=128):
    N, cin0, H, W = x_nchw.shape
    HW = H * W
    _, in_dim, dd = prep['wf'].shape

    idx = jnp.arange(HW, dtype=jnp.int32)
    coords = jnp.stack([(idx // W).astype(jnp.float32),
                        (idx % W).astype(jnp.float32)], axis=0)     # (2, HW)

    # down_conv (Pallas A): channel-major, bf16 MXU feed, f32 out
    x_flat = x_nchw.reshape(N, cin0, HW).astype(jnp.bfloat16)
    feat = down_conv(x_flat, coords, prep['down']['w'], prep['down']['b'],
                     prep['down']['alpha'], H=H, W=W)               # (N,in_dim,HW)

    # conv5 branch: adaptive avg-pool -> 1x1 conv (Pallas B) -> bilinear up
    Ph = adaptive_pool_matrix(H, pool_size)
    Pw = adaptive_pool_matrix(W, pool_size)
    feat4 = feat.reshape(N, in_dim, H, W)
    pooled = jnp.einsum('ph,qw,nchw->ncpq', Ph, Pw, feat4)
    pooled = pooled.reshape(N, in_dim, pool_size * pool_size).astype(jnp.bfloat16)
    c5 = pointwise_conv_prelu(pooled, prep['conv5']['w'], prep['conv5']['b'],
                              prep['conv5']['alpha'])               # (N,dd,P*P)
    Bh = bilinear_matrix(pool_size, H)
    Bw = bilinear_matrix(pool_size, W)
    c5 = c5.reshape(N, dd, pool_size, pool_size)
    c5_up = jnp.einsum('hp,wq,ncpq->nchw', Bh, Bw, c5)              # (N,dd,H,W)
    c5_flat = c5_up.reshape(N, dd, HW).astype(jnp.bfloat16)

    # conv1..conv4 + conv5 merge + fuse, all fused in one Pallas call (C)
    out = branches_fuse(feat.astype(jnp.bfloat16), c5_flat, coords,
                        prep['wb'], prep['bb'], prep['wf'], prep['bf'],
                        prep['alphas'], H=H, W=W)                   # (N,in_dim,HW)
    return out.reshape(N, in_dim, H, W)


if __name__ == "__main__":
    key = jax.random.PRNGKey(0)
    dim, in_dim = 4, 8                                    # PAFEM(dim=4, in_dim=8)
    down_dim = in_dim // 2
    N, H, W = 2, 16, 16

    keys = jax.random.split(key, 8)
    raw = dict(
        down=init_conv_block(keys[0], dim, in_dim, 3),
        conv1=init_conv_block(keys[1], in_dim, down_dim, 1),
        conv2=init_conv_block(keys[2], in_dim, down_dim, 3),
        conv3=init_conv_block(keys[3], in_dim, down_dim, 3),
        conv4=init_conv_block(keys[4], in_dim, down_dim, 3),
        conv5=init_conv_block(keys[5], in_dim, down_dim, 1),
        fuse=init_conv_block(keys[6], 5 * down_dim, in_dim, 1),
    )
    prep = prepare_params(raw)
    x = jax.random.normal(keys[7], (N, dim, H, W), jnp.float32)

    out = jax.jit(pafem_forward)(x, prep)
    jax.block_until_ready(out)
    assert out.shape == (N, in_dim, H, W), out.shape
    assert bool(jnp.all(jnp.isfinite(out)))
    print("KERNEL_OK")
</pallas_src>

<mosaic_0001>
module attributes {stable_mosaic.version = 11 : i64} {
  func.func private @main(%arg0: i32) attributes {dimension_semantics = [#tpu.dimension_semantics<core_parallel>], iteration_bounds = array<i64: 2>, tpu.core_type = #tpu.core_type<sc_scalar_subcore>, window_params = []} {
    return
  }
}

module attributes {stable_mosaic.version = 11 : i64} {
  func.func private @main(%arg0: i32) attributes {dimension_semantics = [#tpu.dimension_semantics<core_parallel>], iteration_bounds = array<i64: 2>, tpu.core_type = #tpu.core_type<sc_scalar_subcore>, window_params = []} {
    return
  }
}

module attributes {stable_mosaic.version = 11 : i64} {
  func.func @kernel(%arg0: i32, %arg1: memref<1x4x290xbf16, #tpu.memory_space<vmem>>, %arg2: memref<2x256xf32, #tpu.memory_space<vmem>>, %arg3: memref<9x8x4xbf16, #tpu.memory_space<vmem>>, %arg4: memref<8x1xf32, #tpu.memory_space<vmem>>, %arg5: memref<1xf32, #tpu.memory_space<smem>>, %arg6: memref<1x8x256xf32, #tpu.memory_space<vmem>>) attributes {dimension_semantics = [#tpu.dimension_semantics<parallel>], iteration_bounds = array<i64: 2>, scalar_prefetch = 0 : i64, scratch_operands = 0 : i64, tpu.core_type = #tpu.core_type<tc>, window_params = [{transform_indices = @transform_0, window_bounds = array<i64: 1, 4, 290>}, {pipeline_mode = #tpu.pipeline_mode<synchronous>, transform_indices = @transform_1, window_bounds = array<i64: 2, 256>}, {pipeline_mode = #tpu.pipeline_mode<synchronous>, transform_indices = @transform_2, window_bounds = array<i64: 9, 8, 4>}, {pipeline_mode = #tpu.pipeline_mode<synchronous>, transform_indices = @transform_3, window_bounds = array<i64: 8, 1>}, {transform_indices = @transform_4, window_bounds = array<i64: 1>}, {transform_indices = @transform_5, window_bounds = array<i64: 1, 8, 256>}]} {
    %c0 = arith.constant 0 : index
    %c0_0 = arith.constant 0 : index
    %0 = vector.load %arg2[%c0, %c0_0] : memref<2x256xf32, #tpu.memory_space<vmem>>, vector<1x256xf32>
    %c1 = arith.constant 1 : index
    %c0_1 = arith.constant 0 : index
    %1 = vector.load %arg2[%c1, %c0_1] : memref<2x256xf32, #tpu.memory_space<vmem>>, vector<1x256xf32>
    %c0_2 = arith.constant 0 : index
    %c0_3 = arith.constant 0 : index
    %c0_4 = arith.constant 0 : index
    %2 = vector.load %arg1[%c0_2, %c0_3, %c0_4] : memref<1x4x290xbf16, #tpu.memory_space<vmem>>, vector<1x4x256xbf16>
    %3 = vector.shape_cast %2 : vector<1x4x256xbf16> to vector<4x256xbf16>
    %c0_5 = arith.constant 0 : index
    %c0_6 = arith.constant 0 : index
    %c0_7 = arith.constant 0 : index
    %4 = vector.load %arg3[%c0_5, %c0_6, %c0_7] : memref<9x8x4xbf16, #tpu.memory_space<vmem>>, vector<1x8x4xbf16>
    %5 = vector.shape_cast %4 : vector<1x8x4xbf16> to vector<8x4xbf16>
    %cst = arith.constant dense<0.000000e+00> : vector<8x256xf32>
    %6 = tpu.matmul %5, %3, %cst {dimension_numbers = #tpu.dot_dimension_numbers<[1], [0], [0], [1], [0, 0, 1, 1], [], []>} : vector<8x4xbf16>, vector<4x256xbf16>, vector<8x256xf32> -> vector<8x256xf32>
    %cst_8 = arith.constant -1.000000e+00 : f32
    %7 = vector.broadcast %cst_8 : f32 to vector<1x256xf32>
    %8 = arith.addf %0, %7 : vector<1x256xf32>
    %cst_9 = arith.constant 0.000000e+00 : f32
    %9 = vector.broadcast %cst_9 : f32 to vector<1x256xf32>
    %10 = arith.cmpf oge, %8, %9 : vector<1x256xf32>
    %cst_10 = arith.constant -1.000000e+00 : f32
    %11 = vector.broadcast %cst_10 : f32 to vector<1x256xf32>
    %12 = arith.addf %0, %11 : vector<1x256xf32>
    %cst_11 = arith.constant 1.500000e+01 : f32
    %13 = vector.broadcast %cst_11 : f32 to vector<1x256xf32>
    %14 = arith.cmpf ole, %12, %13 : vector<1x256xf32>
    %15 = arith.andi %10, %14 : vector<1x256xi1>
    %cst_12 = arith.constant -1.000000e+00 : f32
    %16 = vector.broadcast %cst_12 : f32 to vector<1x256xf32>
    %17 = arith.addf %1, %16 : vector<1x256xf32>
    %cst_13 = arith.constant 0.000000e+00 : f32
    %18 = vector.broadcast %cst_13 : f32 to vector<1x256xf32>
    %19 = arith.cmpf oge, %17, %18 : vector<1x256xf32>
    %20 = arith.andi %15, %19 : vector<1x256xi1>
    %cst_14 = arith.constant -1.000000e+00 : f32
    %21 = vector.broadcast %cst_14 : f32 to vector<1x256xf32>
    %22 = arith.addf %1, %21 : vector<1x256xf32>
    %cst_15 = arith.constant 1.500000e+01 : f32
    %23 = vector.broadcast %cst_15 : f32 to vector<1x256xf32>
    %24 = arith.cmpf ole, %22, %23 : vector<1x256xf32>
    %25 = arith.andi %20, %24 : vector<1x256xi1>
    %cst_16 = arith.constant 0.000000e+00 : f32
    %26 = vector.shape_cast %25 : vector<1x256xi1> to vector<1x256xi1>
    %27 = vector.broadcast %26 : vector<1x256xi1> to vector<8x256xi1>
    %28 = vector.broadcast %cst_16 : f32 to vector<8x256xf32>
    %29 = arith.select %27, %6, %28 : vector<8x256xi1>, vector<8x256xf32>
    %c0_17 = arith.constant 0 : index
    %c0_18 = arith.constant 0 : index
    %c1_19 = arith.constant 1 : index
    %30 = vector.load %arg1[%c0_17, %c0_18, %c1_19] : memref<1x4x290xbf16, #tpu.memory_space<vmem>>, vector<1x4x256xbf16>
    %31 = vector.shape_cast %30 : vector<1x4x256xbf16> to vector<4x256xbf16>
    %c1_20 = arith.constant 1 : index
    %c0_21 = arith.constant 0 : index
    %c0_22 = arith.constant 0 : index
    %32 = vector.load %arg3[%c1_20, %c0_21, %c0_22] : memref<9x8x4xbf16, #tpu.memory_space<vmem>>, vector<1x8x4xbf16>
    %33 = vector.shape_cast %32 : vector<1x8x4xbf16> to vector<8x4xbf16>
    %cst_23 = arith.constant dense<0.000000e+00> : vector<8x256xf32>
    %34 = tpu.matmul %33, %31, %cst_23 {dimension_numbers = #tpu.dot_dimension_numbers<[1], [0], [0], [1], [0, 0, 1, 1], [], []>} : vector<8x4xbf16>, vector<4x256xbf16>, vector<8x256xf32> -> vector<8x256xf32>
    %cst_24 = arith.constant -1.000000e+00 : f32
    %35 = vector.broadcast %cst_24 : f32 to vector<1x256xf32>
    %36 = arith.addf %0, %35 : vector<1x256xf32>
    %cst_25 = arith.constant 0.000000e+00 : f32
    %37 = vector.broadcast %cst_25 : f32 to vector<1x256xf32>
    %38 = arith.cmpf oge, %36, %37 : vector<1x256xf32>
    %cst_26 = arith.constant -1.000000e+00 : f32
    %39 = vector.broadcast %cst_26 : f32 to vector<1x256xf32>
    %40 = arith.addf %0, %39 : vector<1x256xf32>
    %cst_27 = arith.constant 1.500000e+01 : f32
    %41 = vector.broadcast %cst_27 : f32 to vector<1x256xf32>
    %42 = arith.cmpf ole, %40, %41 : vector<1x256xf32>
    %43 = arith.andi %38, %42 : vector<1x256xi1>
    %cst_28 = arith.constant 0.000000e+00 : f32
    %44 = vector.broadcast %cst_28 : f32 to vector<1x256xf32>
    %45 = arith.addf %1, %44 : vector<1x256xf32>
    %cst_29 = arith.constant 0.000000e+00 : f32
    %46 = vector.broadcast %cst_29 : f32 to vector<1x256xf32>
    %47 = arith.cmpf oge, %45, %46 : vector<1x256xf32>
    %48 = arith.andi %43, %47 : vector<1x256xi1>
    %cst_30 = arith.constant 0.000000e+00 : f32
    %49 = vector.broadcast %cst_30 : f32 to vector<1x256xf32>
    %50 = arith.addf %1, %49 : vector<1x256xf32>
    %cst_31 = arith.constant 1.500000e+01 : f32
    %51 = vector.broadcast %cst_31 : f32 to vector<1x256xf32>
    %52 = arith.cmpf ole, %50, %51 : vector<1x256xf32>
    %53 = arith.andi %48, %52 : vector<1x256xi1>
    %cst_32 = arith.constant 0.000000e+00 : f32
    %54 = vector.shape_cast %53 : vector<1x256xi1> to vector<1x256xi1>
    %55 = vector.broadcast %54 : vector<1x256xi1> to vector<8x256xi1>
    %56 = vector.broadcast %cst_32 : f32 to vector<8x256xf32>
    %57 = arith.select %55, %34, %56 : vector<8x256xi1>, vector<8x256xf32>
    %58 = arith.addf %29, %57 : vector<8x256xf32>
    %c0_33 = arith.constant 0 : index
    %c0_34 = arith.constant 0 : index
    %c2 = arith.constant 2 : index
    %59 = vector.load %arg1[%c0_33, %c0_34, %c2] : memref<1x4x290xbf16, #tpu.memory_space<vmem>>, vector<1x4x256xbf16>
    %60 = vector.shape_cast %59 : vector<1x4x256xbf16> to vector<4x256xbf16>
    %c2_35 = arith.constant 2 : index
    %c0_36 = arith.constant 0 : index
    %c0_37 = arith.constant 0 : index
    %61 = vector.load %arg3[%c2_35, %c0_36, %c0_37] : memref<9x8x4xbf16, #tpu.memory_space<vmem>>, vector<1x8x4xbf16>
    %62 = vector.shape_cast %61 : vector<1x8x4xbf16> to vector<8x4xbf16>
    %cst_38 = arith.constant dense<0.000000e+00> : vector<8x256xf32>
    %63 = tpu.matmul %62, %60, %cst_38 {dimension_numbers = #tpu.dot_dimension_numbers<[1], [0], [0], [1], [0, 0, 1, 1], [], []>} : vector<8x4xbf16>, vector<4x256xbf16>, vector<8x256xf32> -> vector<8x256xf32>
    %cst_39 = arith.constant -1.000000e+00 : f32
    %64 = vector.broadcast %cst_39 : f32 to vector<1x256xf32>
    %65 = arith.addf %0, %64 : vector<1x256xf32>
    %cst_40 = arith.constant 0.000000e+00 : f32
    %66 = vector.broadcast %cst_40 : f32 to vector<1x256xf32>
    %67 = arith.cmpf oge, %65, %66 : vector<1x256xf32>
    %cst_41 = arith.constant -1.000000e+00 : f32
    %68 = vector.broadcast %cst_41 : f32 to vector<1x256xf32>
    %69 = arith.addf %0, %68 : vector<1x256xf32>
    %cst_42 = arith.constant 1.500000e+01 : f32
    %70 = vector.broadcast %cst_42 : f32 to vector<1x256xf32>
    %71 = arith.cmpf ole, %69, %70 : vector<1x256xf32>
    %72 = arith.andi %67, %71 : vector<1x256xi1>
    %cst_43 = arith.constant 1.000000e+00 : f32
    %73 = vector.broadcast %cst_43 : f32 to vector<1x256xf32>
    %74 = arith.addf %1, %73 : vector<1x256xf32>
    %cst_44 = arith.constant 0.000000e+00 : f32
    %75 = vector.broadcast %cst_44 : f32 to vector<1x256xf32>
    %76 = arith.cmpf oge, %74, %75 : vector<1x256xf32>
    %77 = arith.andi %72, %76 : vector<1x256xi1>
    %cst_45 = arith.constant 1.000000e+00 : f32
    %78 = vector.broadcast %cst_45 : f32 to vector<1x256xf32>
    %79 = arith.addf %1, %78 : vector<1x256xf32>
    %cst_46 = arith.constant 1.500000e+01 : f32
    %80 = vector.broadcast %cst_46 : f32 to vector<1x256xf32>
    %81 = arith.cmpf ole, %79, %80 : vector<1x256xf32>
    %82 = arith.andi %77, %81 : vector<1x256xi1>
    %cst_47 = arith.constant 0.000000e+00 : f32
    %83 = vector.shape_cast %82 : vector<1x256xi1> to vector<1x256xi1>
    %84 = vector.broadcast %83 : vector<1x256xi1> to vector<8x256xi1>
    %85 = vector.broadcast %cst_47 : f32 to vector<8x256xf32>
    %86 = arith.select %84, %63, %85 : vector<8x256xi1>, vector<8x256xf32>
    %87 = arith.addf %58, %86 : vector<8x256xf32>
    %c0_48 = arith.constant 0 : index
    %c0_49 = arith.constant 0 : index
    %c16 = arith.constant 16 : index
    %88 = vector.load %arg1[%c0_48, %c0_49, %c16] : memref<1x4x290xbf16, #tpu.memory_space<vmem>>, vector<1x4x256xbf16>
    %89 = vector.shape_cast %88 : vector<1x4x256xbf16> to vector<4x256xbf16>
    %c3 = arith.constant 3 : index
    %c0_50 = arith.constant 0 : index
    %c0_51 = arith.constant 0 : index
    %90 = vector.load %arg3[%c3, %c0_50, %c0_51] : memref<9x8x4xbf16, #tpu.memory_space<vmem>>, vector<1x8x4xbf16>
    %91 = vector.shape_cast %90 : vector<1x8x4xbf16> to vector<8x4xbf16>
    %cst_52 = arith.constant dense<0.000000e+00> : vector<8x256xf32>
    %92 = tpu.matmul %91, %89, %cst_52 {dimension_numbers = #tpu.dot_dimension_numbers<[1], [0], [0], [1], [0, 0, 1, 1], [], []>} : vector<8x4xbf16>, vector<4x256xbf16>, vector<8x256xf32> -> vector<8x256xf32>
    %cst_53 = arith.constant 0.000000e+00 : f32
    %93 = vector.broadcast %cst_53 : f32 to vector<1x256xf32>
    %94 = arith.addf %0, %93 : vector<1x256xf32>
    %cst_54 = arith.constant 0.000000e+00 : f32
    %95 = vector.broadcast %cst_54 : f32 to vector<1x256xf32>
    %96 = arith.cmpf oge, %94, %95 : vector<1x256xf32>
    %cst_55 = arith.constant 0.000000e+00 : f32
    %97 = vector.broadcast %cst_55 : f32 to vector<1x256xf32>
    %98 = arith.addf %0, %97 : vector<1x256xf32>
    %cst_56 = arith.constant 1.500000e+01 : f32
    %99 = vector.broadcast %cst_56 : f32 to vector<1x256xf32>
    %100 = arith.cmpf ole, %98, %99 : vector<1x256xf32>
    %101 = arith.andi %96, %100 : vector<1x256xi1>
    %cst_57 = arith.constant -1.000000e+00 : f32
    %102 = vector.broadcast %cst_57 : f32 to vector<1x256xf32>
    %103 = arith.addf %1, %102 : vector<1x256xf32>
    %cst_58 = arith.constant 0.000000e+00 : f32
    %104 = vector.broadcast %cst_58 : f32 to vector<1x256xf32>
    %105 = arith.cmpf oge, %103, %104 : vector<1x256xf32>
    %106 = arith.andi %101, %105 : vector<1x256xi1>
    %cst_59 = arith.constant -1.000000e+00 : f32
    %107 = vector.broadcast %cst_59 : f32 to vector<1x256xf32>
    %108 = arith.addf %1, %107 : vector<1x256xf32>
    %cst_60 = arith.constant 1.500000e+01 : f32
    %109 = vector.broadcast %cst_60 : f32 to vector<1x256xf32>
    %110 = arith.cmpf ole, %108, %109 : vector<1x256xf32>
    %111 = arith.andi %106, %110 : vector<1x256xi1>
    %cst_61 = arith.constant 0.000000e+00 : f32
    %112 = vector.shape_cast %111 : vector<1x256xi1> to vector<1x256xi1>
    %113 = vector.broadcast %112 : vector<1x256xi1> to vector<8x256xi1>
    %114 = vector.broadcast %cst_61 : f32 to vector<8x256xf32>
    %115 = arith.select %113, %92, %114 : vector<8x256xi1>, vector<8x256xf32>
    %116 = arith.addf %87, %115 : vector<8x256xf32>
    %c0_62 = arith.constant 0 : index
    %c0_63 = arith.constant 0 : index
    %c17 = arith.constant 17 : index
    %117 = vector.load %arg1[%c0_62, %c0_63, %c17] : memref<1x4x290xbf16, #tpu.memory_space<vmem>>, vector<1x4x256xbf16>
    %118 = vector.shape_cast %117 : vector<1x4x256xbf16> to vector<4x256xbf16>
    %c4 = arith.constant 4 : index
    %c0_64 = arith.constant 0 : index
    %c0_65 = arith.constant 0 : index
    %119 = vector.load %arg3[%c4, %c0_64, %c0_65] : memref<9x8x4xbf16, #tpu.memory_space<vmem>>, vector<1x8x4xbf16>
    %120 = vector.shape_cast %119 : vector<1x8x4xbf16> to vector<8x4xbf16>
    %cst_66 = arith.constant dense<0.000000e+00> : vector<8x256xf32>
    %121 = tpu.matmul %120, %118, %cst_66 {dimension_numbers = #tpu.dot_dimension_numbers<[1], [0], [0], [1], [0, 0, 1, 1], [], []>} : vector<8x4xbf16>, vector<4x256xbf16>, vector<8x256xf32> -> vector<8x256xf32>
    %122 = arith.addf %116, %121 : vector<8x256xf32>
    %c0_67 = arith.constant 0 : index
    %c0_68 = arith.constant 0 : index
    %c18 = arith.constant 18 : index
    %123 = vector.load %arg1[%c0_67, %c0_68, %c18] : memref<1x4x290xbf16, #tpu.memory_space<vmem>>, vector<1x4x256xbf16>
    %124 = vector.shape_cast %123 : vector<1x4x256xbf16> to vector<4x256xbf16>
    %c5 = arith.constant 5 : index
    %c0_69 = arith.constant 0 : index
    %c0_70 = arith.constant 0 : index
    %125 = vector.load %arg3[%c5, %c0_69, %c0_70] : memref<9x8x4xbf16, #tpu.memory_space<vmem>>, vector<1x8x4xbf16>
    %126 = vector.shape_cast %125 : vector<1x8x4xbf16> to vector<8x4xbf16>
    %cst_71 = arith.constant dense<0.000000e+00> : vector<8x256xf32>
    %127 = tpu.matmul %126, %124, %cst_71 {dimension_numbers = #tpu.dot_dimension_numbers<[1], [0], [0], [1], [0, 0, 1, 1], [], []>} : vector<8x4xbf16>, vector<4x256xbf16>, vector<8x256xf32> -> vector<8x256xf32>
    %cst_72 = arith.constant 0.000000e+00 : f32
    %128 = vector.broadcast %cst_72 : f32 to vector<1x256xf32>
    %129 = arith.addf %0, %128 : vector<1x256xf32>
    %cst_73 = arith.constant 0.000000e+00 : f32
    %130 = vector.broadcast %cst_73 : f32 to vector<1x256xf32>
    %131 = arith.cmpf oge, %129, %130 : vector<1x256xf32>
    %cst_74 = arith.constant 0.000000e+00 : f32
    %132 = vector.broadcast %cst_74 : f32 to vector<1x256xf32>
    %133 = arith.addf %0, %132 : vector<1x256xf32>
    %cst_75 = arith.constant 1.500000e+01 : f32
    %134 = vector.broadcast %cst_75 : f32 to vector<1x256xf32>
    %135 = arith.cmpf ole, %133, %134 : vector<1x256xf32>
    %136 = arith.andi %131, %135 : vector<1x256xi1>
    %cst_76 = arith.constant 1.000000e+00 : f32
    %137 = vector.broadcast %cst_76 : f32 to vector<1x256xf32>
    %138 = arith.addf %1, %137 : vector<1x256xf32>
    %cst_77 = arith.constant 0.000000e+00 : f32
    %139 = vector.broadcast %cst_77 : f32 to vector<1x256xf32>
    %140 = arith.cmpf oge, %138, %139 : vector<1x256xf32>
    %141 = arith.andi %136, %140 : vector<1x256xi1>
    %cst_78 = arith.constant 1.000000e+00 : f32
    %142 = vector.broadcast %cst_78 : f32 to vector<1x256xf32>
    %143 = arith.addf %1, %142 : vector<1x256xf32>
    %cst_79 = arith.constant 1.500000e+01 : f32
    %144 = vector.broadcast %cst_79 : f32 to vector<1x256xf32>
    %145 = arith.cmpf ole, %143, %144 : vector<1x256xf32>
    %146 = arith.andi %141, %145 : vector<1x256xi1>
    %cst_80 = arith.constant 0.000000e+00 : f32
    %147 = vector.shape_cast %146 : vector<1x256xi1> to vector<1x256xi1>
    %148 = vector.broadcast %147 : vector<1x256xi1> to vector<8x256xi1>
    %149 = vector.broadcast %cst_80 : f32 to vector<8x256xf32>
    %150 = arith.select %148, %127, %149 : vector<8x256xi1>, vector<8x256xf32>
    %151 = arith.addf %122, %150 : vector<8x256xf32>
    %c0_81 = arith.constant 0 : index
    %c0_82 = arith.constant 0 : index
    %c32 = arith.constant 32 : index
    %152 = vector.load %arg1[%c0_81, %c0_82, %c32] : memref<1x4x290xbf16, #tpu.memory_space<vmem>>, vector<1x4x256xbf16>
    %153 = vector.shape_cast %152 : vector<1x4x256xbf16> to vector<4x256xbf16>
    %c6 = arith.constant 6 : index
    %c0_83 = arith.constant 0 : index
    %c0_84 = arith.constant 0 : index
    %154 = vector.load %arg3[%c6, %c0_83, %c0_84] : memref<9x8x4xbf16, #tpu.memory_space<vmem>>, vector<1x8x4xbf16>
    %155 = vector.shape_cast %154 : vector<1x8x4xbf16> to vector<8x4xbf16>
    %cst_85 = arith.constant dense<0.000000e+00> : vector<8x256xf32>
    %156 = tpu.matmul %155, %153, %cst_85 {dimension_numbers = #tpu.dot_dimension_numbers<[1], [0], [0], [1], [0, 0, 1, 1], [], []>} : vector<8x4xbf16>, vector<4x256xbf16>, vector<8x256xf32> -> vector<8x256xf32>
    %cst_86 = arith.constant 1.000000e+00 : f32
    %157 = vector.broadcast %cst_86 : f32 to vector<1x256xf32>
    %158 = arith.addf %0, %157 : vector<1x256xf32>
    %cst_87 = arith.constant 0.000000e+00 : f32
    %159 = vector.broadcast %cst_87 : f32 to vector<1x256xf32>
    %160 = arith.cmpf oge, %158, %159 : vector<1x256xf32>
    %cst_88 = arith.constant 1.000000e+00 : f32
    %161 = vector.broadcast %cst_88 : f32 to vector<1x256xf32>
    %162 = arith.addf %0, %161 : vector<1x256xf32>
    %cst_89 = arith.constant 1.500000e+01 : f32
    %163 = vector.broadcast %cst_89 : f32 to vector<1x256xf32>
    %164 = arith.cmpf ole, %162, %163 : vector<1x256xf32>
    %165 = arith.andi %160, %164 : vector<1x256xi1>
    %cst_90 = arith.constant -1.000000e+00 : f32
    %166 = vector.broadcast %cst_90 : f32 to vector<1x256xf32>
    %167 = arith.addf %1, %166 : vector<1x256xf32>
    %cst_91 = arith.constant 0.000000e+00 : f32
    %168 = vector.broadcast %cst_91 : f32 to vector<1x256xf32>
    %169 = arith.cmpf oge, %167, %168 : vector<1x256xf32>
    %170 = arith.andi %165, %169 : vector<1x256xi1>
    %cst_92 = arith.constant -1.000000e+00 : f32
    %171 = vector.broadcast %cst_92 : f32 to vector<1x256xf32>
    %172 = arith.addf %1, %171 : vector<1x256xf32>
    %cst_93 = arith.constant 1.500000e+01 : f32
    %173 = vector.broadcast %cst_93 : f32 to vector<1x256xf32>
    %174 = arith.cmpf ole, %172, %173 : vector<1x256xf32>
    %175 = arith.andi %170, %174 : vector<1x256xi1>
    %cst_94 = arith.constant 0.000000e+00 : f32
    %176 = vector.shape_cast %175 : vector<1x256xi1> to vector<1x256xi1>
    %177 = vector.broadcast %176 : vector<1x256xi1> to vector<8x256xi1>
    %178 = vector.broadcast %cst_94 : f32 to vector<8x256xf32>
    %179 = arith.select %177, %156, %178 : vector<8x256xi1>, vector<8x256xf32>
    %180 = arith.addf %151, %179 : vector<8x256xf32>
    %c0_95 = arith.constant 0 : index
    %c0_96 = arith.constant 0 : index
    %c33 = arith.constant 33 : index
    %181 = vector.load %arg1[%c0_95, %c0_96, %c33] : memref<1x4x290xbf16, #tpu.memory_space<vmem>>, vector<1x4x256xbf16>
    %182 = vector.shape_cast %181 : vector<1x4x256xbf16> to vector<4x256xbf16>
    %c7 = arith.constant 7 : index
    %c0_97 = arith.constant 0 : index
    %c0_98 = arith.constant 0 : index
    %183 = vector.load %arg3[%c7, %c0_97, %c0_98] : memref<9x8x4xbf16, #tpu.memory_space<vmem>>, vector<1x8x4xbf16>
    %184 = vector.shape_cast %183 : vector<1x8x4xbf16> to vector<8x4xbf16>
    %cst_99 = arith.constant dense<0.000000e+00> : vector<8x256xf32>
    %185 = tpu.matmul %184, %182, %cst_99 {dimension_numbers = #tpu.dot_dimension_numbers<[1], [0], [0], [1], [0, 0, 1, 1], [], []>} : vector<8x4xbf16>, vector<4x256xbf16>, vector<8x256xf32> -> vector<8x256xf32>
    %cst_100 = arith.constant 1.000000e+00 : f32
    %186 = vector.broadcast %cst_100 : f32 to vector<1x256xf32>
    %187 = arith.addf %0, %186 : vector<1x256xf32>
    %cst_101 = arith.constant 0.000000e+00 : f32
    %188 = vector.broadcast %cst_101 : f32 to vector<1x256xf32>
    %189 = arith.cmpf oge, %187, %188 : vector<1x256xf32>
    %cst_102 = arith.constant 1.000000e+00 : f32
    %190 = vector.broadcast %cst_102 : f32 to vector<1x256xf32>
    %191 = arith.addf %0, %190 : vector<1x256xf32>
    %cst_103 = arith.constant 1.500000e+01 : f32
    %192 = vector.broadcast %cst_103 : f32 to vector<1x256xf32>
    %193 = arith.cmpf ole, %191, %192 : vector<1x256xf32>
    %194 = arith.andi %189, %193 : vector<1x256xi1>
    %cst_104 = arith.constant 0.000000e+00 : f32
    %195 = vector.broadcast %cst_104 : f32 to vector<1x256xf32>
    %196 = arith.addf %1, %195 : vector<1x256xf32>
    %cst_105 = arith.constant 0.000000e+00 : f32
    %197 = vector.broadcast %cst_105 : f32 to vector<1x256xf32>
    %198 = arith.cmpf oge, %196, %197 : vector<1x256xf32>
    %199 = arith.andi %194, %198 : vector<1x256xi1>
    %cst_106 = arith.constant 0.000000e+00 : f32
    %200 = vector.broadcast %cst_106 : f32 to vector<1x256xf32>
    %201 = arith.addf %1, %200 : vector<1x256xf32>
    %cst_107 = arith.constant 1.500000e+01 : f32
    %202 = vector.broadcast %cst_107 : f32 to vector<1x256xf32>
    %203 = arith.cmpf ole, %201, %202 : vector<1x256xf32>
    %204 = arith.andi %199, %203 : vector<1x256xi1>
    %cst_108 = arith.constant 0.000000e+00 : f32
    %205 = vector.shape_cast %204 : vector<1x256xi1> to vector<1x256xi1>
    %206 = vector.broadcast %205 : vector<1x256xi1> to vector<8x256xi1>
    %207 = vector.broadcast %cst_108 : f32 to vector<8x256xf32>
    %208 = arith.select %206, %185, %207 : vector<8x256xi1>, vector<8x256xf32>
    %209 = arith.addf %180, %208 : vector<8x256xf32>
    %c0_109 = arith.constant 0 : index
    %c0_110 = arith.constant 0 : index
    %c34 = arith.constant 34 : index
    %210 = vector.load %arg1[%c0_109, %c0_110, %c34] : memref<1x4x290xbf16, #tpu.memory_space<vmem>>, vector<1x4x256xbf16>
    %211 = vector.shape_cast %210 : vector<1x4x256xbf16> to vector<4x256xbf16>
    %c8 = arith.constant 8 : index
    %c0_111 = arith.constant 0 : index
    %c0_112 = arith.constant 0 : index
    %212 = vector.load %arg3[%c8, %c0_111, %c0_112] : memref<9x8x4xbf16, #tpu.memory_space<vmem>>, vector<1x8x4xbf16>
    %213 = vector.shape_cast %212 : vector<1x8x4xbf16> to vector<8x4xbf16>
    %cst_113 = arith.constant dense<0.000000e+00> : vector<8x256xf32>
    %214 = tpu.matmul %213, %211, %cst_113 {dimension_numbers = #tpu.dot_dimension_numbers<[1], [0], [0], [1], [0, 0, 1, 1], [], []>} : vector<8x4xbf16>, vector<4x256xbf16>, vector<8x256xf32> -> vector<8x256xf32>
    %cst_114 = arith.constant 1.000000e+00 : f32
    %215 = vector.broadcast %cst_114 : f32 to vector<1x256xf32>
    %216 = arith.addf %0, %215 : vector<1x256xf32>
    %cst_115 = arith.constant 0.000000e+00 : f32
    %217 = vector.broadcast %cst_115 : f32 to vector<1x256xf32>
    %218 = arith.cmpf oge, %216, %217 : vector<1x256xf32>
    %cst_116 = arith.constant 1.000000e+00 : f32
    %219 = vector.broadcast %cst_116 : f32 to vector<1x256xf32>
    %220 = arith.addf %0, %219 : vector<1x256xf32>
    %cst_117 = arith.constant 1.500000e+01 : f32
    %221 = vector.broadcast %cst_117 : f32 to vector<1x256xf32>
    %222 = arith.cmpf ole, %220, %221 : vector<1x256xf32>
    %223 = arith.andi %218, %222 : vector<1x256xi1>
    %cst_118 = arith.constant 1.000000e+00 : f32
    %224 = vector.broadcast %cst_118 : f32 to vector<1x256xf32>
    %225 = arith.addf %1, %224 : vector<1x256xf32>
    %cst_119 = arith.constant 0.000000e+00 : f32
    %226 = vector.broadcast %cst_119 : f32 to vector<1x256xf32>
    %227 = arith.cmpf oge, %225, %226 : vector<1x256xf32>
    %228 = arith.andi %223, %227 : vector<1x256xi1>
    %cst_120 = arith.constant 1.000000e+00 : f32
    %229 = vector.broadcast %cst_120 : f32 to vector<1x256xf32>
    %230 = arith.addf %1, %229 : vector<1x256xf32>
    %cst_121 = arith.constant 1.500000e+01 : f32
    %231 = vector.broadcast %cst_121 : f32 to vector<1x256xf32>
    %232 = arith.cmpf ole, %230, %231 : vector<1x256xf32>
    %233 = arith.andi %228, %232 : vector<1x256xi1>
    %cst_122 = arith.constant 0.000000e+00 : f32
    %234 = vector.shape_cast %233 : vector<1x256xi1> to vector<1x256xi1>
    %235 = vector.broadcast %234 : vector<1x256xi1> to vector<8x256xi1>
    %236 = vector.broadcast %cst_122 : f32 to vector<8x256xf32>
    %237 = arith.select %235, %214, %236 : vector<8x256xi1>, vector<8x256xf32>
    %238 = arith.addf %209, %237 : vector<8x256xf32>
    %c0_123 = arith.constant 0 : index
    %c0_124 = arith.constant 0 : index
    %239 = vector.load %arg4[%c0_123, %c0_124] : memref<8x1xf32, #tpu.memory_space<vmem>>, vector<8x1xf32>
    %240 = vector.broadcast %239 : vector<8x1xf32> to vector<8x256xf32>
    %241 = arith.addf %238, %240 : vector<8x256xf32>
    %c0_125 = arith.constant 0 : index
    %242 = memref.load %arg5[%c0_125] : memref<1xf32, #tpu.memory_space<smem>>
    %cst_126 = arith.constant 0.000000e+00 : f32
    %243 = vector.broadcast %cst_126 : f32 to vector<8x256xf32>
    %244 = arith.cmpf oge, %241, %243 : vector<8x256xf32>
    %245 = vector.broadcast %242 : f32 to vector<8x256xf32>
    %246 = arith.mulf %245, %241 : vector<8x256xf32>
    %247 = arith.select %244, %241, %246 : vector<8x256xi1>, vector<8x256xf32>
    %c0_127 = arith.constant 0 : index
    %c0_128 = arith.constant 0 : index
    %c0_129 = arith.constant 0 : index
    %248 = vector.load %arg6[%c0_127, %c0_128, %c0_129] : memref<1x8x256xf32, #tpu.memory_space<vmem>>, vector<1x8x256xf32>
    %249 = vector.shape_cast %248 : vector<1x8x256xf32> to vector<8x256xf32>
    %250 = vector.shape_cast %247 : vector<8x256xf32> to vector<1x8x256xf32>
    tpu.vector_store %arg6[%c0_127, %c0_128, %c0_129], %250 {strides = array<i32>} : memref<1x8x256xf32, #tpu.memory_space<vmem>>, vector<1x8x256xf32>,
    return
  }
  func.func @transform_0(%arg0: i32) -> (i32, i32, i32) {
    %c0_i32 = arith.constant 0 : i32
    %c0_i32_0 = arith.constant 0 : i32
    %c0_i32_1 = arith.constant 0 : i32
    return %arg0, %c0_i32, %c0_i32_0 : i32, i32, i32
  }
  func.func @transform_1(%arg0: i32) -> (i32, i32) {
    %c0_i32 = arith.constant 0 : i32
    %c0_i32_0 = arith.constant 0 : i32
    %c0_i32_1 = arith.constant 0 : i32
    return %c0_i32, %c0_i32_0 : i32, i32
  }
  func.func @transform_2(%arg0: i32) -> (i32, i32, i32) {
    %c0_i32 = arith.constant 0 : i32
    %c0_i32_0 = arith.constant 0 : i32
    %c0_i32_1 = arith.constant 0 : i32
    %c0_i32_2 = arith.constant 0 : i32
    return %c0_i32, %c0_i32_0, %c0_i32_1 : i32, i32, i32
  }
  func.func @transform_3(%arg0: i32) -> (i32, i32) {
    %c0_i32 = arith.constant 0 : i32
    %c0_i32_0 = arith.constant 0 : i32
    %c0_i32_1 = arith.constant 0 : i32
    return %c0_i32, %c0_i32_0 : i32, i32
  }
  func.func @transform_4(%arg0: i32) -> i32 {
    %c0_i32 = arith.constant 0 : i32
    %c0_i32_0 = arith.constant 0 : i32
    return %c0_i32 : i32
  }
  func.func @transform_5(%arg0: i32) -> (i32, i32, i32) {
    %c0_i32 = arith.constant 0 : i32
    %c0_i32_0 = arith.constant 0 : i32
    %c0_i32_1 = arith.constant 0 : i32
    return %arg0, %c0_i32, %c0_i32_0 : i32, i32, i32
  }
}

module attributes {stable_mosaic.version = 11 : i64} {
  func.func @_pointwise_kernel(%arg0: i32, %arg1: i32, %arg2: memref<1x8x2048xbf16, #tpu.memory_space<vmem>>, %arg3: memref<4x8xbf16, #tpu.memory_space<vmem>>, %arg4: memref<4x1xf32, #tpu.memory_space<vmem>>, %arg5: memref<1xf32, #tpu.memory_space<smem>>, %arg6: memref<1x4x2048xf32, #tpu.memory_space<vmem>>) attributes {dimension_semantics = [#tpu.dimension_semantics<parallel>, #tpu.dimension_semantics<parallel>], iteration_bounds = array<i64: 2, 8>, scalar_prefetch = 0 : i64, scratch_operands = 0 : i64, tpu.core_type = #tpu.core_type<tc>, window_params = [{transform_indices = @transform_0, window_bounds = array<i64: 1, 8, 2048>}, {pipeline_mode = #tpu.pipeline_mode<synchronous>, transform_indices = @transform_1, window_bounds = array<i64: 4, 8>}, {pipeline_mode = #tpu.pipeline_mode<synchronous>, transform_indices = @transform_2, window_bounds = array<i64: 4, 1>}, {transform_indices = @transform_3, window_bounds = array<i64: 1>}, {transform_indices = @transform_4, window_bounds = array<i64: 1, 4, 2048>}]} {
    %c0 = arith.constant 0 : index
    %c0_0 = arith.constant 0 : index
    %0 = vector.load %arg3[%c0, %c0_0] : memref<4x8xbf16, #tpu.memory_space<vmem>>, vector<4x8xbf16>
    %c0_1 = arith.constant 0 : index
    %c0_2 = arith.constant 0 : index
    %c0_3 = arith.constant 0 : index
    %1 = vector.load %arg2[%c0_1, %c0_2, %c0_3] : memref<1x8x2048xbf16, #tpu.memory_space<vmem>>, vector<1x8x2048xbf16>
    %2 = vector.shape_cast %1 : vector<1x8x2048xbf16> to vector<8x2048xbf16>
    %cst = arith.constant dense<0.000000e+00> : vector<4x2048xf32>
    %3 = tpu.matmul %0, %2, %cst {dimension_numbers = #tpu.dot_dimension_numbers<[1], [0], [0], [1], [0, 0, 1, 1], [], []>} : vector<4x8xbf16>, vector<8x2048xbf16>, vector<4x2048xf32> -> vector<4x2048xf32>
    %c0_4 = arith.constant 0 : index
    %c0_5 = arith.constant 0 : index
    %4 = vector.load %arg4[%c0_4, %c0_5] : memref<4x1xf32, #tpu.memory_space<vmem>>, vector<4x1xf32>
    %5 = vector.broadcast %4 : vector<4x1xf32> to vector<4x2048xf32>
    %6 = arith.addf %3, %5 : vector<4x2048xf32>
    %c0_6 = arith.constant 0 : index
    %7 = memref.load %arg5[%c0_6] : memref<1xf32, #tpu.memory_space<smem>>
    %cst_7 = arith.constant 0.000000e+00 : f32
    %8 = vector.broadcast %cst_7 : f32 to vector<4x2048xf32>
    %9 = arith.cmpf oge, %6, %8 : vector<4x2048xf32>
    %10 = vector.broadcast %7 : f32 to vector<4x2048xf32>
    %11 = arith.mulf %10, %6 : vector<4x2048xf32>
    %12 = arith.select %9, %6, %11 : vector<4x2048xi1>, vector<4x2048xf32>
    %c0_8 = arith.constant 0 : index
    %c0_9 = arith.constant 0 : index
    %c0_10 = arith.constant 0 : index
    %13 = vector.load %arg6[%c0_8, %c0_9, %c0_10] : memref<1x4x2048xf32, #tpu.memory_space<vmem>>, vector<1x4x2048xf32>
    %14 = vector.shape_cast %13 : vector<1x4x2048xf32> to vector<4x2048xf32>
    %15 = vector.shape_cast %12 : vector<4x2048xf32> to vector<1x4x2048xf32>
    tpu.vector_store %arg6[%c0_8, %c0_9, %c0_10], %15 {strides = array<i32>} : memref<1x4x2048xf32, #tpu.memory_space<vmem>>, vector<1x4x2048xf32>,
    return
  }
  func.func @transform_0(%arg0: i32, %arg1: i32) -> (i32, i32, i32) {
    %c0_i32 = arith.constant 0 : i32
    %c0_i32_0 = arith.constant 0 : i32
    return %arg0, %c0_i32, %arg1 : i32, i32, i32
  }
  func.func @transform_1(%arg0: i32, %arg1: i32) -> (i32, i32) {
    %c0_i32 = arith.constant 0 : i32
    %c0_i32_0 = arith.constant 0 : i32
    %c0_i32_1 = arith.constant 0 : i32
    return %c0_i32, %c0_i32_0 : i32, i32
  }
  func.func @transform_2(%arg0: i32, %arg1: i32) -> (i32, i32) {
    %c0_i32 = arith.constant 0 : i32
    %c0_i32_0 = arith.constant 0 : i32
    %c0_i32_1 = arith.constant 0 : i32
    return %c0_i32, %c0_i32_0 : i32, i32
  }
  func.func @transform_3(%arg0: i32, %arg1: i32) -> i32 {
    %c0_i32 = arith.constant 0 : i32
    %c0_i32_0 = arith.constant 0 : i32
    return %c0_i32 : i32
  }
  func.func @transform_4(%arg0: i32, %arg1: i32) -> (i32, i32, i32) {
    %c0_i32 = arith.constant 0 : i32
    %c0_i32_0 = arith.constant 0 : i32
    return %arg0, %c0_i32, %arg1 : i32, i32, i32
  }
}

module attributes {stable_mosaic.version = 11 : i64} {
  func.func @kernel(%arg0: i32, %arg1: memref<1x8x460xbf16, #tpu.memory_space<vmem>>, %arg2: memref<1x4x256xbf16, #tpu.memory_space<vmem>>, %arg3: memref<2x256xf32, #tpu.memory_space<vmem>>, %arg4: memref<28x4x8xbf16, #tpu.memory_space<vmem>>, %arg5: memref<4x4x1xf32, #tpu.memory_space<vmem>>, %arg6: memref<5x8x4xbf16, #tpu.memory_space<vmem>>, %arg7: memref<8x1xf32, #tpu.memory_space<vmem>>, %arg8: memref<8xf32, #tpu.memory_space<smem>>, %arg9: memref<1x8x256xf32, #tpu.memory_space<vmem>>) attributes {dimension_semantics = [#tpu.dimension_semantics<parallel>], iteration_bounds = array<i64: 2>, scalar_prefetch = 0 : i64, scratch_operands = 0 : i64, tpu.core_type = #tpu.core_type<tc>, window_params = [{transform_indices = @transform_0, window_bounds = array<i64: 1, 8, 460>}, {transform_indices = @transform_1, window_bounds = array<i64: 1, 4, 256>}, {pipeline_mode = #tpu.pipeline_mode<synchronous>, transform_indices = @transform_2, window_bounds = array<i64: 2, 256>}, {pipeline_mode = #tpu.pipeline_mode<synchronous>, transform_indices = @transform_3, window_bounds = array<i64: 28, 4, 8>}, {pipeline_mode = #tpu.pipeline_mode<synchronous>, transform_indices = @transform_4, window_bounds = array<i64: 4, 4, 1>}, {pipeline_mode = #tpu.pipeline_mode<synchronous>, transform_indices = @transform_5, window_bounds = array<i64: 5, 8, 4>}, {pipeline_mode = #tpu.pipeline_mode<synchronous>, transform_indices = @transform_6, window_bounds = array<i64: 8, 1>}, {transform_indices = @transform_7, window_bounds = array<i64: 8>}, {transform_indices = @transform_8, window_bounds = array<i64: 1, 8, 256>}]} {
    %c0 = arith.constant 0 : index
    %c0_0 = arith.constant 0 : index
    %0 = vector.load %arg3[%c0, %c0_0] : memref<2x256xf32, #tpu.memory_space<vmem>>, vector<1x256xf32>
    %c1 = arith.constant 1 : index
    %c0_1 = arith.constant 0 : index
    %1 = vector.load %arg3[%c1, %c0_1] : memref<2x256xf32, #tpu.memory_space<vmem>>, vector<1x256xf32>
    %cst = arith.constant 0.000000e+00 : f32
    %2 = vector.broadcast %cst : f32 to vector<8x256xf32>
    %c0_2 = arith.constant 0 : index
    %c0_3 = arith.constant 0 : index
    %c102 = arith.constant 102 : index
    %3 = vector.load %arg1[%c0_2, %c0_3, %c102] : memref<1x8x460xbf16, #tpu.memory_space<vmem>>, vector<1x8x256xbf16>
    %4 = vector.shape_cast %3 : vector<1x8x256xbf16> to vector<8x256xbf16>
    %c0_4 = arith.constant 0 : index
    %c0_5 = arith.constant 0 : index
    %c0_6 = arith.constant 0 : index
    %5 = vector.load %arg4[%c0_4, %c0_5, %c0_6] : memref<28x4x8xbf16, #tpu.memory_space<vmem>>, vector<1x4x8xbf16>
    %6 = vector.shape_cast %5 : vector<1x4x8xbf16> to vector<4x8xbf16>
    %cst_7 = arith.constant dense<0.000000e+00> : vector<4x256xf32>
    %7 = tpu.matmul %6, %4, %cst_7 {dimension_numbers = #tpu.dot_dimension_numbers<[1], [0], [0], [1], [0, 0, 1, 1], [], []>} : vector<4x8xbf16>, vector<8x256xbf16>, vector<4x256xf32> -> vector<4x256xf32>
    %c0_8 = arith.constant 0 : index
    %c0_9 = arith.constant 0 : index
    %c0_10 = arith.constant 0 : index
    %8 = vector.load %arg5[%c0_8, %c0_9, %c0_10] : memref<4x4x1xf32, #tpu.memory_space<vmem>>, vector<1x4x1xf32>
    %9 = vector.shape_cast %8 : vector<1x4x1xf32> to vector<4x1xf32>
    %10 = vector.broadcast %9 : vector<4x1xf32> to vector<4x256xf32>
    %11 = arith.addf %7, %10 : vector<4x256xf32>
    %c0_11 = arith.constant 0 : index
    %12 = memref.load %arg8[%c0_11] : memref<8xf32, #tpu.memory_space<smem>>
    %cst_12 = arith.constant 0.000000e+00 : f32
    %13 = vector.broadcast %cst_12 : f32 to vector<4x256xf32>
    %14 = arith.cmpf oge, %11, %13 : vector<4x256xf32>
    %15 = vector.broadcast %12 : f32 to vector<4x256xf32>
    %16 = arith.mulf %15, %11 : vector<4x256xf32>
    %17 = arith.select %14, %11, %16 : vector<4x256xi1>, vector<4x256xf32>
    %18 = arith.truncf %17 : vector<4x256xf32> to vector<4x256xbf16>
    %c0_13 = arith.constant 0 : index
    %c0_14 = arith.constant 0 : index
    %c0_15 = arith.constant 0 : index
    %19 = vector.load %arg6[%c0_13, %c0_14, %c0_15] : memref<5x8x4xbf16, #tpu.memory_space<vmem>>, vector<1x8x4xbf16>
    %20 = vector.shape_cast %19 : vector<1x8x4xbf16> to vector<8x4xbf16>
    %cst_16 = arith.constant dense<0.000000e+00> : vector<8x256xf32>
    %21 = tpu.matmul %20, %18, %cst_16 {dimension_numbers = #tpu.dot_dimension_numbers<[1], [0], [0], [1], [0, 0, 1, 1], [], []>} : vector<8x4xbf16>, vector<4x256xbf16>, vector<8x256xf32> -> vector<8x256xf32>
    %22 = arith.addf %2, %21 : vector<8x256xf32>
    %c0_17 = arith.constant 0 : index
    %c0_18 = arith.constant 0 : index
    %c68 = arith.constant 68 : index
    %23 = vector.load %arg1[%c0_17, %c0_18, %c68] : memref<1x8x460xbf16, #tpu.memory_space<vmem>>, vector<1x8x256xbf16>
    %24 = vector.shape_cast %23 : vector<1x8x256xbf16> to vector<8x256xbf16>
    %c1_19 = arith.constant 1 : index
    %c0_20 = arith.constant 0 : index
    %c0_21 = arith.constant 0 : index
    %25 = vector.load %arg4[%c1_19, %c0_20, %c0_21] : memref<28x4x8xbf16, #tpu.memory_space<vmem>>, vector<1x4x8xbf16>
    %26 = vector.shape_cast %25 : vector<1x4x8xbf16> to vector<4x8xbf16>
    %cst_22 = arith.constant dense<0.000000e+00> : vector<4x256xf32>
    %27 = tpu.matmul %26, %24, %cst_22 {dimension_numbers = #tpu.dot_dimension_numbers<[1], [0], [0], [1], [0, 0, 1, 1], [], []>} : vector<4x8xbf16>, vector<8x256xbf16>, vector<4x256xf32> -> vector<4x256xf32>
    %cst_23 = arith.constant -2.000000e+00 : f32
    %28 = vector.broadcast %cst_23 : f32 to vector<1x256xf32>
    %29 = arith.addf %0, %28 : vector<1x256xf32>
    %cst_24 = arith.constant 0.000000e+00 : f32
    %30 = vector.broadcast %cst_24 : f32 to vector<1x256xf32>
    %31 = arith.cmpf oge, %29, %30 : vector<1x256xf32>
    %cst_25 = arith.constant -2.000000e+00 : f32
    %32 = vector.broadcast %cst_25 : f32 to vector<1x256xf32>
    %33 = arith.addf %0, %32 : vector<1x256xf32>
    %cst_26 = arith.constant 1.500000e+01 : f32
    %34 = vector.broadcast %cst_26 : f32 to vector<1x256xf32>
    %35 = arith.cmpf ole, %33, %34 : vector<1x256xf32>
    %36 = arith.andi %31, %35 : vector<1x256xi1>
    %cst_27 = arith.constant -2.000000e+00 : f32
    %37 = vector.broadcast %cst_27 : f32 to vector<1x256xf32>
    %38 = arith.addf %1, %37 : vector<1x256xf32>
    %cst_28 = arith.constant 0.000000e+00 : f32
    %39 = vector.broadcast %cst_28 : f32 to vector<1x256xf32>
    %40 = arith.cmpf oge, %38, %39 : vector<1x256xf32>
    %41 = arith.andi %36, %40 : vector<1x256xi1>
    %cst_29 = arith.constant -2.000000e+00 : f32
    %42 = vector.broadcast %cst_29 : f32 to vector<1x256xf32>
    %43 = arith.addf %1, %42 : vector<1x256xf32>
    %cst_30 = arith.constant 1.500000e+01 : f32
    %44 = vector.broadcast %cst_30 : f32 to vector<1x256xf32>
    %45 = arith.cmpf ole, %43, %44 : vector<1x256xf32>
    %46 = arith.andi %41, %45 : vector<1x256xi1>
    %cst_31 = arith.constant 0.000000e+00 : f32
    %47 = vector.shape_cast %46 : vector<1x256xi1> to vector<1x256xi1>
    %48 = vector.broadcast %47 : vector<1x256xi1> to vector<4x256xi1>
    %49 = vector.broadcast %cst_31 : f32 to vector<4x256xf32>
    %50 = arith.select %48, %27, %49 : vector<4x256xi1>, vector<4x256xf32>
    %c0_32 = arith.constant 0 : index
    %c0_33 = arith.constant 0 : index
    %c70 = arith.constant 70 : index
    %51 = vector.load %arg1[%c0_32, %c0_33, %c70] : memref<1x8x460xbf16, #tpu.memory_space<vmem>>, vector<1x8x256xbf16>
    %52 = vector.shape_cast %51 : vector<1x8x256xbf16> to vector<8x256xbf16>
    %c2 = arith.constant 2 : index
    %c0_34 = arith.constant 0 : index
    %c0_35 = arith.constant 0 : index
    %53 = vector.load %arg4[%c2, %c0_34, %c0_35] : memref<28x4x8xbf16, #tpu.memory_space<vmem>>, vector<1x4x8xbf16>
    %54 = vector.shape_cast %53 : vector<1x4x8xbf16> to vector<4x8xbf16>
    %cst_36 = arith.constant dense<0.000000e+00> : vector<4x256xf32>
    %55 = tpu.matmul %54, %52, %cst_36 {dimension_numbers = #tpu.dot_dimension_numbers<[1], [0], [0], [1], [0, 0, 1, 1], [], []>} : vector<4x8xbf16>, vector<8x256xbf16>, vector<4x256xf32> -> vector<4x256xf32>
    %cst_37 = arith.constant -2.000000e+00 : f32
    %56 = vector.broadcast %cst_37 : f32 to vector<1x256xf32>
    %57 = arith.addf %0, %56 : vector<1x256xf32>
    %cst_38 = arith.constant 0.000000e+00 : f32
    %58 = vector.broadcast %cst_38 : f32 to vector<1x256xf32>
    %59 = arith.cmpf oge, %57, %58 : vector<1x256xf32>
    %cst_39 = arith.constant -2.000000e+00 : f32
    %60 = vector.broadcast %cst_39 : f32 to vector<1x256xf32>
    %61 = arith.addf %0, %60 : vector<1x256xf32>
    %cst_40 = arith.constant 1.500000e+01 : f32
    %62 = vector.broadcast %cst_40 : f32 to vector<1x256xf32>
    %63 = arith.cmpf ole, %61, %62 : vector<1x256xf32>
    %64 = arith.andi %59, %63 : vector<1x256xi1>
    %cst_41 = arith.constant 0.000000e+00 : f32
    %65 = vector.broadcast %cst_41 : f32 to vector<1x256xf32>
    %66 = arith.addf %1, %65 : vector<1x256xf32>
    %cst_42 = arith.constant 0.000000e+00 : f32
    %67 = vector.broadcast %cst_42 : f32 to vector<1x256xf32>
    %68 = arith.cmpf oge, %66, %67 : vector<1x256xf32>
    %69 = arith.andi %64, %68 : vector<1x256xi1>
    %cst_43 = arith.constant 0.000000e+00 : f32
    %70 = vector.broadcast %cst_43 : f32 to vector<1x256xf32>
    %71 = arith.addf %1, %70 : vector<1x256xf32>
    %cst_44 = arith.constant 1.500000e+01 : f32
    %72 = vector.broadcast %cst_44 : f32 to vector<1x256xf32>
    %73 = arith.cmpf ole, %71, %72 : vector<1x256xf32>
    %74 = arith.andi %69, %73 : vector<1x256xi1>
    %cst_45 = arith.constant 0.000000e+00 : f32
    %75 = vector.shape_cast %74 : vector<1x256xi1> to vector<1x256xi1>
    %76 = vector.broadcast %75 : vector<1x256xi1> to vector<4x256xi1>
    %77 = vector.broadcast %cst_45 : f32 to vector<4x256xf32>
    %78 = arith.select %76, %55, %77 : vector<4x256xi1>, vector<4x256xf32>
    %79 = arith.addf %50, %78 : vector<4x256xf32>
    %c0_46 = arith.constant 0 : index
    %c0_47 = arith.constant 0 : index
    %c72 = arith.constant 72 : index
    %80 = vector.load %arg1[%c0_46, %c0_47, %c72] : memref<1x8x460xbf16, #tpu.memory_space<vmem>>, vector<1x8x256xbf16>
    %81 = vector.shape_cast %80 : vector<1x8x256xbf16> to vector<8x256xbf16>
    %c3 = arith.constant 3 : index
    %c0_48 = arith.constant 0 : index
    %c0_49 = arith.constant 0 : index
    %82 = vector.load %arg4[%c3, %c0_48, %c0_49] : memref<28x4x8xbf16, #tpu.memory_space<vmem>>, vector<1x4x8xbf16>
    %83 = vector.shape_cast %82 : vector<1x4x8xbf16> to vector<4x8xbf16>
    %cst_50 = arith.constant dense<0.000000e+00> : vector<4x256xf32>
    %84 = tpu.matmul %83, %81, %cst_50 {dimension_numbers = #tpu.dot_dimension_numbers<[1], [0], [0], [1], [0, 0, 1, 1], [], []>} : vector<4x8xbf16>, vector<8x256xbf16>, vector<4x256xf32> -> vector<4x256xf32>
    %cst_51 = arith.constant -2.000000e+00 : f32
    %85 = vector.broadcast %cst_51 : f32 to vector<1x256xf32>
    %86 = arith.addf %0, %85 : vector<1x256xf32>
    %cst_52 = arith.constant 0.000000e+00 : f32
    %87 = vector.broadcast %cst_52 : f32 to vector<1x256xf32>
    %88 = arith.cmpf oge, %86, %87 : vector<1x256xf32>
    %cst_53 = arith.constant -2.000000e+00 : f32
    %89 = vector.broadcast %cst_53 : f32 to vector<1x256xf32>
    %90 = arith.addf %0, %89 : vector<1x256xf32>
    %cst_54 = arith.constant 1.500000e+01 : f32
    %91 = vector.broadcast %cst_54 : f32 to vector<1x256xf32>
    %92 = arith.cmpf ole, %90, %91 : vector<1x256xf32>
    %93 = arith.andi %88, %92 : vector<1x256xi1>
    %cst_55 = arith.constant 2.000000e+00 : f32
    %94 = vector.broadcast %cst_55 : f32 to vector<1x256xf32>
    %95 = arith.addf %1, %94 : vector<1x256xf32>
    %cst_56 = arith.constant 0.000000e+00 : f32
    %96 = vector.broadcast %cst_56 : f32 to vector<1x256xf32>
    %97 = arith.cmpf oge, %95, %96 : vector<1x256xf32>
    %98 = arith.andi %93, %97 : vector<1x256xi1>
    %cst_57 = arith.constant 2.000000e+00 : f32
    %99 = vector.broadcast %cst_57 : f32 to vector<1x256xf32>
    %100 = arith.addf %1, %99 : vector<1x256xf32>
    %cst_58 = arith.constant 1.500000e+01 : f32
    %101 = vector.broadcast %cst_58 : f32 to vector<1x256xf32>
    %102 = arith.cmpf ole, %100, %101 : vector<1x256xf32>
    %103 = arith.andi %98, %102 : vector<1x256xi1>
    %cst_59 = arith.constant 0.000000e+00 : f32
    %104 = vector.shape_cast %103 : vector<1x256xi1> to vector<1x256xi1>
    %105 = vector.broadcast %104 : vector<1x256xi1> to vector<4x256xi1>
    %106 = vector.broadcast %cst_59 : f32 to vector<4x256xf32>
    %107 = arith.select %105, %84, %106 : vector<4x256xi1>, vector<4x256xf32>
    %108 = arith.addf %79, %107 : vector<4x256xf32>
    %c0_60 = arith.constant 0 : index
    %c0_61 = arith.constant 0 : index
    %c100 = arith.constant 100 : index
    %109 = vector.load %arg1[%c0_60, %c0_61, %c100] : memref<1x8x460xbf16, #tpu.memory_space<vmem>>, vector<1x8x256xbf16>
    %110 = vector.shape_cast %109 : vector<1x8x256xbf16> to vector<8x256xbf16>
    %c4 = arith.constant 4 : index
    %c0_62 = arith.constant 0 : index
    %c0_63 = arith.constant 0 : index
    %111 = vector.load %arg4[%c4, %c0_62, %c0_63] : memref<28x4x8xbf16, #tpu.memory_space<vmem>>, vector<1x4x8xbf16>
    %112 = vector.shape_cast %111 : vector<1x4x8xbf16> to vector<4x8xbf16>
    %cst_64 = arith.constant dense<0.000000e+00> : vector<4x256xf32>
    %113 = tpu.matmul %112, %110, %cst_64 {dimension_numbers = #tpu.dot_dimension_numbers<[1], [0], [0], [1], [0, 0, 1, 1], [], []>} : vector<4x8xbf16>, vector<8x256xbf16>, vector<4x256xf32> -> vector<4x256xf32>
    %cst_65 = arith.constant 0.000000e+00 : f32
    %114 = vector.broadcast %cst_65 : f32 to vector<1x256xf32>
    %115 = arith.addf %0, %114 : vector<1x256xf32>
    %cst_66 = arith.constant 0.000000e+00 : f32
    %116 = vector.broadcast %cst_66 : f32 to vector<1x256xf32>
    %117 = arith.cmpf oge, %115, %116 : vector<1x256xf32>
    %cst_67 = arith.constant 0.000000e+00 : f32
    %118 = vector.broadcast %cst_67 : f32 to vector<1x256xf32>
    %119 = arith.addf %0, %118 : vector<1x256xf32>
    %cst_68 = arith.constant 1.500000e+01 : f32
    %120 = vector.broadcast %cst_68 : f32 to vector<1x256xf32>
    %121 = arith.cmpf ole, %119, %120 : vector<1x256xf32>
    %122 = arith.andi %117, %121 : vector<1x256xi1>
    %cst_69 = arith.constant -2.000000e+00 : f32
    %123 = vector.broadcast %cst_69 : f32 to vector<1x256xf32>
    %124 = arith.addf %1, %123 : vector<1x256xf32>
    %cst_70 = arith.constant 0.000000e+00 : f32
    %125 = vector.broadcast %cst_70 : f32 to vector<1x256xf32>
    %126 = arith.cmpf oge, %124, %125 : vector<1x256xf32>
    %127 = arith.andi %122, %126 : vector<1x256xi1>
    %cst_71 = arith.constant -2.000000e+00 : f32
    %128 = vector.broadcast %cst_71 : f32 to vector<1x256xf32>
    %129 = arith.addf %1, %128 : vector<1x256xf32>
    %cst_72 = arith.constant 1.500000e+01 : f32
    %130 = vector.broadcast %cst_72 : f32 to vector<1x256xf32>
    %131 = arith.cmpf ole, %129, %130 : vector<1x256xf32>
    %132 = arith.andi %127, %131 : vector<1x256xi1>
    %cst_73 = arith.constant 0.000000e+00 : f32
    %133 = vector.shape_cast %132 : vector<1x256xi1> to vector<1x256xi1>
    %134 = vector.broadcast %133 : vector<1x256xi1> to vector<4x256xi1>
    %135 = vector.broadcast %cst_73 : f32 to vector<4x256xf32>
    %136 = arith.select %134, %113, %135 : vector<4x256xi1>, vector<4x256xf32>
    %137 = arith.addf %108, %136 : vector<4x256xf32>
    %c0_74 = arith.constant 0 : index
    %c0_75 = arith.constant 0 : index
    %c102_76 = arith.constant 102 : index
    %138 = vector.load %arg1[%c0_74, %c0_75, %c102_76] : memref<1x8x460xbf16, #tpu.memory_space<vmem>>, vector<1x8x256xbf16>
    %139 = vector.shape_cast %138 : vector<1x8x256xbf16> to vector<8x256xbf16>
    %c5 = arith.constant 5 : index
    %c0_77 = arith.constant 0 : index
    %c0_78 = arith.constant 0 : index
    %140 = vector.load %arg4[%c5, %c0_77, %c0_78] : memref<28x4x8xbf16, #tpu.memory_space<vmem>>, vector<1x4x8xbf16>
    %141 = vector.shape_cast %140 : vector<1x4x8xbf16> to vector<4x8xbf16>
    %cst_79 = arith.constant dense<0.000000e+00> : vector<4x256xf32>
    %142 = tpu.matmul %141, %139, %cst_79 {dimension_numbers = #tpu.dot_dimension_numbers<[1], [0], [0], [1], [0, 0, 1, 1], [], []>} : vector<4x8xbf16>, vector<8x256xbf16>, vector<4x256xf32> -> vector<4x256xf32>
    %143 = arith.addf %137, %142 : vector<4x256xf32>
    %c0_80 = arith.constant 0 : index
    %c0_81 = arith.constant 0 : index
    %c104 = arith.constant 104 : index
    %144 = vector.load %arg1[%c0_80, %c0_81, %c104] : memref<1x8x460xbf16, #tpu.memory_space<vmem>>, vector<1x8x256xbf16>
    %145 = vector.shape_cast %144 : vector<1x8x256xbf16> to vector<8x256xbf16>
    %c6 = arith.constant 6 : index
    %c0_82 = arith.constant 0 : index
    %c0_83 = arith.constant 0 : index
    %146 = vector.load %arg4[%c6, %c0_82, %c0_83] : memref<28x4x8xbf16, #tpu.memory_space<vmem>>, vector<1x4x8xbf16>
    %147 = vector.shape_cast %146 : vector<1x4x8xbf16> to vector<4x8xbf16>
    %cst_84 = arith.constant dense<0.000000e+00> : vector<4x256xf32>
    %148 = tpu.matmul %147, %145, %cst_84 {dimension_numbers = #tpu.dot_dimension_numbers<[1], [0], [0], [1], [0, 0, 1, 1], [], []>} : vector<4x8xbf16>, vector<8x256xbf16>, vector<4x256xf32> -> vector<4x256xf32>
    %cst_85 = arith.constant 0.000000e+00 : f32
    %149 = vector.broadcast %cst_85 : f32 to vector<1x256xf32>
    %150 = arith.addf %0, %149 : vector<1x256xf32>
    %cst_86 = arith.constant 0.000000e+00 : f32
    %151 = vector.broadcast %cst_86 : f32 to vector<1x256xf32>
    %152 = arith.cmpf oge, %150, %151 : vector<1x256xf32>
    %cst_87 = arith.constant 0.000000e+00 : f32
    %153 = vector.broadcast %cst_87 : f32 to vector<1x256xf32>
    %154 = arith.addf %0, %153 : vector<1x256xf32>
    %cst_88 = arith.constant 1.500000e+01 : f32
    %155 = vector.broadcast %cst_88 : f32 to vector<1x256xf32>
    %156 = arith.cmpf ole, %154, %155 : vector<1x256xf32>
    %157 = arith.andi %152, %156 : vector<1x256xi1>
    %cst_89 = arith.constant 2.000000e+00 : f32
    %158 = vector.broadcast %cst_89 : f32 to vector<1x256xf32>
    %159 = arith.addf %1, %158 : vector<1x256xf32>
    %cst_90 = arith.constant 0.000000e+00 : f32
    %160 = vector.broadcast %cst_90 : f32 to vector<1x256xf32>
    %161 = arith.cmpf oge, %159, %160 : vector<1x256xf32>
    %162 = arith.andi %157, %161 : vector<1x256xi1>
    %cst_91 = arith.constant 2.000000e+00 : f32
    %163 = vector.broadcast %cst_91 : f32 to vector<1x256xf32>
    %164 = arith.addf %1, %163 : vector<1x256xf32>
    %cst_92 = arith.constant 1.500000e+01 : f32
    %165 = vector.broadcast %cst_92 : f32 to vector<1x256xf32>
    %166 = arith.cmpf ole, %164, %165 : vector<1x256xf32>
    %167 = arith.andi %162, %166 : vector<1x256xi1>
    %cst_93 = arith.constant 0.000000e+00 : f32
    %168 = vector.shape_cast %167 : vector<1x256xi1> to vector<1x256xi1>
    %169 = vector.broadcast %168 : vector<1x256xi1> to vector<4x256xi1>
    %170 = vector.broadcast %cst_93 : f32 to vector<4x256xf32>
    %171 = arith.select %169, %148, %170 : vector<4x256xi1>, vector<4x256xf32>
    %172 = arith.addf %143, %171 : vector<4x256xf32>
    %c0_94 = arith.constant 0 : index
    %c0_95 = arith.constant 0 : index
    %c132 = arith.constant 132 : index
    %173 = vector.load %arg1[%c0_94, %c0_95, %c132] : memref<1x8x460xbf16, #tpu.memory_space<vmem>>, vector<1x8x256xbf16>
    %174 = vector.shape_cast %173 : vector<1x8x256xbf16> to vector<8x256xbf16>
    %c7 = arith.constant 7 : index
    %c0_96 = arith.constant 0 : index
    %c0_97 = arith.constant 0 : index
    %175 = vector.load %arg4[%c7, %c0_96, %c0_97] : memref<28x4x8xbf16, #tpu.memory_space<vmem>>, vector<1x4x8xbf16>
    %176 = vector.shape_cast %175 : vector<1x4x8xbf16> to vector<4x8xbf16>
    %cst_98 = arith.constant dense<0.000000e+00> : vector<4x256xf32>
    %177 = tpu.matmul %176, %174, %cst_98 {dimension_numbers = #tpu.dot_dimension_numbers<[1], [0], [0], [1], [0, 0, 1, 1], [], []>} : vector<4x8xbf16>, vector<8x256xbf16>, vector<4x256xf32> -> vector<4x256xf32>
    %cst_99 = arith.constant 2.000000e+00 : f32
    %178 = vector.broadcast %cst_99 : f32 to vector<1x256xf32>
    %179 = arith.addf %0, %178 : vector<1x256xf32>
    %cst_100 = arith.constant 0.000000e+00 : f32
    %180 = vector.broadcast %cst_100 : f32 to vector<1x256xf32>
    %181 = arith.cmpf oge, %179, %180 : vector<1x256xf32>
    %cst_101 = arith.constant 2.000000e+00 : f32
    %182 = vector.broadcast %cst_101 : f32 to vector<1x256xf32>
    %183 = arith.addf %0, %182 : vector<1x256xf32>
    %cst_102 = arith.constant 1.500000e+01 : f32
    %184 = vector.broadcast %cst_102 : f32 to vector<1x256xf32>
    %185 = arith.cmpf ole, %183, %184 : vector<1x256xf32>
    %186 = arith.andi %181, %185 : vector<1x256xi1>
    %cst_103 = arith.constant -2.000000e+00 : f32
    %187 = vector.broadcast %cst_103 : f32 to vector<1x256xf32>
    %188 = arith.addf %1, %187 : vector<1x256xf32>
    %cst_104 = arith.constant 0.000000e+00 : f32
    %189 = vector.broadcast %cst_104 : f32 to vector<1x256xf32>
    %190 = arith.cmpf oge, %188, %189 : vector<1x256xf32>
    %191 = arith.andi %186, %190 : vector<1x256xi1>
    %cst_105 = arith.constant -2.000000e+00 : f32
    %192 = vector.broadcast %cst_105 : f32 to vector<1x256xf32>
    %193 = arith.addf %1, %192 : vector<1x256xf32>
    %cst_106 = arith.constant 1.500000e+01 : f32
    %194 = vector.broadcast %cst_106 : f32 to vector<1x256xf32>
    %195 = arith.cmpf ole, %193, %194 : vector<1x256xf32>
    %196 = arith.andi %191, %195 : vector<1x256xi1>
    %cst_107 = arith.constant 0.000000e+00 : f32
    %197 = vector.shape_cast %196 : vector<1x256xi1> to vector<1x256xi1>
    %198 = vector.broadcast %197 : vector<1x256xi1> to vector<4x256xi1>
    %199 = vector.broadcast %cst_107 : f32 to vector<4x256xf32>
    %200 = arith.select %198, %177, %199 : vector<4x256xi1>, vector<4x256xf32>
    %201 = arith.addf %172, %200 : vector<4x256xf32>
    %c0_108 = arith.constant 0 : index
    %c0_109 = arith.constant 0 : index
    %c134 = arith.constant 134 : index
    %202 = vector.load %arg1[%c0_108, %c0_109, %c134] : memref<1x8x460xbf16, #tpu.memory_space<vmem>>, vector<1x8x256xbf16>
    %203 = vector.shape_cast %202 : vector<1x8x256xbf16> to vector<8x256xbf16>
    %c8 = arith.constant 8 : index
    %c0_110 = arith.constant 0 : index
    %c0_111 = arith.constant 0 : index
    %204 = vector.load %arg4[%c8, %c0_110, %c0_111] : memref<28x4x8xbf16, #tpu.memory_space<vmem>>, vector<1x4x8xbf16>
    %205 = vector.shape_cast %204 : vector<1x4x8xbf16> to vector<4x8xbf16>
    %cst_112 = arith.constant dense<0.000000e+00> : vector<4x256xf32>
    %206 = tpu.matmul %205, %203, %cst_112 {dimension_numbers = #tpu.dot_dimension_numbers<[1], [0], [0], [1], [0, 0, 1, 1], [], []>} : vector<4x8xbf16>, vector<8x256xbf16>, vector<4x256xf32> -> vector<4x256xf32>
    %cst_113 = arith.constant 2.000000e+00 : f32
    %207 = vector.broadcast %cst_113 : f32 to vector<1x256xf32>
    %208 = arith.addf %0, %207 : vector<1x256xf32>
    %cst_114 = arith.constant 0.000000e+00 : f32
    %209 = vector.broadcast %cst_114 : f32 to vector<1x256xf32>
    %210 = arith.cmpf oge, %208, %209 : vector<1x256xf32>
    %cst_115 = arith.constant 2.000000e+00 : f32
    %211 = vector.broadcast %cst_115 : f32 to vector<1x256xf32>
    %212 = arith.addf %0, %211 : vector<1x256xf32>
    %cst_116 = arith.constant 1.500000e+01 : f32
    %213 = vector.broadcast %cst_116 : f32 to vector<1x256xf32>
    %214 = arith.cmpf ole, %212, %213 : vector<1x256xf32>
    %215 = arith.andi %210, %214 : vector<1x256xi1>
    %cst_117 = arith.constant 0.000000e+00 : f32
    %216 = vector.broadcast %cst_117 : f32 to vector<1x256xf32>
    %217 = arith.addf %1, %216 : vector<1x256xf32>
    %cst_118 = arith.constant 0.000000e+00 : f32
    %218 = vector.broadcast %cst_118 : f32 to vector<1x256xf32>
    %219 = arith.cmpf oge, %217, %218 : vector<1x256xf32>
    %220 = arith.andi %215, %219 : vector<1x256xi1>
    %cst_119 = arith.constant 0.000000e+00 : f32
    %221 = vector.broadcast %cst_119 : f32 to vector<1x256xf32>
    %222 = arith.addf %1, %221 : vector<1x256xf32>
    %cst_120 = arith.constant 1.500000e+01 : f32
    %223 = vector.broadcast %cst_120 : f32 to vector<1x256xf32>
    %224 = arith.cmpf ole, %222, %223 : vector<1x256xf32>
    %225 = arith.andi %220, %224 : vector<1x256xi1>
    %cst_121 = arith.constant 0.000000e+00 : f32
    %226 = vector.shape_cast %225 : vector<1x256xi1> to vector<1x256xi1>
    %227 = vector.broadcast %226 : vector<1x256xi1> to vector<4x256xi1>
    %228 = vector.broadcast %cst_121 : f32 to vector<4x256xf32>
    %229 = arith.select %227, %206, %228 : vector<4x256xi1>, vector<4x256xf32>
    %230 = arith.addf %201, %229 : vector<4x256xf32>
    %c0_122 = arith.constant 0 : index
    %c0_123 = arith.constant 0 : index
    %c136 = arith.constant 136 : index
    %231 = vector.load %arg1[%c0_122, %c0_123, %c136] : memref<1x8x460xbf16, #tpu.memory_space<vmem>>, vector<1x8x256xbf16>
    %232 = vector.shape_cast %231 : vector<1x8x256xbf16> to vector<8x256xbf16>
    %c9 = arith.constant 9 : index
    %c0_124 = arith.constant 0 : index
    %c0_125 = arith.constant 0 : index
    %233 = vector.load %arg4[%c9, %c0_124, %c0_125] : memref<28x4x8xbf16, #tpu.memory_space<vmem>>, vector<1x4x8xbf16>
    %234 = vector.shape_cast %233 : vector<1x4x8xbf16> to vector<4x8xbf16>
    %cst_126 = arith.constant dense<0.000000e+00> : vector<4x256xf32>
    %235 = tpu.matmul %234, %232, %cst_126 {dimension_numbers = #tpu.dot_dimension_numbers<[1], [0], [0], [1], [0, 0, 1, 1], [], []>} : vector<4x8xbf16>, vector<8x256xbf16>, vector<4x256xf32> -> vector<4x256xf32>
    %cst_127 = arith.constant 2.000000e+00 : f32
    %236 = vector.broadcast %cst_127 : f32 to vector<1x256xf32>
    %237 = arith.addf %0, %236 : vector<1x256xf32>
    %cst_128 = arith.constant 0.000000e+00 : f32
    %238 = vector.broadcast %cst_128 : f32 to vector<1x256xf32>
    %239 = arith.cmpf oge, %237, %238 : vector<1x256xf32>
    %cst_129 = arith.constant 2.000000e+00 : f32
    %240 = vector.broadcast %cst_129 : f32 to vector<1x256xf32>
    %241 = arith.addf %0, %240 : vector<1x256xf32>
    %cst_130 = arith.constant 1.500000e+01 : f32
    %242 = vector.broadcast %cst_130 : f32 to vector<1x256xf32>
    %243 = arith.cmpf ole, %241, %242 : vector<1x256xf32>
    %244 = arith.andi %239, %243 : vector<1x256xi1>
    %cst_131 = arith.constant 2.000000e+00 : f32
    %245 = vector.broadcast %cst_131 : f32 to vector<1x256xf32>
    %246 = arith.addf %1, %245 : vector<1x256xf32>
    %cst_132 = arith.constant 0.000000e+00 : f32
    %247 = vector.broadcast %cst_132 : f32 to vector<1x256xf32>
    %248 = arith.cmpf oge, %246, %247 : vector<1x256xf32>
    %249 = arith.andi %244, %248 : vector<1x256xi1>
    %cst_133 = arith.constant 2.000000e+00 : f32
    %250 = vector.broadcast %cst_133 : f32 to vector<1x256xf32>
    %251 = arith.addf %1, %250 : vector<1x256xf32>
    %cst_134 = arith.constant 1.500000e+01 : f32
    %252 = vector.broadcast %cst_134 : f32 to vector<1x256xf32>
    %253 = arith.cmpf ole, %251, %252 : vector<1x256xf32>
    %254 = arith.andi %249, %253 : vector<1x256xi1>
    %cst_135 = arith.constant 0.000000e+00 : f32
    %255 = vector.shape_cast %254 : vector<1x256xi1> to vector<1x256xi1>
    %256 = vector.broadcast %255 : vector<1x256xi1> to vector<4x256xi1>
    %257 = vector.broadcast %cst_135 : f32 to vector<4x256xf32>
    %258 = arith.select %256, %235, %257 : vector<4x256xi1>, vector<4x256xf32>
    %259 = arith.addf %230, %258 : vector<4x256xf32>
    %c1_136 = arith.constant 1 : index
    %c0_137 = arith.constant 0 : index
    %c0_138 = arith.constant 0 : index
    %260 = vector.load %arg5[%c1_136, %c0_137, %c0_138] : memref<4x4x1xf32, #tpu.memory_space<vmem>>, vector<1x4x1xf32>
    %261 = vector.shape_cast %260 : vector<1x4x1xf32> to vector<4x1xf32>
    %262 = vector.broadcast %261 : vector<4x1xf32> to vector<4x256xf32>
    %263 = arith.addf %259, %262 : vector<4x256xf32>
    %c1_139 = arith.constant 1 : index
    %264 = memref.load %arg8[%c1_139] : memref<8xf32, #tpu.memory_space<smem>>
    %cst_140 = arith.constant 0.000000e+00 : f32
    %265 = vector.broadcast %cst_140 : f32 to vector<4x256xf32>
    %266 = arith.cmpf oge, %263, %265 : vector<4x256xf32>
    %267 = vector.broadcast %264 : f32 to vector<4x256xf32>
    %268 = arith.mulf %267, %263 : vector<4x256xf32>
    %269 = arith.select %266, %263, %268 : vector<4x256xi1>, vector<4x256xf32>
    %270 = arith.truncf %269 : vector<4x256xf32> to vector<4x256xbf16>
    %c1_141 = arith.constant 1 : index
    %c0_142 = arith.constant 0 : index
    %c0_143 = arith.constant 0 : index
    %271 = vector.load %arg6[%c1_141, %c0_142, %c0_143] : memref<5x8x4xbf16, #tpu.memory_space<vmem>>, vector<1x8x4xbf16>
    %272 = vector.shape_cast %271 : vector<1x8x4xbf16> to vector<8x4xbf16>
    %cst_144 = arith.constant dense<0.000000e+00> : vector<8x256xf32>
    %273 = tpu.matmul %272, %270, %cst_144 {dimension_numbers = #tpu.dot_dimension_numbers<[1], [0], [0], [1], [0, 0, 1, 1], [], []>} : vector<8x4xbf16>, vector<4x256xbf16>, vector<8x256xf32> -> vector<8x256xf32>
    %274 = arith.addf %22, %273 : vector<8x256xf32>
    %c0_145 = arith.constant 0 : index
    %c0_146 = arith.constant 0 : index
    %c34 = arith.constant 34 : index
    %275 = vector.load %arg1[%c0_145, %c0_146, %c34] : memref<1x8x460xbf16, #tpu.memory_space<vmem>>, vector<1x8x256xbf16>
    %276 = vector.shape_cast %275 : vector<1x8x256xbf16> to vector<8x256xbf16>
    %c10 = arith.constant 10 : index
    %c0_147 = arith.constant 0 : index
    %c0_148 = arith.constant 0 : index
    %277 = vector.load %arg4[%c10, %c0_147, %c0_148] : memref<28x4x8xbf16, #tpu.memory_space<vmem>>, vector<1x4x8xbf16>
    %278 = vector.shape_cast %277 : vector<1x4x8xbf16> to vector<4x8xbf16>
    %cst_149 = arith.constant dense<0.000000e+00> : vector<4x256xf32>
    %279 = tpu.matmul %278, %276, %cst_149 {dimension_numbers = #tpu.dot_dimension_numbers<[1], [0], [0], [1], [0, 0, 1, 1], [], []>} : vector<4x8xbf16>, vector<8x256xbf16>, vector<4x256xf32> -> vector<4x256xf32>
    %cst_150 = arith.constant -4.000000e+00 : f32
    %280 = vector.broadcast %cst_150 : f32 to vector<1x256xf32>
    %281 = arith.addf %0, %280 : vector<1x256xf32>
    %cst_151 = arith.constant 0.000000e+00 : f32
    %282 = vector.broadcast %cst_151 : f32 to vector<1x256xf32>
    %283 = arith.cmpf oge, %281, %282 : vector<1x256xf32>
    %cst_152 = arith.constant -4.000000e+00 : f32
    %284 = vector.broadcast %cst_152 : f32 to vector<1x256xf32>
    %285 = arith.addf %0, %284 : vector<1x256xf32>
    %cst_153 = arith.constant 1.500000e+01 : f32
    %286 = vector.broadcast %cst_153 : f32 to vector<1x256xf32>
    %287 = arith.cmpf ole, %285, %286 : vector<1x256xf32>
    %288 = arith.andi %283, %287 : vector<1x256xi1>
    %cst_154 = arith.constant -4.000000e+00 : f32
    %289 = vector.broadcast %cst_154 : f32 to vector<1x256xf32>
    %290 = arith.addf %1, %289 : vector<1x256xf32>
    %cst_155 = arith.constant 0.000000e+00 : f32
    %291 = vector.broadcast %cst_155 : f32 to vector<1x256xf32>
    %292 = arith.cmpf oge, %290, %291 : vector<1x256xf32>
    %293 = arith.andi %288, %292 : vector<1x256xi1>
    %cst_156 = arith.constant -4.000000e+00 : f32
    %294 = vector.broadcast %cst_156 : f32 to vector<1x256xf32>
    %295 = arith.addf %1, %294 : vector<1x256xf32>
    %cst_157 = arith.constant 1.500000e+01 : f32
    %296 = vector.broadcast %cst_157 : f32 to vector<1x256xf32>
    %297 = arith.cmpf ole, %295, %296 : vector<1x256xf32>
    %298 = arith.andi %293, %297 : vector<1x256xi1>
    %cst_158 = arith.constant 0.000000e+00 : f32
    %299 = vector.shape_cast %298 : vector<1x256xi1> to vector<1x256xi1>
    %300 = vector.broadcast %299 : vector<1x256xi1> to vector<4x256xi1>
    %301 = vector.broadcast %cst_158 : f32 to vector<4x256xf32>
    %302 = arith.select %300, %279, %301 : vector<4x256xi1>, vector<4x256xf32>
    %c0_159 = arith.constant 0 : index
    %c0_160 = arith.constant 0 : index
    %c38 = arith.constant 38 : index
    %303 = vector.load %arg1[%c0_159, %c0_160, %c38] : memref<1x8x460xbf16, #tpu.memory_space<vmem>>, vector<1x8x256xbf16>
    %304 = vector.shape_cast %303 : vector<1x8x256xbf16> to vector<8x256xbf16>
    %c11 = arith.constant 11 : index
    %c0_161 = arith.constant 0 : index
    %c0_162 = arith.constant 0 : index
    %305 = vector.load %arg4[%c11, %c0_161, %c0_162] : memref<28x4x8xbf16, #tpu.memory_space<vmem>>, vector<1x4x8xbf16>
    %306 = vector.shape_cast %305 : vector<1x4x8xbf16> to vector<4x8xbf16>
    %cst_163 = arith.constant dense<0.000000e+00> : vector<4x256xf32>
    %307 = tpu.matmul %306, %304, %cst_163 {dimension_numbers = #tpu.dot_dimension_numbers<[1], [0], [0], [1], [0, 0, 1, 1], [], []>} : vector<4x8xbf16>, vector<8x256xbf16>, vector<4x256xf32> -> vector<4x256xf32>
    %cst_164 = arith.constant -4.000000e+00 : f32
    %308 = vector.broadcast %cst_164 : f32 to vector<1x256xf32>
    %309 = arith.addf %0, %308 : vector<1x256xf32>
    %cst_165 = arith.constant 0.000000e+00 : f32
    %310 = vector.broadcast %cst_165 : f32 to vector<1x256xf32>
    %311 = arith.cmpf oge, %309, %310 : vector<1x256xf32>
    %cst_166 = arith.constant -4.000000e+00 : f32
    %312 = vector.broadcast %cst_166 : f32 to vector<1x256xf32>
    %313 = arith.addf %0, %312 : vector<1x256xf32>
    %cst_167 = arith.constant 1.500000e+01 : f32
    %314 = vector.broadcast %cst_167 : f32 to vector<1x256xf32>
    %315 = arith.cmpf ole, %313, %314 : vector<1x256xf32>
    %316 = arith.andi %311, %315 : vector<1x256xi1>
    %cst_168 = arith.constant 0.000000e+00 : f32
    %317 = vector.broadcast %cst_168 : f32 to vector<1x256xf32>
    %318 = arith.addf %1, %317 : vector<1x256xf32>
    %cst_169 = arith.constant 0.000000e+00 : f32
    %319 = vector.broadcast %cst_169 : f32 to vector<1x256xf32>
    %320 = arith.cmpf oge, %318, %319 : vector<1x256xf32>
    %321 = arith.andi %316, %320 : vector<1x256xi1>
    %cst_170 = arith.constant 0.000000e+00 : f32
    %322 = vector.broadcast %cst_170 : f32 to vector<1x256xf32>
    %323 = arith.addf %1, %322 : vector<1x256xf32>
    %cst_171 = arith.constant 1.500000e+01 : f32
    %324 = vector.broadcast %cst_171 : f32 to vector<1x256xf32>
    %325 = arith.cmpf ole, %323, %324 : vector<1x256xf32>
    %326 = arith.andi %321, %325 : vector<1x256xi1>
    %cst_172 = arith.constant 0.000000e+00 : f32
    %327 = vector.shape_cast %326 : vector<1x256xi1> to vector<1x256xi1>
    %328 = vector.broadcast %327 : vector<1x256xi1> to vector<4x256xi1>
    %329 = vector.broadcast %cst_172 : f32 to vector<4x256xf32>
    %330 = arith.select %328, %307, %329 : vector<4x256xi1>, vector<4x256xf32>
    %331 = arith.addf %302, %330 : vector<4x256xf32>
    %c0_173 = arith.constant 0 : index
    %c0_174 = arith.constant 0 : index
    %c42 = arith.constant 42 : index
    %332 = vector.load %arg1[%c0_173, %c0_174, %c42] : memref<1x8x460xbf16, #tpu.memory_space<vmem>>, vector<1x8x256xbf16>
    %333 = vector.shape_cast %332 : vector<1x8x256xbf16> to vector<8x256xbf16>
    %c12 = arith.constant 12 : index
    %c0_175 = arith.constant 0 : index
    %c0_176 = arith.constant 0 : index
    %334 = vector.load %arg4[%c12, %c0_175, %c0_176] : memref<28x4x8xbf16, #tpu.memory_space<vmem>>, vector<1x4x8xbf16>
    %335 = vector.shape_cast %334 : vector<1x4x8xbf16> to vector<4x8xbf16>
    %cst_177 = arith.constant dense<0.000000e+00> : vector<4x256xf32>
    %336 = tpu.matmul %335, %333, %cst_177 {dimension_numbers = #tpu.dot_dimension_numbers<[1], [0], [0], [1], [0, 0, 1, 1], [], []>} : vector<4x8xbf16>, vector<8x256xbf16>, vector<4x256xf32> -> vector<4x256xf32>
    %cst_178 = arith.constant -4.000000e+00 : f32
    %337 = vector.broadcast %cst_178 : f32 to vector<1x256xf32>
    %338 = arith.addf %0, %337 : vector<1x256xf32>
    %cst_179 = arith.constant 0.000000e+00 : f32
    %339 = vector.broadcast %cst_179 : f32 to vector<1x256xf32>
    %340 = arith.cmpf oge, %338, %339 : vector<1x256xf32>
    %cst_180 = arith.constant -4.000000e+00 : f32
    %341 = vector.broadcast %cst_180 : f32 to vector<1x256xf32>
    %342 = arith.addf %0, %341 : vector<1x256xf32>
    %cst_181 = arith.constant 1.500000e+01 : f32
    %343 = vector.broadcast %cst_181 : f32 to vector<1x256xf32>
    %344 = arith.cmpf ole, %342, %343 : vector<1x256xf32>
    %345 = arith.andi %340, %344 : vector<1x256xi1>
    %cst_182 = arith.constant 4.000000e+00 : f32
    %346 = vector.broadcast %cst_182 : f32 to vector<1x256xf32>
    %347 = arith.addf %1, %346 : vector<1x256xf32>
    %cst_183 = arith.constant 0.000000e+00 : f32
    %348 = vector.broadcast %cst_183 : f32 to vector<1x256xf32>
    %349 = arith.cmpf oge, %347, %348 : vector<1x256xf32>
    %350 = arith.andi %345, %349 : vector<1x256xi1>
    %cst_184 = arith.constant 4.000000e+00 : f32
    %351 = vector.broadcast %cst_184 : f32 to vector<1x256xf32>
    %352 = arith.addf %1, %351 : vector<1x256xf32>
    %cst_185 = arith.constant 1.500000e+01 : f32
    %353 = vector.broadcast %cst_185 : f32 to vector<1x256xf32>
    %354 = arith.cmpf ole, %352, %353 : vector<1x256xf32>
    %355 = arith.andi %350, %354 : vector<1x256xi1>
    %cst_186 = arith.constant 0.000000e+00 : f32
    %356 = vector.shape_cast %355 : vector<1x256xi1> to vector<1x256xi1>
    %357 = vector.broadcast %356 : vector<1x256xi1> to vector<4x256xi1>
    %358 = vector.broadcast %cst_186 : f32 to vector<4x256xf32>
    %359 = arith.select %357, %336, %358 : vector<4x256xi1>, vector<4x256xf32>
    %360 = arith.addf %331, %359 : vector<4x256xf32>
    %c0_187 = arith.constant 0 : index
    %c0_188 = arith.constant 0 : index
    %c98 = arith.constant 98 : index
    %361 = vector.load %arg1[%c0_187, %c0_188, %c98] : memref<1x8x460xbf16, #tpu.memory_space<vmem>>, vector<1x8x256xbf16>
    %362 = vector.shape_cast %361 : vector<1x8x256xbf16> to vector<8x256xbf16>
    %c13 = arith.constant 13 : index
    %c0_189 = arith.constant 0 : index
    %c0_190 = arith.constant 0 : index
    %363 = vector.load %arg4[%c13, %c0_189, %c0_190] : memref<28x4x8xbf16, #tpu.memory_space<vmem>>, vector<1x4x8xbf16>
    %364 = vector.shape_cast %363 : vector<1x4x8xbf16> to vector<4x8xbf16>
    %cst_191 = arith.constant dense<0.000000e+00> : vector<4x256xf32>
    %365 = tpu.matmul %364, %362, %cst_191 {dimension_numbers = #tpu.dot_dimension_numbers<[1], [0], [0], [1], [0, 0, 1, 1], [], []>} : vector<4x8xbf16>, vector<8x256xbf16>, vector<4x256xf32> -> vector<4x256xf32>
    %cst_192 = arith.constant 0.000000e+00 : f32
    %366 = vector.broadcast %cst_192 : f32 to vector<1x256xf32>
    %367 = arith.addf %0, %366 : vector<1x256xf32>
    %cst_193 = arith.constant 0.000000e+00 : f32
    %368 = vector.broadcast %cst_193 : f32 to vector<1x256xf32>
    %369 = arith.cmpf oge, %367, %368 : vector<1x256xf32>
    %cst_194 = arith.constant 0.000000e+00 : f32
    %370 = vector.broadcast %cst_194 : f32 to vector<1x256xf32>
    %371 = arith.addf %0, %370 : vector<1x256xf32>
    %cst_195 = arith.constant 1.500000e+01 : f32
    %372 = vector.broadcast %cst_195 : f32 to vector<1x256xf32>
    %373 = arith.cmpf ole, %371, %372 : vector<1x256xf32>
    %374 = arith.andi %369, %373 : vector<1x256xi1>
    %cst_196 = arith.constant -4.000000e+00 : f32
    %375 = vector.broadcast %cst_196 : f32 to vector<1x256xf32>
    %376 = arith.addf %1, %375 : vector<1x256xf32>
    %cst_197 = arith.constant 0.000000e+00 : f32
    %377 = vector.broadcast %cst_197 : f32 to vector<1x256xf32>
    %378 = arith.cmpf oge, %376, %377 : vector<1x256xf32>
    %379 = arith.andi %374, %378 : vector<1x256xi1>
    %cst_198 = arith.constant -4.000000e+00 : f32
    %380 = vector.broadcast %cst_198 : f32 to vector<1x256xf32>
    %381 = arith.addf %1, %380 : vector<1x256xf32>
    %cst_199 = arith.constant 1.500000e+01 : f32
    %382 = vector.broadcast %cst_199 : f32 to vector<1x256xf32>
    %383 = arith.cmpf ole, %381, %382 : vector<1x256xf32>
    %384 = arith.andi %379, %383 : vector<1x256xi1>
    %cst_200 = arith.constant 0.000000e+00 : f32
    %385 = vector.shape_cast %384 : vector<1x256xi1> to vector<1x256xi1>
    %386 = vector.broadcast %385 : vector<1x256xi1> to vector<4x256xi1>
    %387 = vector.broadcast %cst_200 : f32 to vector<4x256xf32>
    %388 = arith.select %386, %365, %387 : vector<4x256xi1>, vector<4x256xf32>
    %389 = arith.addf %360, %388 : vector<4x256xf32>
    %c0_201 = arith.constant 0 : index
    %c0_202 = arith.constant 0 : index
    %c102_203 = arith.constant 102 : index
    %390 = vector.load %arg1[%c0_201, %c0_202, %c102_203] : memref<1x8x460xbf16, #tpu.memory_space<vmem>>, vector<1x8x256xbf16>
    %391 = vector.shape_cast %390 : vector<1x8x256xbf16> to vector<8x256xbf16>
    %c14 = arith.constant 14 : index
    %c0_204 = arith.constant 0 : index
    %c0_205 = arith.constant 0 : index
    %392 = vector.load %arg4[%c14, %c0_204, %c0_205] : memref<28x4x8xbf16, #tpu.memory_space<vmem>>, vector<1x4x8xbf16>
    %393 = vector.shape_cast %392 : vector<1x4x8xbf16> to vector<4x8xbf16>
    %cst_206 = arith.constant dense<0.000000e+00> : vector<4x256xf32>
    %394 = tpu.matmul %393, %391, %cst_206 {dimension_numbers = #tpu.dot_dimension_numbers<[1], [0], [0], [1], [0, 0, 1, 1], [], []>} : vector<4x8xbf16>, vector<8x256xbf16>, vector<4x256xf32> -> vector<4x256xf32>
    %395 = arith.addf %389, %394 : vector<4x256xf32>
    %c0_207 = arith.constant 0 : index
    %c0_208 = arith.constant 0 : index
    %c106 = arith.constant 106 : index
    %396 = vector.load %arg1[%c0_207, %c0_208, %c106] : memref<1x8x460xbf16, #tpu.memory_space<vmem>>, vector<1x8x256xbf16>
    %397 = vector.shape_cast %396 : vector<1x8x256xbf16> to vector<8x256xbf16>
    %c15 = arith.constant 15 : index
    %c0_209 = arith.constant 0 : index
    %c0_210 = arith.constant 0 : index
    %398 = vector.load %arg4[%c15, %c0_209, %c0_210] : memref<28x4x8xbf16, #tpu.memory_space<vmem>>, vector<1x4x8xbf16>
    %399 = vector.shape_cast %398 : vector<1x4x8xbf16> to vector<4x8xbf16>
    %cst_211 = arith.constant dense<0.000000e+00> : vector<4x256xf32>
    %400 = tpu.matmul %399, %397, %cst_211 {dimension_numbers = #tpu.dot_dimension_numbers<[1], [0], [0], [1], [0, 0, 1, 1], [], []>} : vector<4x8xbf16>, vector<8x256xbf16>, vector<4x256xf32> -> vector<4x256xf32>
    %cst_212 = arith.constant 0.000000e+00 : f32
    %401 = vector.broadcast %cst_212 : f32 to vector<1x256xf32>
    %402 = arith.addf %0, %401 : vector<1x256xf32>
    %cst_213 = arith.constant 0.000000e+00 : f32
    %403 = vector.broadcast %cst_213 : f32 to vector<1x256xf32>
    %404 = arith.cmpf oge, %402, %403 : vector<1x256xf32>
    %cst_214 = arith.constant 0.000000e+00 : f32
    %405 = vector.broadcast %cst_214 : f32 to vector<1x256xf32>
    %406 = arith.addf %0, %405 : vector<1x256xf32>
    %cst_215 = arith.constant 1.500000e+01 : f32
    %407 = vector.broadcast %cst_215 : f32 to vector<1x256xf32>
    %408 = arith.cmpf ole, %406, %407 : vector<1x256xf32>
    %409 = arith.andi %404, %408 : vector<1x256xi1>
    %cst_216 = arith.constant 4.000000e+00 : f32
    %410 = vector.broadcast %cst_216 : f32 to vector<1x256xf32>
    %411 = arith.addf %1, %410 : vector<1x256xf32>
    %cst_217 = arith.constant 0.000000e+00 : f32
    %412 = vector.broadcast %cst_217 : f32 to vector<1x256xf32>
    %413 = arith.cmpf oge, %411, %412 : vector<1x256xf32>
    %414 = arith.andi %409, %413 : vector<1x256xi1>
    %cst_218 = arith.constant 4.000000e+00 : f32
    %415 = vector.broadcast %cst_218 : f32 to vector<1x256xf32>
    %416 = arith.addf %1, %415 : vector<1x256xf32>
    %cst_219 = arith.constant 1.500000e+01 : f32
    %417 = vector.broadcast %cst_219 : f32 to vector<1x256xf32>
    %418 = arith.cmpf ole, %416, %417 : vector<1x256xf32>
    %419 = arith.andi %414, %418 : vector<1x256xi1>
    %cst_220 = arith.constant 0.000000e+00 : f32
    %420 = vector.shape_cast %419 : vector<1x256xi1> to vector<1x256xi1>
    %421 = vector.broadcast %420 : vector<1x256xi1> to vector<4x256xi1>
    %422 = vector.broadcast %cst_220 : f32 to vector<4x256xf32>
    %423 = arith.select %421, %400, %422 : vector<4x256xi1>, vector<4x256xf32>
    %424 = arith.addf %395, %423 : vector<4x256xf32>
    %c0_221 = arith.constant 0 : index
    %c0_222 = arith.constant 0 : index
    %c162 = arith.constant 162 : index
    %425 = vector.load %arg1[%c0_221, %c0_222, %c162] : memref<1x8x460xbf16, #tpu.memory_space<vmem>>, vector<1x8x256xbf16>
    %426 = vector.shape_cast %425 : vector<1x8x256xbf16> to vector<8x256xbf16>
    %c16 = arith.constant 16 : index
    %c0_223 = arith.constant 0 : index
    %c0_224 = arith.constant 0 : index
    %427 = vector.load %arg4[%c16, %c0_223, %c0_224] : memref<28x4x8xbf16, #tpu.memory_space<vmem>>, vector<1x4x8xbf16>
    %428 = vector.shape_cast %427 : vector<1x4x8xbf16> to vector<4x8xbf16>
    %cst_225 = arith.constant dense<0.000000e+00> : vector<4x256xf32>
    %429 = tpu.matmul %428, %426, %cst_225 {dimension_numbers = #tpu.dot_dimension_numbers<[1], [0], [0], [1], [0, 0, 1, 1], [], []>} : vector<4x8xbf16>, vector<8x256xbf16>, vector<4x256xf32> -> vector<4x256xf32>
    %cst_226 = arith.constant 4.000000e+00 : f32
    %430 = vector.broadcast %cst_226 : f32 to vector<1x256xf32>
    %431 = arith.addf %0, %430 : vector<1x256xf32>
    %cst_227 = arith.constant 0.000000e+00 : f32
    %432 = vector.broadcast %cst_227 : f32 to vector<1x256xf32>
    %433 = arith.cmpf oge, %431, %432 : vector<1x256xf32>
    %cst_228 = arith.constant 4.000000e+00 : f32
    %434 = vector.broadcast %cst_228 : f32 to vector<1x256xf32>
    %435 = arith.addf %0, %434 : vector<1x256xf32>
    %cst_229 = arith.constant 1.500000e+01 : f32
    %436 = vector.broadcast %cst_229 : f32 to vector<1x256xf32>
    %437 = arith.cmpf ole, %435, %436 : vector<1x256xf32>
    %438 = arith.andi %433, %437 : vector<1x256xi1>
    %cst_230 = arith.constant -4.000000e+00 : f32
    %439 = vector.broadcast %cst_230 : f32 to vector<1x256xf32>
    %440 = arith.addf %1, %439 : vector<1x256xf32>
    %cst_231 = arith.constant 0.000000e+00 : f32
    %441 = vector.broadcast %cst_231 : f32 to vector<1x256xf32>
    %442 = arith.cmpf oge, %440, %441 : vector<1x256xf32>
    %443 = arith.andi %438, %442 : vector<1x256xi1>
    %cst_232 = arith.constant -4.000000e+00 : f32
    %444 = vector.broadcast %cst_232 : f32 to vector<1x256xf32>
    %445 = arith.addf %1, %444 : vector<1x256xf32>
    %cst_233 = arith.constant 1.500000e+01 : f32
    %446 = vector.broadcast %cst_233 : f32 to vector<1x256xf32>
    %447 = arith.cmpf ole, %445, %446 : vector<1x256xf32>
    %448 = arith.andi %443, %447 : vector<1x256xi1>
    %cst_234 = arith.constant 0.000000e+00 : f32
    %449 = vector.shape_cast %448 : vector<1x256xi1> to vector<1x256xi1>
    %450 = vector.broadcast %449 : vector<1x256xi1> to vector<4x256xi1>
    %451 = vector.broadcast %cst_234 : f32 to vector<4x256xf32>
    %452 = arith.select %450, %429, %451 : vector<4x256xi1>, vector<4x256xf32>
    %453 = arith.addf %424, %452 : vector<4x256xf32>
    %c0_235 = arith.constant 0 : index
    %c0_236 = arith.constant 0 : index
    %c166 = arith.constant 166 : index
    %454 = vector.load %arg1[%c0_235, %c0_236, %c166] : memref<1x8x460xbf16, #tpu.memory_space<vmem>>, vector<1x8x256xbf16>
    %455 = vector.shape_cast %454 : vector<1x8x256xbf16> to vector<8x256xbf16>
    %c17 = arith.constant 17 : index
    %c0_237 = arith.constant 0 : index
    %c0_238 = arith.constant 0 : index
    %456 = vector.load %arg4[%c17, %c0_237, %c0_238] : memref<28x4x8xbf16, #tpu.memory_space<vmem>>, vector<1x4x8xbf16>
    %457 = vector.shape_cast %456 : vector<1x4x8xbf16> to vector<4x8xbf16>
    %cst_239 = arith.constant dense<0.000000e+00> : vector<4x256xf32>
    %458 = tpu.matmul %457, %455, %cst_239 {dimension_numbers = #tpu.dot_dimension_numbers<[1], [0], [0], [1], [0, 0, 1, 1], [], []>} : vector<4x8xbf16>, vector<8x256xbf16>, vector<4x256xf32> -> vector<4x256xf32>
    %cst_240 = arith.constant 4.000000e+00 : f32
    %459 = vector.broadcast %cst_240 : f32 to vector<1x256xf32>
    %460 = arith.addf %0, %459 : vector<1x256xf32>
    %cst_241 = arith.constant 0.000000e+00 : f32
    %461 = vector.broadcast %cst_241 : f32 to vector<1x256xf32>
    %462 = arith.cmpf oge, %460, %461 : vector<1x256xf32>
    %cst_242 = arith.constant 4.000000e+00 : f32
    %463 = vector.broadcast %cst_242 : f32 to vector<1x256xf32>
    %464 = arith.addf %0, %463 : vector<1x256xf32>
    %cst_243 = arith.constant 1.500000e+01 : f32
    %465 = vector.broadcast %cst_243 : f32 to vector<1x256xf32>
    %466 = arith.cmpf ole, %464, %465 : vector<1x256xf32>
    %467 = arith.andi %462, %466 : vector<1x256xi1>
    %cst_244 = arith.constant 0.000000e+00 : f32
    %468 = vector.broadcast %cst_244 : f32 to vector<1x256xf32>
    %469 = arith.addf %1, %468 : vector<1x256xf32>
    %cst_245 = arith.constant 0.000000e+00 : f32
    %470 = vector.broadcast %cst_245 : f32 to vector<1x256xf32>
    %471 = arith.cmpf oge, %469, %470 : vector<1x256xf32>
    %472 = arith.andi %467, %471 : vector<1x256xi1>
    %cst_246 = arith.constant 0.000000e+00 : f32
    %473 = vector.broadcast %cst_246 : f32 to vector<1x256xf32>
    %474 = arith.addf %1, %473 : vector<1x256xf32>
    %cst_247 = arith.constant 1.500000e+01 : f32
    %475 = vector.broadcast %cst_247 : f32 to vector<1x256xf32>
    %476 = arith.cmpf ole, %474, %475 : vector<1x256xf32>
    %477 = arith.andi %472, %476 : vector<1x256xi1>
    %cst_248 = arith.constant 0.000000e+00 : f32
    %478 = vector.shape_cast %477 : vector<1x256xi1> to vector<1x256xi1>
    %479 = vector.broadcast %478 : vector<1x256xi1> to vector<4x256xi1>
    %480 = vector.broadcast %cst_248 : f32 to vector<4x256xf32>
    %481 = arith.select %479, %458, %480 : vector<4x256xi1>, vector<4x256xf32>
    %482 = arith.addf %453, %481 : vector<4x256xf32>
    %c0_249 = arith.constant 0 : index
    %c0_250 = arith.constant 0 : index
    %c170 = arith.constant 170 : index
    %483 = vector.load %arg1[%c0_249, %c0_250, %c170] : memref<1x8x460xbf16, #tpu.memory_space<vmem>>, vector<1x8x256xbf16>
    %484 = vector.shape_cast %483 : vector<1x8x256xbf16> to vector<8x256xbf16>
    %c18 = arith.constant 18 : index
    %c0_251 = arith.constant 0 : index
    %c0_252 = arith.constant 0 : index
    %485 = vector.load %arg4[%c18, %c0_251, %c0_252] : memref<28x4x8xbf16, #tpu.memory_space<vmem>>, vector<1x4x8xbf16>
    %486 = vector.shape_cast %485 : vector<1x4x8xbf16> to vector<4x8xbf16>
    %cst_253 = arith.constant dense<0.000000e+00> : vector<4x256xf32>
    %487 = tpu.matmul %486, %484, %cst_253 {dimension_numbers = #tpu.dot_dimension_numbers<[1], [0], [0], [1], [0, 0, 1, 1], [], []>} : vector<4x8xbf16>, vector<8x256xbf16>, vector<4x256xf32> -> vector<4x256xf32>
    %cst_254 = arith.constant 4.000000e+00 : f32
    %488 = vector.broadcast %cst_254 : f32 to vector<1x256xf32>
    %489 = arith.addf %0, %488 : vector<1x256xf32>
    %cst_255 = arith.constant 0.000000e+00 : f32
    %490 = vector.broadcast %cst_255 : f32 to vector<1x256xf32>
    %491 = arith.cmpf oge, %489, %490 : vector<1x256xf32>
    %cst_256 = arith.constant 4.000000e+00 : f32
    %492 = vector.broadcast %cst_256 : f32 to vector<1x256xf32>
    %493 = arith.addf %0, %492 : vector<1x256xf32>
    %cst_257 = arith.constant 1.500000e+01 : f32
    %494 = vector.broadcast %cst_257 : f32 to vector<1x256xf32>
    %495 = arith.cmpf ole, %493, %494 : vector<1x256xf32>
    %496 = arith.andi %491, %495 : vector<1x256xi1>
    %cst_258 = arith.constant 4.000000e+00 : f32
    %497 = vector.broadcast %cst_258 : f32 to vector<1x256xf32>
    %498 = arith.addf %1, %497 : vector<1x256xf32>
    %cst_259 = arith.constant 0.000000e+00 : f32
    %499 = vector.broadcast %cst_259 : f32 to vector<1x256xf32>
    %500 = arith.cmpf oge, %498, %499 : vector<1x256xf32>
    %501 = arith.andi %496, %500 : vector<1x256xi1>
    %cst_260 = arith.constant 4.000000e+00 : f32
    %502 = vector.broadcast %cst_260 : f32 to vector<1x256xf32>
    %503 = arith.addf %1, %502 : vector<1x256xf32>
    %cst_261 = arith.constant 1.500000e+01 : f32
    %504 = vector.broadcast %cst_261 : f32 to vector<1x256xf32>
    %505 = arith.cmpf ole, %503, %504 : vector<1x256xf32>
    %506 = arith.andi %501, %505 : vector<1x256xi1>
    %cst_262 = arith.constant 0.000000e+00 : f32
    %507 = vector.shape_cast %506 : vector<1x256xi1> to vector<1x256xi1>
    %508 = vector.broadcast %507 : vector<1x256xi1> to vector<4x256xi1>
    %509 = vector.broadcast %cst_262 : f32 to vector<4x256xf32>
    %510 = arith.select %508, %487, %509 : vector<4x256xi1>, vector<4x256xf32>
    %511 = arith.addf %482, %510 : vector<4x256xf32>
    %c2_263 = arith.constant 2 : index
    %c0_264 = arith.constant 0 : index
    %c0_265 = arith.constant 0 : index
    %512 = vector.load %arg5[%c2_263, %c0_264, %c0_265] : memref<4x4x1xf32, #tpu.memory_space<vmem>>, vector<1x4x1xf32>
    %513 = vector.shape_cast %512 : vector<1x4x1xf32> to vector<4x1xf32>
    %514 = vector.broadcast %513 : vector<4x1xf32> to vector<4x256xf32>
    %515 = arith.addf %511, %514 : vector<4x256xf32>
    %c2_266 = arith.constant 2 : index
    %516 = memref.load %arg8[%c2_266] : memref<8xf32, #tpu.memory_space<smem>>
    %cst_267 = arith.constant 0.000000e+00 : f32
    %517 = vector.broadcast %cst_267 : f32 to vector<4x256xf32>
    %518 = arith.cmpf oge, %515, %517 : vector<4x256xf32>
    %519 = vector.broadcast %516 : f32 to vector<4x256xf32>
    %520 = arith.mulf %519, %515 : vector<4x256xf32>
    %521 = arith.select %518, %515, %520 : vector<4x256xi1>, vector<4x256xf32>
    %522 = arith.truncf %521 : vector<4x256xf32> to vector<4x256xbf16>
    %c2_268 = arith.constant 2 : index
    %c0_269 = arith.constant 0 : index
    %c0_270 = arith.constant 0 : index
    %523 = vector.load %arg6[%c2_268, %c0_269, %c0_270] : memref<5x8x4xbf16, #tpu.memory_space<vmem>>, vector<1x8x4xbf16>
    %524 = vector.shape_cast %523 : vector<1x8x4xbf16> to vector<8x4xbf16>
    %cst_271 = arith.constant dense<0.000000e+00> : vector<8x256xf32>
    %525 = tpu.matmul %524, %522, %cst_271 {dimension_numbers = #tpu.dot_dimension_numbers<[1], [0], [0], [1], [0, 0, 1, 1], [], []>} : vector<8x4xbf16>, vector<4x256xbf16>, vector<8x256xf32> -> vector<8x256xf32>
    %526 = arith.addf %274, %525 : vector<8x256xf32>
    %c0_272 = arith.constant 0 : index
    %c0_273 = arith.constant 0 : index
    %c0_274 = arith.constant 0 : index
    %527 = vector.load %arg1[%c0_272, %c0_273, %c0_274] : memref<1x8x460xbf16, #tpu.memory_space<vmem>>, vector<1x8x256xbf16>
    %528 = vector.shape_cast %527 : vector<1x8x256xbf16> to vector<8x256xbf16>
    %c19 = arith.constant 19 : index
    %c0_275 = arith.constant 0 : index
    %c0_276 = arith.constant 0 : index
    %529 = vector.load %arg4[%c19, %c0_275, %c0_276] : memref<28x4x8xbf16, #tpu.memory_space<vmem>>, vector<1x4x8xbf16>
    %530 = vector.shape_cast %529 : vector<1x4x8xbf16> to vector<4x8xbf16>
    %cst_277 = arith.constant dense<0.000000e+00> : vector<4x256xf32>
    %531 = tpu.matmul %530, %528, %cst_277 {dimension_numbers = #tpu.dot_dimension_numbers<[1], [0], [0], [1], [0, 0, 1, 1], [], []>} : vector<4x8xbf16>, vector<8x256xbf16>, vector<4x256xf32> -> vector<4x256xf32>
    %cst_278 = arith.constant -6.000000e+00 : f32
    %532 = vector.broadcast %cst_278 : f32 to vector<1x256xf32>
    %533 = arith.addf %0, %532 : vector<1x256xf32>
    %cst_279 = arith.constant 0.000000e+00 : f32
    %534 = vector.broadcast %cst_279 : f32 to vector<1x256xf32>
    %535 = arith.cmpf oge, %533, %534 : vector<1x256xf32>
    %cst_280 = arith.constant -6.000000e+00 : f32
    %536 = vector.broadcast %cst_280 : f32 to vector<1x256xf32>
    %537 = arith.addf %0, %536 : vector<1x256xf32>
    %cst_281 = arith.constant 1.500000e+01 : f32
    %538 = vector.broadcast %cst_281 : f32 to vector<1x256xf32>
    %539 = arith.cmpf ole, %537, %538 : vector<1x256xf32>
    %540 = arith.andi %535, %539 : vector<1x256xi1>
    %cst_282 = arith.constant -6.000000e+00 : f32
    %541 = vector.broadcast %cst_282 : f32 to vector<1x256xf32>
    %542 = arith.addf %1, %541 : vector<1x256xf32>
    %cst_283 = arith.constant 0.000000e+00 : f32
    %543 = vector.broadcast %cst_283 : f32 to vector<1x256xf32>
    %544 = arith.cmpf oge, %542, %543 : vector<1x256xf32>
    %545 = arith.andi %540, %544 : vector<1x256xi1>
    %cst_284 = arith.constant -6.000000e+00 : f32
    %546 = vector.broadcast %cst_284 : f32 to vector<1x256xf32>
    %547 = arith.addf %1, %546 : vector<1x256xf32>
    %cst_285 = arith.constant 1.500000e+01 : f32
    %548 = vector.broadcast %cst_285 : f32 to vector<1x256xf32>
    %549 = arith.cmpf ole, %547, %548 : vector<1x256xf32>
    %550 = arith.andi %545, %549 : vector<1x256xi1>
    %cst_286 = arith.constant 0.000000e+00 : f32
    %551 = vector.shape_cast %550 : vector<1x256xi1> to vector<1x256xi1>
    %552 = vector.broadcast %551 : vector<1x256xi1> to vector<4x256xi1>
    %553 = vector.broadcast %cst_286 : f32 to vector<4x256xf32>
    %554 = arith.select %552, %531, %553 : vector<4x256xi1>, vector<4x256xf32>
    %c0_287 = arith.constant 0 : index
    %c0_288 = arith.constant 0 : index
    %c6_289 = arith.constant 6 : index
    %555 = vector.load %arg1[%c0_287, %c0_288, %c6_289] : memref<1x8x460xbf16, #tpu.memory_space<vmem>>, vector<1x8x256xbf16>
    %556 = vector.shape_cast %555 : vector<1x8x256xbf16> to vector<8x256xbf16>
    %c20 = arith.constant 20 : index
    %c0_290 = arith.constant 0 : index
    %c0_291 = arith.constant 0 : index
    %557 = vector.load %arg4[%c20, %c0_290, %c0_291] : memref<28x4x8xbf16, #tpu.memory_space<vmem>>, vector<1x4x8xbf16>
    %558 = vector.shape_cast %557 : vector<1x4x8xbf16> to vector<4x8xbf16>
    %cst_292 = arith.constant dense<0.000000e+00> : vector<4x256xf32>
    %559 = tpu.matmul %558, %556, %cst_292 {dimension_numbers = #tpu.dot_dimension_numbers<[1], [0], [0], [1], [0, 0, 1, 1], [], []>} : vector<4x8xbf16>, vector<8x256xbf16>, vector<4x256xf32> -> vector<4x256xf32>
    %cst_293 = arith.constant -6.000000e+00 : f32
    %560 = vector.broadcast %cst_293 : f32 to vector<1x256xf32>
    %561 = arith.addf %0, %560 : vector<1x256xf32>
    %cst_294 = arith.constant 0.000000e+00 : f32
    %562 = vector.broadcast %cst_294 : f32 to vector<1x256xf32>
    %563 = arith.cmpf oge, %561, %562 : vector<1x256xf32>
    %cst_295 = arith.constant -6.000000e+00 : f32
    %564 = vector.broadcast %cst_295 : f32 to vector<1x256xf32>
    %565 = arith.addf %0, %564 : vector<1x256xf32>
    %cst_296 = arith.constant 1.500000e+01 : f32
    %566 = vector.broadcast %cst_296 : f32 to vector<1x256xf32>
    %567 = arith.cmpf ole, %565, %566 : vector<1x256xf32>
    %568 = arith.andi %563, %567 : vector<1x256xi1>
    %cst_297 = arith.constant 0.000000e+00 : f32
    %569 = vector.broadcast %cst_297 : f32 to vector<1x256xf32>
    %570 = arith.addf %1, %569 : vector<1x256xf32>
    %cst_298 = arith.constant 0.000000e+00 : f32
    %571 = vector.broadcast %cst_298 : f32 to vector<1x256xf32>
    %572 = arith.cmpf oge, %570, %571 : vector<1x256xf32>
    %573 = arith.andi %568, %572 : vector<1x256xi1>
    %cst_299 = arith.constant 0.000000e+00 : f32
    %574 = vector.broadcast %cst_299 : f32 to vector<1x256xf32>
    %575 = arith.addf %1, %574 : vector<1x256xf32>
    %cst_300 = arith.constant 1.500000e+01 : f32
    %576 = vector.broadcast %cst_300 : f32 to vector<1x256xf32>
    %577 = arith.cmpf ole, %575, %576 : vector<1x256xf32>
    %578 = arith.andi %573, %577 : vector<1x256xi1>
    %cst_301 = arith.constant 0.000000e+00 : f32
    %579 = vector.shape_cast %578 : vector<1x256xi1> to vector<1x256xi1>
    %580 = vector.broadcast %579 : vector<1x256xi1> to vector<4x256xi1>
    %581 = vector.broadcast %cst_301 : f32 to vector<4x256xf32>
    %582 = arith.select %580, %559, %581 : vector<4x256xi1>, vector<4x256xf32>
    %583 = arith.addf %554, %582 : vector<4x256xf32>
    %c0_302 = arith.constant 0 : index
    %c0_303 = arith.constant 0 : index
    %c12_304 = arith.constant 12 : index
    %584 = vector.load %arg1[%c0_302, %c0_303, %c12_304] : memref<1x8x460xbf16, #tpu.memory_space<vmem>>, vector<1x8x256xbf16>
    %585 = vector.shape_cast %584 : vector<1x8x256xbf16> to vector<8x256xbf16>
    %c21 = arith.constant 21 : index
    %c0_305 = arith.constant 0 : index
    %c0_306 = arith.constant 0 : index
    %586 = vector.load %arg4[%c21, %c0_305, %c0_306] : memref<28x4x8xbf16, #tpu.memory_space<vmem>>, vector<1x4x8xbf16>
    %587 = vector.shape_cast %586 : vector<1x4x8xbf16> to vector<4x8xbf16>
    %cst_307 = arith.constant dense<0.000000e+00> : vector<4x256xf32>
    %588 = tpu.matmul %587, %585, %cst_307 {dimension_numbers = #tpu.dot_dimension_numbers<[1], [0], [0], [1], [0, 0, 1, 1], [], []>} : vector<4x8xbf16>, vector<8x256xbf16>, vector<4x256xf32> -> vector<4x256xf32>
    %cst_308 = arith.constant -6.000000e+00 : f32
    %589 = vector.broadcast %cst_308 : f32 to vector<1x256xf32>
    %590 = arith.addf %0, %589 : vector<1x256xf32>
    %cst_309 = arith.constant 0.000000e+00 : f32
    %591 = vector.broadcast %cst_309 : f32 to vector<1x256xf32>
    %592 = arith.cmpf oge, %590, %591 : vector<1x256xf32>
    %cst_310 = arith.constant -6.000000e+00 : f32
    %593 = vector.broadcast %cst_310 : f32 to vector<1x256xf32>
    %594 = arith.addf %0, %593 : vector<1x256xf32>
    %cst_311 = arith.constant 1.500000e+01 : f32
    %595 = vector.broadcast %cst_311 : f32 to vector<1x256xf32>
    %596 = arith.cmpf ole, %594, %595 : vector<1x256xf32>
    %597 = arith.andi %592, %596 : vector<1x256xi1>
    %cst_312 = arith.constant 6.000000e+00 : f32
    %598 = vector.broadcast %cst_312 : f32 to vector<1x256xf32>
    %599 = arith.addf %1, %598 : vector<1x256xf32>
    %cst_313 = arith.constant 0.000000e+00 : f32
    %600 = vector.broadcast %cst_313 : f32 to vector<1x256xf32>
    %601 = arith.cmpf oge, %599, %600 : vector<1x256xf32>
    %602 = arith.andi %597, %601 : vector<1x256xi1>
    %cst_314 = arith.constant 6.000000e+00 : f32
    %603 = vector.broadcast %cst_314 : f32 to vector<1x256xf32>
    %604 = arith.addf %1, %603 : vector<1x256xf32>
    %cst_315 = arith.constant 1.500000e+01 : f32
    %605 = vector.broadcast %cst_315 : f32 to vector<1x256xf32>
    %606 = arith.cmpf ole, %604, %605 : vector<1x256xf32>
    %607 = arith.andi %602, %606 : vector<1x256xi1>
    %cst_316 = arith.constant 0.000000e+00 : f32
    %608 = vector.shape_cast %607 : vector<1x256xi1> to vector<1x256xi1>
    %609 = vector.broadcast %608 : vector<1x256xi1> to vector<4x256xi1>
    %610 = vector.broadcast %cst_316 : f32 to vector<4x256xf32>
    %611 = arith.select %609, %588, %610 : vector<4x256xi1>, vector<4x256xf32>
    %612 = arith.addf %583, %611 : vector<4x256xf32>
    %c0_317 = arith.constant 0 : index
    %c0_318 = arith.constant 0 : index
    %c96 = arith.constant 96 : index
    %613 = vector.load %arg1[%c0_317, %c0_318, %c96] : memref<1x8x460xbf16, #tpu.memory_space<vmem>>, vector<1x8x256xbf16>
    %614 = vector.shape_cast %613 : vector<1x8x256xbf16> to vector<8x256xbf16>
    %c22 = arith.constant 22 : index
    %c0_319 = arith.constant 0 : index
    %c0_320 = arith.constant 0 : index
    %615 = vector.load %arg4[%c22, %c0_319, %c0_320] : memref<28x4x8xbf16, #tpu.memory_space<vmem>>, vector<1x4x8xbf16>
    %616 = vector.shape_cast %615 : vector<1x4x8xbf16> to vector<4x8xbf16>
    %cst_321 = arith.constant dense<0.000000e+00> : vector<4x256xf32>
    %617 = tpu.matmul %616, %614, %cst_321 {dimension_numbers = #tpu.dot_dimension_numbers<[1], [0], [0], [1], [0, 0, 1, 1], [], []>} : vector<4x8xbf16>, vector<8x256xbf16>, vector<4x256xf32> -> vector<4x256xf32>
    %cst_322 = arith.constant 0.000000e+00 : f32
    %618 = vector.broadcast %cst_322 : f32 to vector<1x256xf32>
    %619 = arith.addf %0, %618 : vector<1x256xf32>
    %cst_323 = arith.constant 0.000000e+00 : f32
    %620 = vector.broadcast %cst_323 : f32 to vector<1x256xf32>
    %621 = arith.cmpf oge, %619, %620 : vector<1x256xf32>
    %cst_324 = arith.constant 0.000000e+00 : f32
    %622 = vector.broadcast %cst_324 : f32 to vector<1x256xf32>
    %623 = arith.addf %0, %622 : vector<1x256xf32>
    %cst_325 = arith.constant 1.500000e+01 : f32
    %624 = vector.broadcast %cst_325 : f32 to vector<1x256xf32>
    %625 = arith.cmpf ole, %623, %624 : vector<1x256xf32>
    %626 = arith.andi %621, %625 : vector<1x256xi1>
    %cst_326 = arith.constant -6.000000e+00 : f32
    %627 = vector.broadcast %cst_326 : f32 to vector<1x256xf32>
    %628 = arith.addf %1, %627 : vector<1x256xf32>
    %cst_327 = arith.constant 0.000000e+00 : f32
    %629 = vector.broadcast %cst_327 : f32 to vector<1x256xf32>
    %630 = arith.cmpf oge, %628, %629 : vector<1x256xf32>
    %631 = arith.andi %626, %630 : vector<1x256xi1>
    %cst_328 = arith.constant -6.000000e+00 : f32
    %632 = vector.broadcast %cst_328 : f32 to vector<1x256xf32>
    %633 = arith.addf %1, %632 : vector<1x256xf32>
    %cst_329 = arith.constant 1.500000e+01 : f32
    %634 = vector.broadcast %cst_329 : f32 to vector<1x256xf32>
    %635 = arith.cmpf ole, %633, %634 : vector<1x256xf32>
    %636 = arith.andi %631, %635 : vector<1x256xi1>
    %cst_330 = arith.constant 0.000000e+00 : f32
    %637 = vector.shape_cast %636 : vector<1x256xi1> to vector<1x256xi1>
    %638 = vector.broadcast %637 : vector<1x256xi1> to vector<4x256xi1>
    %639 = vector.broadcast %cst_330 : f32 to vector<4x256xf32>
    %640 = arith.select %638, %617, %639 : vector<4x256xi1>, vector<4x256xf32>
    %641 = arith.addf %612, %640 : vector<4x256xf32>
    %c0_331 = arith.constant 0 : index
    %c0_332 = arith.constant 0 : index
    %c102_333 = arith.constant 102 : index
    %642 = vector.load %arg1[%c0_331, %c0_332, %c102_333] : memref<1x8x460xbf16, #tpu.memory_space<vmem>>, vector<1x8x256xbf16>
    %643 = vector.shape_cast %642 : vector<1x8x256xbf16> to vector<8x256xbf16>
    %c23 = arith.constant 23 : index
    %c0_334 = arith.constant 0 : index
    %c0_335 = arith.constant 0 : index
    %644 = vector.load %arg4[%c23, %c0_334, %c0_335] : memref<28x4x8xbf16, #tpu.memory_space<vmem>>, vector<1x4x8xbf16>
    %645 = vector.shape_cast %644 : vector<1x4x8xbf16> to vector<4x8xbf16>
    %cst_336 = arith.constant dense<0.000000e+00> : vector<4x256xf32>
    %646 = tpu.matmul %645, %643, %cst_336 {dimension_numbers = #tpu.dot_dimension_numbers<[1], [0], [0], [1], [0, 0, 1, 1], [], []>} : vector<4x8xbf16>, vector<8x256xbf16>, vector<4x256xf32> -> vector<4x256xf32>
    %647 = arith.addf %641, %646 : vector<4x256xf32>
    %c0_337 = arith.constant 0 : index
    %c0_338 = arith.constant 0 : index
    %c108 = arith.constant 108 : index
    %648 = vector.load %arg1[%c0_337, %c0_338, %c108] : memref<1x8x460xbf16, #tpu.memory_space<vmem>>, vector<1x8x256xbf16>
    %649 = vector.shape_cast %648 : vector<1x8x256xbf16> to vector<8x256xbf16>
    %c24 = arith.constant 24 : index
    %c0_339 = arith.constant 0 : index
    %c0_340 = arith.constant 0 : index
    %650 = vector.load %arg4[%c24, %c0_339, %c0_340] : memref<28x4x8xbf16, #tpu.memory_space<vmem>>, vector<1x4x8xbf16>
    %651 = vector.shape_cast %650 : vector<1x4x8xbf16> to vector<4x8xbf16>
    %cst_341 = arith.constant dense<0.000000e+00> : vector<4x256xf32>
    %652 = tpu.matmul %651, %649, %cst_341 {dimension_numbers = #tpu.dot_dimension_numbers<[1], [0], [0], [1], [0, 0, 1, 1], [], []>} : vector<4x8xbf16>, vector<8x256xbf16>, vector<4x256xf32> -> vector<4x256xf32>
    %cst_342 = arith.constant 0.000000e+00 : f32
    %653 = vector.broadcast %cst_342 : f32 to vector<1x256xf32>
    %654 = arith.addf %0, %653 : vector<1x256xf32>
    %cst_343 = arith.constant 0.000000e+00 : f32
    %655 = vector.broadcast %cst_343 : f32 to vector<1x256xf32>
    %656 = arith.cmpf oge, %654, %655 : vector<1x256xf32>
    %cst_344 = arith.constant 0.000000e+00 : f32
    %657 = vector.broadcast %cst_344 : f32 to vector<1x256xf32>
    %658 = arith.addf %0, %657 : vector<1x256xf32>
    %cst_345 = arith.constant 1.500000e+01 : f32
    %659 = vector.broadcast %cst_345 : f32 to vector<1x256xf32>
    %660 = arith.cmpf ole, %658, %659 : vector<1x256xf32>
    %661 = arith.andi %656, %660 : vector<1x256xi1>
    %cst_346 = arith.constant 6.000000e+00 : f32
    %662 = vector.broadcast %cst_346 : f32 to vector<1x256xf32>
    %663 = arith.addf %1, %662 : vector<1x256xf32>
    %cst_347 = arith.constant 0.000000e+00 : f32
    %664 = vector.broadcast %cst_347 : f32 to vector<1x256xf32>
    %665 = arith.cmpf oge, %663, %664 : vector<1x256xf32>
    %666 = arith.andi %661, %665 : vector<1x256xi1>
    %cst_348 = arith.constant 6.000000e+00 : f32
    %667 = vector.broadcast %cst_348 : f32 to vector<1x256xf32>
    %668 = arith.addf %1, %667 : vector<1x256xf32>
    %cst_349 = arith.constant 1.500000e+01 : f32
    %669 = vector.broadcast %cst_349 : f32 to vector<1x256xf32>
    %670 = arith.cmpf ole, %668, %669 : vector<1x256xf32>
    %671 = arith.andi %666, %670 : vector<1x256xi1>
    %cst_350 = arith.constant 0.000000e+00 : f32
    %672 = vector.shape_cast %671 : vector<1x256xi1> to vector<1x256xi1>
    %673 = vector.broadcast %672 : vector<1x256xi1> to vector<4x256xi1>
    %674 = vector.broadcast %cst_350 : f32 to vector<4x256xf32>
    %675 = arith.select %673, %652, %674 : vector<4x256xi1>, vector<4x256xf32>
    %676 = arith.addf %647, %675 : vector<4x256xf32>
    %c0_351 = arith.constant 0 : index
    %c0_352 = arith.constant 0 : index
    %c192 = arith.constant 192 : index
    %677 = vector.load %arg1[%c0_351, %c0_352, %c192] : memref<1x8x460xbf16, #tpu.memory_space<vmem>>, vector<1x8x256xbf16>
    %678 = vector.shape_cast %677 : vector<1x8x256xbf16> to vector<8x256xbf16>
    %c25 = arith.constant 25 : index
    %c0_353 = arith.constant 0 : index
    %c0_354 = arith.constant 0 : index
    %679 = vector.load %arg4[%c25, %c0_353, %c0_354] : memref<28x4x8xbf16, #tpu.memory_space<vmem>>, vector<1x4x8xbf16>
    %680 = vector.shape_cast %679 : vector<1x4x8xbf16> to vector<4x8xbf16>
    %cst_355 = arith.constant dense<0.000000e+00> : vector<4x256xf32>
    %681 = tpu.matmul %680, %678, %cst_355 {dimension_numbers = #tpu.dot_dimension_numbers<[1], [0], [0], [1], [0, 0, 1, 1], [], []>} : vector<4x8xbf16>, vector<8x256xbf16>, vector<4x256xf32> -> vector<4x256xf32>
    %cst_356 = arith.constant 6.000000e+00 : f32
    %682 = vector.broadcast %cst_356 : f32 to vector<1x256xf32>
    %683 = arith.addf %0, %682 : vector<1x256xf32>
    %cst_357 = arith.constant 0.000000e+00 : f32
    %684 = vector.broadcast %cst_357 : f32 to vector<1x256xf32>
    %685 = arith.cmpf oge, %683, %684 : vector<1x256xf32>
    %cst_358 = arith.constant 6.000000e+00 : f32
    %686 = vector.broadcast %cst_358 : f32 to vector<1x256xf32>
    %687 = arith.addf %0, %686 : vector<1x256xf32>
    %cst_359 = arith.constant 1.500000e+01 : f32
    %688 = vector.broadcast %cst_359 : f32 to vector<1x256xf32>
    %689 = arith.cmpf ole, %687, %688 : vector<1x256xf32>
    %690 = arith.andi %685, %689 : vector<1x256xi1>
    %cst_360 = arith.constant -6.000000e+00 : f32
    %691 = vector.broadcast %cst_360 : f32 to vector<1x256xf32>
    %692 = arith.addf %1, %691 : vector<1x256xf32>
    %cst_361 = arith.constant 0.000000e+00 : f32
    %693 = vector.broadcast %cst_361 : f32 to vector<1x256xf32>
    %694 = arith.cmpf oge, %692, %693 : vector<1x256xf32>
    %695 = arith.andi %690, %694 : vector<1x256xi1>
    %cst_362 = arith.constant -6.000000e+00 : f32
    %696 = vector.broadcast %cst_362 : f32 to vector<1x256xf32>
    %697 = arith.addf %1, %696 : vector<1x256xf32>
    %cst_363 = arith.constant 1.500000e+01 : f32
    %698 = vector.broadcast %cst_363 : f32 to vector<1x256xf32>
    %699 = arith.cmpf ole, %697, %698 : vector<1x256xf32>
    %700 = arith.andi %695, %699 : vector<1x256xi1>
    %cst_364 = arith.constant 0.000000e+00 : f32
    %701 = vector.shape_cast %700 : vector<1x256xi1> to vector<1x256xi1>
    %702 = vector.broadcast %701 : vector<1x256xi1> to vector<4x256xi1>
    %703 = vector.broadcast %cst_364 : f32 to vector<4x256xf32>
    %704 = arith.select %702, %681, %703 : vector<4x256xi1>, vector<4x256xf32>
    %705 = arith.addf %676, %704 : vector<4x256xf32>
    %c0_365 = arith.constant 0 : index
    %c0_366 = arith.constant 0 : index
    %c198 = arith.constant 198 : index
    %706 = vector.load %arg1[%c0_365, %c0_366, %c198] : memref<1x8x460xbf16, #tpu.memory_space<vmem>>, vector<1x8x256xbf16>
    %707 = vector.shape_cast %706 : vector<1x8x256xbf16> to vector<8x256xbf16>
    %c26 = arith.constant 26 : index
    %c0_367 = arith.constant 0 : index
    %c0_368 = arith.constant 0 : index
    %708 = vector.load %arg4[%c26, %c0_367, %c0_368] : memref<28x4x8xbf16, #tpu.memory_space<vmem>>, vector<1x4x8xbf16>
    %709 = vector.shape_cast %708 : vector<1x4x8xbf16> to vector<4x8xbf16>
    %cst_369 = arith.constant dense<0.000000e+00> : vector<4x256xf32>
    %710 = tpu.matmul %709, %707, %cst_369 {dimension_numbers = #tpu.dot_dimension_numbers<[1], [0], [0], [1], [0, 0, 1, 1], [], []>} : vector<4x8xbf16>, vector<8x256xbf16>, vector<4x256xf32> -> vector<4x256xf32>
    %cst_370 = arith.constant 6.000000e+00 : f32
    %711 = vector.broadcast %cst_370 : f32 to vector<1x256xf32>
    %712 = arith.addf %0, %711 : vector<1x256xf32>
    %cst_371 = arith.constant 0.000000e+00 : f32
    %713 = vector.broadcast %cst_371 : f32 to vector<1x256xf32>
    %714 = arith.cmpf oge, %712, %713 : vector<1x256xf32>
    %cst_372 = arith.constant 6.000000e+00 : f32
    %715 = vector.broadcast %cst_372 : f32 to vector<1x256xf32>
    %716 = arith.addf %0, %715 : vector<1x256xf32>
    %cst_373 = arith.constant 1.500000e+01 : f32
    %717 = vector.broadcast %cst_373 : f32 to vector<1x256xf32>
    %718 = arith.cmpf ole, %716, %717 : vector<1x256xf32>
    %719 = arith.andi %714, %718 : vector<1x256xi1>
    %cst_374 = arith.constant 0.000000e+00 : f32
    %720 = vector.broadcast %cst_374 : f32 to vector<1x256xf32>
    %721 = arith.addf %1, %720 : vector<1x256xf32>
    %cst_375 = arith.constant 0.000000e+00 : f32
    %722 = vector.broadcast %cst_375 : f32 to vector<1x256xf32>
    %723 = arith.cmpf oge, %721, %722 : vector<1x256xf32>
    %724 = arith.andi %719, %723 : vector<1x256xi1>
    %cst_376 = arith.constant 0.000000e+00 : f32
    %725 = vector.broadcast %cst_376 : f32 to vector<1x256xf32>
    %726 = arith.addf %1, %725 : vector<1x256xf32>
    %cst_377 = arith.constant 1.500000e+01 : f32
    %727 = vector.broadcast %cst_377 : f32 to vector<1x256xf32>
    %728 = arith.cmpf ole, %726, %727 : vector<1x256xf32>
    %729 = arith.andi %724, %728 : vector<1x256xi1>
    %cst_378 = arith.constant 0.000000e+00 : f32
    %730 = vector.shape_cast %729 : vector<1x256xi1> to vector<1x256xi1>
    %731 = vector.broadcast %730 : vector<1x256xi1> to vector<4x256xi1>
    %732 = vector.broadcast %cst_378 : f32 to vector<4x256xf32>
    %733 = arith.select %731, %710, %732 : vector<4x256xi1>, vector<4x256xf32>
    %734 = arith.addf %705, %733 : vector<4x256xf32>
    %c0_379 = arith.constant 0 : index
    %c0_380 = arith.constant 0 : index
    %c204 = arith.constant 204 : index
    %735 = vector.load %arg1[%c0_379, %c0_380, %c204] : memref<1x8x460xbf16, #tpu.memory_space<vmem>>, vector<1x8x256xbf16>
    %736 = vector.shape_cast %735 : vector<1x8x256xbf16> to vector<8x256xbf16>
    %c27 = arith.constant 27 : index
    %c0_381 = arith.constant 0 : index
    %c0_382 = arith.constant 0 : index
    %737 = vector.load %arg4[%c27, %c0_381, %c0_382] : memref<28x4x8xbf16, #tpu.memory_space<vmem>>, vector<1x4x8xbf16>
    %738 = vector.shape_cast %737 : vector<1x4x8xbf16> to vector<4x8xbf16>
    %cst_383 = arith.constant dense<0.000000e+00> : vector<4x256xf32>
    %739 = tpu.matmul %738, %736, %cst_383 {dimension_numbers = #tpu.dot_dimension_numbers<[1], [0], [0], [1], [0, 0, 1, 1], [], []>} : vector<4x8xbf16>, vector<8x256xbf16>, vector<4x256xf32> -> vector<4x256xf32>
    %cst_384 = arith.constant 6.000000e+00 : f32
    %740 = vector.broadcast %cst_384 : f32 to vector<1x256xf32>
    %741 = arith.addf %0, %740 : vector<1x256xf32>
    %cst_385 = arith.constant 0.000000e+00 : f32
    %742 = vector.broadcast %cst_385 : f32 to vector<1x256xf32>
    %743 = arith.cmpf oge, %741, %742 : vector<1x256xf32>
    %cst_386 = arith.constant 6.000000e+00 : f32
    %744 = vector.broadcast %cst_386 : f32 to vector<1x256xf32>
    %745 = arith.addf %0, %744 : vector<1x256xf32>
    %cst_387 = arith.constant 1.500000e+01 : f32
    %746 = vector.broadcast %cst_387 : f32 to vector<1x256xf32>
    %747 = arith.cmpf ole, %745, %746 : vector<1x256xf32>
    %748 = arith.andi %743, %747 : vector<1x256xi1>
    %cst_388 = arith.constant 6.000000e+00 : f32
    %749 = vector.broadcast %cst_388 : f32 to vector<1x256xf32>
    %750 = arith.addf %1, %749 : vector<1x256xf32>
    %cst_389 = arith.constant 0.000000e+00 : f32
    %751 = vector.broadcast %cst_389 : f32 to vector<1x256xf32>
    %752 = arith.cmpf oge, %750, %751 : vector<1x256xf32>
    %753 = arith.andi %748, %752 : vector<1x256xi1>
    %cst_390 = arith.constant 6.000000e+00 : f32
    %754 = vector.broadcast %cst_390 : f32 to vector<1x256xf32>
    %755 = arith.addf %1, %754 : vector<1x256xf32>
    %cst_391 = arith.constant 1.500000e+01 : f32
    %756 = vector.broadcast %cst_391 : f32 to vector<1x256xf32>
    %757 = arith.cmpf ole, %755, %756 : vector<1x256xf32>
    %758 = arith.andi %753, %757 : vector<1x256xi1>
    %cst_392 = arith.constant 0.000000e+00 : f32
    %759 = vector.shape_cast %758 : vector<1x256xi1> to vector<1x256xi1>
    %760 = vector.broadcast %759 : vector<1x256xi1> to vector<4x256xi1>
    %761 = vector.broadcast %cst_392 : f32 to vector<4x256xf32>
    %762 = arith.select %760, %739, %761 : vector<4x256xi1>, vector<4x256xf32>
    %763 = arith.addf %734, %762 : vector<4x256xf32>
    %c3_393 = arith.constant 3 : index
    %c0_394 = arith.constant 0 : index
    %c0_395 = arith.constant 0 : index
    %764 = vector.load %arg5[%c3_393, %c0_394, %c0_395] : memref<4x4x1xf32, #tpu.memory_space<vmem>>, vector<1x4x1xf32>
    %765 = vector.shape_cast %764 : vector<1x4x1xf32> to vector<4x1xf32>
    %766 = vector.broadcast %765 : vector<4x1xf32> to vector<4x256xf32>
    %767 = arith.addf %763, %766 : vector<4x256xf32>
    %c3_396 = arith.constant 3 : index
    %768 = memref.load %arg8[%c3_396] : memref<8xf32, #tpu.memory_space<smem>>
    %cst_397 = arith.constant 0.000000e+00 : f32
    %769 = vector.broadcast %cst_397 : f32 to vector<4x256xf32>
    %770 = arith.cmpf oge, %767, %769 : vector<4x256xf32>
    %771 = vector.broadcast %768 : f32 to vector<4x256xf32>
    %772 = arith.mulf %771, %767 : vector<4x256xf32>
    %773 = arith.select %770, %767, %772 : vector<4x256xi1>, vector<4x256xf32>
    %774 = arith.truncf %773 : vector<4x256xf32> to vector<4x256xbf16>
    %c3_398 = arith.constant 3 : index
    %c0_399 = arith.constant 0 : index
    %c0_400 = arith.constant 0 : index
    %775 = vector.load %arg6[%c3_398, %c0_399, %c0_400] : memref<5x8x4xbf16, #tpu.memory_space<vmem>>, vector<1x8x4xbf16>
    %776 = vector.shape_cast %775 : vector<1x8x4xbf16> to vector<8x4xbf16>
    %cst_401 = arith.constant dense<0.000000e+00> : vector<8x256xf32>
    %777 = tpu.matmul %776, %774, %cst_401 {dimension_numbers = #tpu.dot_dimension_numbers<[1], [0], [0], [1], [0, 0, 1, 1], [], []>} : vector<8x4xbf16>, vector<4x256xbf16>, vector<8x256xf32> -> vector<8x256xf32>
    %778 = arith.addf %526, %777 : vector<8x256xf32>
    %c4_402 = arith.constant 4 : index
    %c0_403 = arith.constant 0 : index
    %c0_404 = arith.constant 0 : index
    %779 = vector.load %arg6[%c4_402, %c0_403, %c0_404] : memref<5x8x4xbf16, #tpu.memory_space<vmem>>, vector<1x8x4xbf16>
    %780 = vector.shape_cast %779 : vector<1x8x4xbf16> to vector<8x4xbf16>
    %c0_405 = arith.constant 0 : index
    %c0_406 = arith.constant 0 : index
    %c0_407 = arith.constant 0 : index
    %781 = vector.load %arg2[%c0_405, %c0_406, %c0_407] : memref<1x4x256xbf16, #tpu.memory_space<vmem>>, vector<1x4x256xbf16>
    %782 = vector.shape_cast %781 : vector<1x4x256xbf16> to vector<4x256xbf16>
    %cst_408 = arith.constant dense<0.000000e+00> : vector<8x256xf32>
    %783 = tpu.matmul %780, %782, %cst_408 {dimension_numbers = #tpu.dot_dimension_numbers<[1], [0], [0], [1], [0, 0, 1, 1], [], []>} : vector<8x4xbf16>, vector<4x256xbf16>, vector<8x256xf32> -> vector<8x256xf32>
    %784 = arith.addf %778, %783 : vector<8x256xf32>
    %c0_409 = arith.constant 0 : index
    %c0_410 = arith.constant 0 : index
    %785 = vector.load %arg7[%c0_409, %c0_410] : memref<8x1xf32, #tpu.memory_space<vmem>>, vector<8x1xf32>
    %786 = vector.broadcast %785 : vector<8x1xf32> to vector<8x256xf32>
    %787 = arith.addf %784, %786 : vector<8x256xf32>
    %c4_411 = arith.constant 4 : index
    %788 = memref.load %arg8[%c4_411] : memref<8xf32, #tpu.memory_space<smem>>
    %cst_412 = arith.constant 0.000000e+00 : f32
    %789 = vector.broadcast %cst_412 : f32 to vector<8x256xf32>
    %790 = arith.cmpf oge, %787, %789 : vector<8x256xf32>
    %791 = vector.broadcast %788 : f32 to vector<8x256xf32>
    %792 = arith.mulf %791, %787 : vector<8x256xf32>
    %793 = arith.select %790, %787, %792 : vector<8x256xi1>, vector<8x256xf32>
    %c0_413 = arith.constant 0 : index
    %c0_414 = arith.constant 0 : index
    %c0_415 = arith.constant 0 : index
    %794 = vector.load %arg9[%c0_413, %c0_414, %c0_415] : memref<1x8x256xf32, #tpu.memory_space<vmem>>, vector<1x8x256xf32>
    %795 = vector.shape_cast %794 : vector<1x8x256xf32> to vector<8x256xf32>
    %796 = vector.shape_cast %793 : vector<8x256xf32> to vector<1x8x256xf32>
    tpu.vector_store %arg9[%c0_413, %c0_414, %c0_415], %796 {strides = array<i32>} : memref<1x8x256xf32, #tpu.memory_space<vmem>>, vector<1x8x256xf32>,
    return
  }
  func.func @transform_0(%arg0: i32) -> (i32, i32, i32) {
    %c0_i32 = arith.constant 0 : i32
    %c0_i32_0 = arith.constant 0 : i32
    %c0_i32_1 = arith.constant 0 : i32
    return %arg0, %c0_i32, %c0_i32_0 : i32, i32, i32
  }
  func.func @transform_1(%arg0: i32) -> (i32, i32, i32) {
    %c0_i32 = arith.constant 0 : i32
    %c0_i32_0 = arith.constant 0 : i32
    %c0_i32_1 = arith.constant 0 : i32
    return %arg0, %c0_i32, %c0_i32_0 : i32, i32, i32
  }
  func.func @transform_2(%arg0: i32) -> (i32, i32) {
    %c0_i32 = arith.constant 0 : i32
    %c0_i32_0 = arith.constant 0 : i32
    %c0_i32_1 = arith.constant 0 : i32
    return %c0_i32, %c0_i32_0 : i32, i32
  }
  func.func @transform_3(%arg0: i32) -> (i32, i32, i32) {
    %c0_i32 = arith.constant 0 : i32
    %c0_i32_0 = arith.constant 0 : i32
    %c0_i32_1 = arith.constant 0 : i32
    %c0_i32_2 = arith.constant 0 : i32
    return %c0_i32, %c0_i32_0, %c0_i32_1 : i32, i32, i32
  }
  func.func @transform_4(%arg0: i32) -> (i32, i32, i32) {
    %c0_i32 = arith.constant 0 : i32
    %c0_i32_0 = arith.constant 0 : i32
    %c0_i32_1 = arith.constant 0 : i32
    %c0_i32_2 = arith.constant 0 : i32
    return %c0_i32, %c0_i32_0, %c0_i32_1 : i32, i32, i32
  }
  func.func @transform_5(%arg0: i32) -> (i32, i32, i32) {
    %c0_i32 = arith.constant 0 : i32
    %c0_i32_0 = arith.constant 0 : i32
    %c0_i32_1 = arith.constant 0 : i32
    %c0_i32_2 = arith.constant 0 : i32
    return %c0_i32, %c0_i32_0, %c0_i32_1 : i32, i32, i32
  }
  func.func @transform_6(%arg0: i32) -> (i32, i32) {
    %c0_i32 = arith.constant 0 : i32
    %c0_i32_0 = arith.constant 0 : i32
    %c0_i32_1 = arith.constant 0 : i32
    return %c0_i32, %c0_i32_0 : i32, i32
  }
  func.func @transform_7(%arg0: i32) -> i32 {
    %c0_i32 = arith.constant 0 : i32
    %c0_i32_0 = arith.constant 0 : i32
    return %c0_i32 : i32
  }
  func.func @transform_8(%arg0: i32) -> (i32, i32, i32) {
    %c0_i32 = arith.constant 0 : i32
    %c0_i32_0 = arith.constant 0 : i32
    %c0_i32_1 = arith.constant 0 : i32
    return %arg0, %c0_i32, %c0_i32_0 : i32, i32, i32
  }
}

</mosaic_0001>

<bundles_post_ra>
// kernel: pafem_forward.4
= control target key start
LH: loop header
LB: loop body
LE: loop exit
PB: predicated region body
PF: predicated region fallthrough
CT: control target
= control target key end

     0   :  { %s1027_s17 = smov 0   ;;  %s1029_s18 = smov 0   ;;  %s1180_s0 = inlined_call_operand.vmem [shape: bf16[2,8,16384], index: 0, kind: input, shape index: {}]   ;;  %s1181_s1 = inlined_call_operand.vmem [shape: bf16[4,8], index: 1, kind: input, shape index: {}]   ;;  %s1182_s2 = inlined_call_operand.vmem [shape: f32[4,1], index: 2, kind: input, shape index: {}]   ;;  %s1183_s3 = inlined_call_operand.<no memory space> [shape: f32[1], index: 3, kind: input, shape index: {}]   ;;  %s1184_s4 = inlined_call_operand.vmem [shape: f32[2,4,16384], index: 4, kind: output, shape index: {}]  }
   0x1   :  { %9 = sst [smem:[#allocation2]] %s1183_s3  ;;  %s1031_s19 = smov 0  }
   0x2   :  { %s1033_s20 = smov 0   ;;  %s1035_s21 = smov 0  }
   0x3 LB: > { %s24_s3 = sadd.s32 1, %s988_s19  ;;  %s27_s22 = sadd.s32 1, %s992_s20  ;;  %s996_s21 = sphi %s1035_s21, %s15_s21   ;;  %s992_s20 = sphi %s1033_s20, %s1188_s20   ;;  %s988_s19 = sphi %s1031_s19, %s1187_s19   ;;  %s984_s18 = sphi %s1029_s18, %s1186_s18   ;;  %s980_s17 = sphi %s1027_s17, %s1185_s17  }
   0x4   : > { %p25_p0 = scmp.ge.s32.totalorder %s24_s3, 8  ;;  %p859_p1 = scmp.ge.s32.totalorder %s996_s21, 1 }
   0x5   : > { %p184_p2 = scmp.lt.s32.totalorder %s996_s21, 17 }
   0x6   : > { %s1190_s3 = smov (%p25_p0, %s24_s3), 0  ;;  %s1192_s22 = smov (!%p25_p0, %s27_s22), %s992_s20 }
   0x7   : > { %p185_p3 = pnand %p859_p1, %p184_p2  ;;  %p29_p4 = scmp.ge.s32.totalorder %s1192_s22, 2 }
   0x8   : > { %s860_s23 = sshll.u32 (!%p185_p3), %s980_s17, 4  ;;  %p219_p5 = scmp.lt.s32.totalorder (!%p185_p3), %s984_s18, 1  ;;  %v998_v0 = vmov (!%p185_p3), 0   ;;  %v248_v1 = vld [vmem:[%s1182_s2] sm:$0xf] (!%p185_p3)  ;;  %vm298_vm0 = vcmask (!%p185_p3), 1043456  }
   0x9   : > { %s1194_s22 = smov (%p29_p4, %s1192_s22), 0  ;;  %188 = sbr.rel (%p185_p3) target bundleno = 273 (0x111), region = 36 }
   0xa   : > { %p221_p6 = scmp.lt.s32.totalorder (!%p185_p3), %s860_s23, 127  ;;  %379 = vmatprep.mubr.bf16.mxu0 (!%p185_p3), %v998_v0  ;;  %420 = vmatprep.mubr.bf16.mxu1 (!%p185_p3), %v998_v0  ;;  %v239_v18 = vld [vmem:[%s1181_s1] sm:$0x3] (!%p185_p3)  ;;  %vm294_vm1 = vcmask (!%p185_p3), 64512   ;;  %s675_s8 = sld [smem:[#allocation2]] (!%p185_p3) }
   0xb   : > { %941 = vset.pattern.permute.xlu0 (!%p185_p3), %v998_v0 }
   0xc   : > { %251 = vperm.xlu0 (!%p185_p3), %941, %v248_v1  }
  0x10   : > { %s1196_s18 = smov (!%p219_p5, %s984_s18), 1  ;;  %s1198_s23 = smov (!%p221_p6, %s860_s23), 127  ;;  %v1116_v37 = vstv %s675_s8 }
  0x11   : > { %s861_s26 = sshll.u32 %s1196_s18, 7 }
  0x12   : > { %s1063_s27 = sadd.s32 %s861_s26, %s1198_s23 }
  0x13   : > { %s862_s28 = sshll.u32 %s1063_s27, 2 }
  0x14   : > { %s1071_s5 = scalar_lea.vmem %s1180_s0, %s862_s28  ;;  %s1131_s11 = scalar_lea.vmem %s1184_s4, %s862_s28 }
  0x15   : > { %v240_v2 = vld [vmem:[%s1071_s5] sm:$0xff]  ;;  %v241_v3 = vld [vmem:[%s1071_s5 + $0x8] sm:$0xff]  ;;  %v242_v4 = vld [vmem:[%s1071_s5 + $0x10] sm:$0xff] }
  0x16   : > { %v867_v5 = vcombine.high %v240_v2, %v240_v2  ;;  %v869_v6 = vcombine.high %v241_v3, %v241_v3  ;;  %v866_v7 = vcombine.low %v240_v2, %v240_v2  ;;  %v868_v8 = vcombine.low %v241_v3, %v241_v3  ;;  %v243_v9 = vld [vmem:[%s1071_s5 + $0x18] sm:$0xff]  ;;  %v244_v16 = vld [vmem:[%s1071_s5 + $0x20] sm:$0xff]  ;;  %v245_v17 = vld [vmem:[%s1071_s5 + $0x28] sm:$0xff] }
  0x17   : > { %v871_v10 = vcombine.high %v242_v4, %v242_v4  ;;  %v873_v11 = vcombine.high %v243_v9, %v243_v9  ;;  %v870_v12 = vcombine.low %v242_v4, %v242_v4  ;;  %v872_v13 = vcombine.low %v243_v9, %v243_v9  ;;  %v246_v25 = vld [vmem:[%s1071_s5 + $0x30] sm:$0xff]  ;;  %v247_v26 = vld [vmem:[%s1071_s5 + $0x38] sm:$0xff] }
  0x18   : > { %882 = vmatprep.subr.msk.bf16.mxu0 %vm298_vm0, %v867_v5  ;;  %884 = vmatprep.subr.msk.bf16.mxu1 %vm298_vm0, %v869_v6  ;;  %v300_v14 = vsel %vm298_vm0, %v866_v7, 0  ;;  %v306_v15 = vsel %vm298_vm0, %v868_v8, 0  ;;  %v875_v21 = vcombine.high %v244_v16, %v244_v16  ;;  %v877_v22 = vcombine.high %v245_v17, %v245_v17 }
  0x19   : > { %348 = vmatpush1.bf16.msra.mxu0 %v300_v14  ;;  %389 = vmatpush1.bf16.msra.mxu1 %v306_v15  ;;  %v312_v19 = vsel %vm298_vm0, %v870_v12, 0  ;;  %v318_v20 = vsel %vm298_vm0, %v872_v13, 0  ;;  %v874_v23 = vcombine.low %v244_v16, %v244_v16  ;;  %v876_v24 = vcombine.low %v245_v17, %v245_v17 }
  0x1a   : > { %886 = vmatprep.subr.msk.bf16.mxu0 %vm298_vm0, %v871_v10  ;;  %888 = vmatprep.subr.msk.bf16.mxu1 %vm298_vm0, %v873_v11  ;;  %v879_v29 = vcombine.high %v246_v25, %v246_v25  ;;  %v881_v30 = vcombine.high %v247_v26, %v247_v26  ;;  %v878_v31 = vcombine.low %v246_v25, %v246_v25 }
  0x1b   : > { %v324_v27 = vsel %vm298_vm0, %v874_v23, 0  ;;  %v330_v28 = vsel %vm298_vm0, %v876_v24, 0  ;;  %v880_v32 = vcombine.low %v247_v26, %v247_v26 }
  0x1c   : > { %883 = vmatmul.mubr.msk.bf16.vlgmr.msra.gmra.mrb[0].mxu0 %vm294_vm1, %v239_v18  ;;  %885 = vmatmul.mubr.msk.bf16.vlgmr.msra.gmra.mrb[0].mxu1 %vm294_vm1, %v239_v18  ;;  %v336_v33 = vsel %vm298_vm0, %v878_v31, 0 }
  0x1d   : > { %430 = vmatpush1.bf16.msra.mxu0 %v312_v19  ;;  %471 = vmatpush1.bf16.msra.mxu1 %v318_v20  ;;  %v342_v34 = vsel %vm298_vm0, %v880_v32, 0 }
  0x1e   : > { %461 = vmatprep.mubr.bf16.mxu0 %v998_v0  ;;  %502 = vmatprep.mubr.bf16.mxu1 %v998_v0 }
  0x1f   : > { %890 = vmatprep.subr.msk.bf16.mxu0 %vm298_vm0, %v875_v21  ;;  %892 = vmatprep.subr.msk.bf16.mxu1 %vm298_vm0, %v877_v22 }
  0x24   : > { %887 = vmatmul.mubr.msk.bf16.vlgmr.msra.gmra.mrb[4].mxu0 %vm294_vm1, %v239_v18  ;;  %889 = vmatmul.mubr.msk.bf16.vlgmr.msra.gmra.mrb[4].mxu1 %vm294_vm1, %v239_v18 }
  0x25   : > { %512 = vmatpush1.bf16.msra.mxu0 %v324_v27  ;;  %553 = vmatpush1.bf16.msra.mxu1 %v330_v28 }
  0x26   : > { %543 = vmatprep.mubr.bf16.mxu0 %v998_v0  ;;  %584 = vmatprep.mubr.bf16.mxu1 %v998_v0 }
  0x27   : > { %894 = vmatprep.subr.msk.bf16.mxu0 %vm298_vm0, %v879_v29  ;;  %896 = vmatprep.subr.msk.bf16.mxu1 %vm298_vm0, %v881_v30 }
  0x2c   : > { %891 = vmatmul.mubr.msk.bf16.vlgmr.msra.gmra.mrb[8].mxu0 %vm294_vm1, %v239_v18  ;;  %893 = vmatmul.mubr.msk.bf16.vlgmr.msra.gmra.mrb[8].mxu1 %vm294_vm1, %v239_v18 }
  0x2d   : > { %594 = vmatpush1.bf16.msra.mxu0 %v336_v33  ;;  %635 = vmatpush1.bf16.msra.mxu1 %v342_v34 }
  0x2e   : > { %625 = vmatprep.mubr.bf16.mxu0 %v998_v0  ;;  %666 = vmatprep.mubr.bf16.mxu1 %v998_v0 }
  0x34   : > { %895 = vmatmul.mubr.msk.bf16.vlgmr.msra.gmra.mrb[12].mxu0 %vm294_vm1, %v239_v18  ;;  %897 = vmatmul.mubr.msk.bf16.vlgmr.msra.gmra.mrb[12].mxu1 %vm294_vm1, %v239_v18 }
  0x8b   : > { %v1114_v35 = vpop.permute.xlu0 %251 }
  0xef   : > { %v381_v36 = vpop.f32.mrb[0].mxu0  ;;  %v422_v38 = vpop.f32.mrb[0].mxu1 }
  0xf0   : > { %v382_v39 = vadd.f32 %v381_v36, %v1114_v35  ;;  %v423_v40 = vadd.f32 %v422_v38, %v1114_v35  ;;  %v383_v41 = vpop.f32.mrb[1].mxu0  ;;  %v424_v42 = vpop.f32.mrb[1].mxu1 }
  0xf1   : > { %v384_v43 = vadd.f32 %v383_v41, %v1114_v35  ;;  %v425_v44 = vadd.f32 %v424_v42, %v1114_v35  ;;  %v385_v45 = vpop.f32.mrb[2].mxu0  ;;  %v426_v46 = vpop.f32.mrb[2].mxu1 }
  0xf2   : > { %vm676_vm2 = vcmp.ge.f32.partialorder %v382_v39, 0.0  ;;  %v693_v47 = vmul.f32 %v1116_v37, %v382_v39  ;;  %vm678_vm3 = vcmp.ge.f32.partialorder %v423_v40, 0.0  ;;  %v695_v48 = vmul.f32 %v1116_v37, %v423_v40  ;;  %v386_v49 = vpop.f32.mrb[3].mxu0  ;;  %v427_v50 = vpop.f32.mrb[3].mxu1 }
  0xf3   : > { %vm677_vm4 = vcmp.ge.f32.partialorder %v384_v43, 0.0  ;;  %v694_v51 = vmul.f32 %v1116_v37, %v384_v43  ;;  %vm679_vm5 = vcmp.ge.f32.partialorder %v425_v44, 0.0  ;;  %v696_v52 = vmul.f32 %v1116_v37, %v425_v44 }
  0xf4   : > { %v709_v53 = vsel %vm676_vm2, %v382_v39, %v693_v47  ;;  %v711_v54 = vsel %vm678_vm3, %v423_v40, %v695_v48 }
  0xf5   : > { %v710_v55 = vsel %vm677_vm4, %v384_v43, %v694_v51  ;;  %v712_v56 = vsel %vm679_vm5, %v425_v44, %v696_v52 }
  0xf6   : > { %v741_v57 = vcombine.low %v709_v53, %v710_v55  ;;  %v742_v58 = vcombine.low %v711_v54, %v712_v56 }
  0xf7   : > { %v463_v59 = vpop.f32.mrb[4].mxu0  ;;  %v504_v60 = vpop.f32.mrb[4].mxu1 }
  0xf8   : > { %757 = vst [vmem:[%s1131_s11] sm:$0xff] %v741_v57  ;;  %758 = vst [vmem:[%s1131_s11 + $0x8] sm:$0xff] %v742_v58  ;;  %v464_v61 = vadd.f32 %v463_v59, %v1114_v35  ;;  %v505_v62 = vadd.f32 %v504_v60, %v1114_v35  ;;  %v465_v63 = vpop.f32.mrb[5].mxu0  ;;  %v506_v0 = vpop.f32.mrb[5].mxu1 }
  0xf9   : > { %v466_v1 = vadd.f32 %v465_v63, %v1114_v35  ;;  %v507_v2 = vadd.f32 %v506_v0, %v1114_v35  ;;  %v467_v3 = vpop.f32.mrb[6].mxu0  ;;  %v508_v4 = vpop.f32.mrb[6].mxu1 }
  0xfa   : > { %vm680_vm6 = vcmp.ge.f32.partialorder %v464_v61, 0.0  ;;  %v697_v5 = vmul.f32 %v1116_v37, %v464_v61  ;;  %vm682_vm7 = vcmp.ge.f32.partialorder %v505_v62, 0.0  ;;  %v699_v6 = vmul.f32 %v1116_v37, %v505_v62  ;;  %v468_v7 = vpop.f32.mrb[7].mxu0  ;;  %v509_v8 = vpop.f32.mrb[7].mxu1 }
  0xfb   : > { %vm681_vm8 = vcmp.ge.f32.partialorder %v466_v1, 0.0  ;;  %v698_v9 = vmul.f32 %v1116_v37, %v466_v1  ;;  %vm683_vm9 = vcmp.ge.f32.partialorder %v507_v2, 0.0  ;;  %v700_v10 = vmul.f32 %v1116_v37, %v507_v2 }
  0xfc   : > { %v713_v11 = vsel %vm680_vm6, %v464_v61, %v697_v5  ;;  %v715_v12 = vsel %vm682_vm7, %v505_v62, %v699_v6 }
  0xfd   : > { %v714_v13 = vsel %vm681_vm8, %v466_v1, %v698_v9  ;;  %v716_v14 = vsel %vm683_vm9, %v507_v2, %v700_v10 }
  0xfe   : > { %v743_v15 = vcombine.low %v713_v11, %v714_v13  ;;  %v744_v16 = vcombine.low %v715_v12, %v716_v14 }
  0xff   : > { %v545_v17 = vpop.f32.mrb[8].mxu0  ;;  %v586_v18 = vpop.f32.mrb[8].mxu1 }
 0x100   : > { %759 = vst [vmem:[%s1131_s11 + $0x10] sm:$0xff] %v743_v15  ;;  %760 = vst [vmem:[%s1131_s11 + $0x18] sm:$0xff] %v744_v16  ;;  %v546_v19 = vadd.f32 %v545_v17, %v1114_v35  ;;  %v587_v20 = vadd.f32 %v586_v18, %v1114_v35  ;;  %v547_v21 = vpop.f32.mrb[9].mxu0  ;;  %v588_v22 = vpop.f32.mrb[9].mxu1 }
 0x101   : > { %v548_v23 = vadd.f32 %v547_v21, %v1114_v35  ;;  %v589_v24 = vadd.f32 %v588_v22, %v1114_v35  ;;  %v549_v25 = vpop.f32.mrb[10].mxu0  ;;  %v590_v26 = vpop.f32.mrb[10].mxu1 }
 0x102   : > { %vm684_vm10 = vcmp.ge.f32.partialorder %v546_v19, 0.0  ;;  %v701_v27 = vmul.f32 %v1116_v37, %v546_v19  ;;  %vm686_vm11 = vcmp.ge.f32.partialorder %v587_v20, 0.0  ;;  %v703_v28 = vmul.f32 %v1116_v37, %v587_v20  ;;  %v550_v29 = vpop.f32.mrb[11].mxu0  ;;  %v591_v30 = vpop.f32.mrb[11].mxu1 }
 0x103   : > { %vm685_vm12 = vcmp.ge.f32.partialorder %v548_v23, 0.0  ;;  %v702_v31 = vmul.f32 %v1116_v37, %v548_v23  ;;  %vm687_vm13 = vcmp.ge.f32.partialorder %v589_v24, 0.0  ;;  %v704_v32 = vmul.f32 %v1116_v37, %v589_v24 }
 0x104   : > { %v717_v33 = vsel %vm684_vm10, %v546_v19, %v701_v27  ;;  %v719_v34 = vsel %vm686_vm11, %v587_v20, %v703_v28 }
 0x105   : > { %v718_v36 = vsel %vm685_vm12, %v548_v23, %v702_v31  ;;  %v720_v38 = vsel %vm687_vm13, %v589_v24, %v704_v32 }
 0x106   : > { %v745_v39 = vcombine.low %v717_v33, %v718_v36  ;;  %v746_v40 = vcombine.low %v719_v34, %v720_v38 }
 0x107   : > { %v627_v41 = vpop.f32.mrb[12].mxu0  ;;  %v668_v42 = vpop.f32.mrb[12].mxu1 }
 0x108   : > { %761 = vst [vmem:[%s1131_s11 + $0x20] sm:$0xff] %v745_v39  ;;  %762 = vst [vmem:[%s1131_s11 + $0x28] sm:$0xff] %v746_v40  ;;  %v628_v43 = vadd.f32 %v627_v41, %v1114_v35  ;;  %v669_v44 = vadd.f32 %v668_v42, %v1114_v35  ;;  %v629_v45 = vpop.f32.mrb[13].mxu0  ;;  %v670_v46 = vpop.f32.mrb[13].mxu1 }
 0x109   : > { %v630_v47 = vadd.f32 %v629_v45, %v1114_v35  ;;  %v671_v48 = vadd.f32 %v670_v46, %v1114_v35  ;;  %v631_v49 = vpop.f32.mrb[14].mxu0  ;;  %v672_v50 = vpop.f32.mrb[14].mxu1 }
 0x10a   : > { %vm688_vm14 = vcmp.ge.f32.partialorder %v628_v43, 0.0  ;;  %v705_v51 = vmul.f32 %v1116_v37, %v628_v43  ;;  %vm690_vm15 = vcmp.ge.f32.partialorder %v669_v44, 0.0  ;;  %v707_v52 = vmul.f32 %v1116_v37, %v669_v44  ;;  %v632_v53 = vpop.f32.mrb[15].mxu0  ;;  %v673_v54 = vpop.f32.mrb[15].mxu1 }
 0x10b   : > { %vm689_vm0 = vcmp.ge.f32.partialorder %v630_v47, 0.0  ;;  %v706_v55 = vmul.f32 %v1116_v37, %v630_v47  ;;  %vm691_vm1 = vcmp.ge.f32.partialorder %v671_v48, 0.0  ;;  %v708_v56 = vmul.f32 %v1116_v37, %v671_v48 }
 0x10c   : > { %v721_v57 = vsel %vm688_vm14, %v628_v43, %v705_v51  ;;  %v723_v35 = vsel %vm690_vm15, %v669_v44, %v707_v52 }
 0x10d   : > { %v722_v58 = vsel %vm689_vm0, %v630_v47, %v706_v55  ;;  %v724_v59 = vsel %vm691_vm1, %v671_v48, %v708_v56 }
 0x10e   : > { %v747_v60 = vcombine.low %v721_v57, %v722_v58  ;;  %v748_v61 = vcombine.low %v723_v35, %v724_v59 }
 0x110   : > { %763 = vst [vmem:[%s1131_s11 + $0x30] sm:$0xff] %v747_v60  ;;  %764 = vst [vmem:[%s1131_s11 + $0x38] sm:$0xff] %v748_v61 }
 0x111 PF: > { %s15_s21 = sadd.s32 1, %s996_s21   ;;  %s1185_s17 = smov %s988_s19 }
 0x112   : > { %p12_p7 = scmp.ge.s32.totalorder %s15_s21, 18   ;;  %s1186_s18 = smov %s992_s20 }
 0x113   : > { %s1187_s19 = smov %s1190_s3  ;;  %s1188_s20 = smov %s1194_s22 }
 0x114   :  { %14 = sbr.rel (!%p12_p7) target bundleno = 3 (0x3), region = 66 }

// kernel: pafem_forward.3
= control target key start
LH: loop header
LB: loop body
LE: loop exit
PB: predicated region body
PF: predicated region fallthrough
CT: control target
= control target key end

     0   :  { %s1273_s20 = smov 0   ;;  %s1511_s0 = inlined_call_operand.vmem [shape: bf16[2,4,290], index: 0, kind: input, shape index: {}]   ;;  %s1512_s1 = inlined_call_operand.vmem [shape: f32[2,256], index: 1, kind: input, shape index: {}]   ;;  %s1513_s2 = inlined_call_operand.vmem [shape: bf16[9,8,4], index: 2, kind: input, shape index: {}]   ;;  %s1514_s3 = inlined_call_operand.vmem [shape: f32[8,1], index: 3, kind: input, shape index: {}]   ;;  %s1515_s4 = inlined_call_operand.<no memory space> [shape: f32[1], index: 4, kind: input, shape index: {}]   ;;  %s1516_s5 = inlined_call_operand.vmem [shape: f32[2,8,256], index: 5, kind: output, shape index: {}]  }
   0x1   :  { %10 = sst [smem:[#allocation2]] %s1515_s4 }
   0x2 LB: > { %s1155_s21 = sadd.s32 4294967295, %s1228_s20   ;;  %p1159_p0 = scmp.ge.s32.totalorder %s1228_s20, 1  ;;  %s1228_s20 = sphi %s1273_s20, %s16_s20  }
   0x3   : > { %p188_p1 = scmp.lt.s32.totalorder %s1228_s20, 3 }
   0x5   : > { %p189_p2 = pnand %p1159_p0, %p188_p1 }
   0x6   : > { %p216_p3 = scmp.lt.s32.totalorder (!%p189_p2), %s1155_s21, 1  ;;  %v303_v0 = vlaneseq (!%p189_p2)  ;;  %v1230_v1 = vmov (!%p189_p2), 1983009808   ;;  %v1231_v6 = vmov (!%p189_p2), 0   ;;  %s1232_s25 = smov (!%p189_p2), 126   ;;  %vm245_vm0 = vcmask (!%p189_p2), 1041408  }
   0x7   : > { %192 = sbr.rel (%p189_p2) target bundleno = 408 (0x198), region = 40  ;;  %v321_v2 = vunpack.c.l.s4 (!%p189_p2), %v1230_v1  ;;  %284 = vmatprep.mubr.bf16.mxu0 (!%p189_p2), %v1231_v6  ;;  %385 = vmatprep.mubr.bf16.mxu1 (!%p189_p2), %v1231_v6  ;;  %s1233_s26 = smov (!%p189_p2), 127   ;;  %v231_v25 = vld [vmem:[%s1513_s2] sm:$0xf] (!%p189_p2)  ;;  %vm241_vm1 = vcmask (!%p189_p2), 31744   ;;  %vm341_vm2 = vcmask (!%p189_p2), 1039360  }
   0x8   : > { %v1283_v3 = vshrl.u32 (!%p189_p2), %v303_v0, 7  ;;  %1213 = vset.pattern.permute.xlu0 (!%p189_p2), %v1231_v6  ;;  %s1234_s27 = smov (!%p189_p2), 112   ;;  %s1235_s30 = smov (!%p189_p2), 111   ;;  %v1082_v51 = vld [vmem:[%s1514_s3] sm:$0xff] (!%p189_p2)  ;;  %vm440_vm3 = vcmask (!%p189_p2), 1031168   ;;  %vm539_vm4 = vcmask (!%p189_p2), 916480  }
   0x9   : > { %v322_v4 = vunpack.c.0.s8 (!%p189_p2), %v321_v2  ;;  %s1236_s6 = smov (!%p189_p2), 110   ;;  %s1237_s7 = smov (!%p189_p2), 96   ;;  %v1167_v61 = vld [vmem:[%s1513_s2 + $0x4] sm:$0xf] (!%p189_p2)  ;;  %vm639_vm5 = vcmask (!%p189_p2), 908288   ;;  %vm720_vm6 = vcmask (!%p189_p2), 900096  }
   0xa   : > { %s1238_s8 = smov (!%p189_p2), 95   ;;  %s1239_s9 = smov (!%p189_p2), 94   ;;  %vm816_vm7 = vcmask (!%p189_p2), 785408   ;;  %vm916_vm8 = vcmask (!%p189_p2), 777216   ;;  %vm1012_vm9 = vcmask (!%p189_p2), 769024  }
   0xb   : > { %v1287_v5 = vsub.s32 (!%p189_p2), %v322_v4, %v1283_v3 }
   0xe   : > { %s1528_s21 = smov (!%p216_p3, %s1155_s21), 1 }
   0xf   : > { %s1194_s4 = smul.u32 6, %s1528_s21 }
  0x11   : > { %s1294_s24 = scalar_lea.vmem %s1511_s0, %s1194_s4 }
  0x12   : > { %v414_v7 = vld [vmem:[%s1294_s24] sm:$0x3f] }
  0x13   : > { %v315_v8 = vld [vmem:[%s1294_s24] sm:$0x3f]  ;;  %v425_v10 = vrot.slane %v414_v7, %v1287_v5  ;;  %v418_v13 = vcombine.high %v414_v7, %v414_v7 }
  0x14   : > { %v513_v9 = vld [vmem:[%s1294_s24] sm:$0x3f]  ;;  %v326_v11 = vrot.slane %v315_v8, %v1287_v5  ;;  %v319_v12 = vcombine.high %v315_v8, %v315_v8 }
  0x15   : > { %434 = vrot.lane.b32.xlu1 %v425_v10, %s1232_s25  ;;  %v524_v14 = vrot.slane %v513_v9, %v1287_v5  ;;  %v1164_v16 = vld.sshfl [vmem:[%s1294_s24] sm:$0x33 pattern:$0x76325410]  ;;  %v432_v18 = vrot.slane %v418_v13, %v1287_v5  ;;  %v433_v21 = vcombine.high %v425_v10, %v425_v10  ;;  %v517_v23 = vcombine.high %v513_v9, %v513_v9 }
  0x16   : > { %335 = vrot.lane.b32.xlu0 %v326_v11, %s1233_s26  ;;  %v333_v15 = vrot.slane %v319_v12, %v1287_v5  ;;  %v334_v17 = vcombine.high %v326_v11, %v326_v11  ;;  %v240_v19 = vcombine.high %v1164_v16, %v1164_v16  ;;  %v247_v20 = vsel %vm245_vm0, %v1164_v16, 0  ;;  %v613_v24 = vld [vmem:[%s1294_s24] sm:$0x3f]  ;;  %v1173_v11 = vld [vmem:[%s1513_s2 + $0xc] sm:$0xf] }
  0x17   : > { %v532_v22 = vcombine.high %v524_v14, %v524_v14  ;;  %v531_v26 = vrot.slane %v517_v23, %v1287_v5  ;;  %v624_v27 = vrot.slane %v613_v24, %v1287_v5  ;;  %v617_v28 = vcombine.high %v613_v24, %v613_v24  ;;  %v694_v29 = vld [vmem:[%s1294_s24] sm:$0x3f] }
  0x18   : > { %1165 = vmatprep.subr.msk.bf16.mxu0 %vm245_vm0, %v240_v19  ;;  %v705_v32 = vrot.slane %v694_v29, %v1287_v5  ;;  %v698_v34 = vcombine.high %v694_v29, %v694_v29  ;;  %v790_v35 = vld [vmem:[%s1294_s24] sm:$0x3f] }
  0x19   : > { %339 = vrot.lane.b32.xlu1 %v333_v15, %s1233_s26  ;;  %253 = vmatpush1.bf16.msra.mxu0 %v247_v20  ;;  %v632_v30 = vcombine.high %v624_v27, %v624_v27  ;;  %v631_v31 = vrot.slane %v617_v28, %v1287_v5  ;;  %v801_v37 = vrot.slane %v790_v35, %v1287_v5  ;;  %v890_v39 = vld [vmem:[%s1294_s24] sm:$0x3f] }
  0x1a   : > { %533 = vrot.lane.b32.xlu0 %v524_v14, %s1234_s27  ;;  %v713_v33 = vcombine.high %v705_v32, %v705_v32  ;;  %v712_v36 = vrot.slane %v698_v34, %v1287_v5  ;;  %v794_v38 = vcombine.high %v790_v35, %v790_v35  ;;  %v901_v42 = vrot.slane %v890_v39, %v1287_v5  ;;  %v986_v45 = vld [vmem:[%s1294_s24] sm:$0x3f] }
  0x1b   : > { %v809_v40 = vcombine.high %v801_v37, %v801_v37  ;;  %v894_v44 = vcombine.high %v890_v39, %v890_v39  ;;  %v997_v47 = vrot.slane %v986_v45, %v1287_v5  ;;  %v990_v48 = vcombine.high %v986_v45, %v986_v45  ;;  %v1185_v39 = vld [vmem:[%s1513_s2 + $0x1c] sm:$0xf]  ;;  %v1188_v45 = vld [vmem:[%s1513_s2 + $0x20] sm:$0xf] }
  0x1c   : > { %1166 = vmatmul.mubr.msk.bf16.vlgmr.msra.gmra.mrb[0].mxu0 %vm241_vm1, %v231_v25  ;;  %v808_v41 = vrot.slane %v794_v38, %v1287_v5  ;;  %v909_v43 = vcombine.high %v901_v42, %v901_v42  ;;  %v1179_v25 = vld [vmem:[%s1513_s2 + $0x14] sm:$0xf] }
  0x1d   : > { %438 = vrot.lane.b32.xlu1 %v432_v18, %s1232_s25  ;;  %484 = vmatprep.mubr.bf16.mxu0 %v1231_v6  ;;  %v908_v46 = vrot.slane %v894_v44, %v1287_v5  ;;  %v1005_v49 = vcombine.high %v997_v47, %v997_v47  ;;  %v1004_v50 = vrot.slane %v990_v48, %v1287_v5  ;;  %v1170_v5 = vld [vmem:[%s1513_s2 + $0x8] sm:$0xf] }
  0x1e   : > { %337 = vrot.lane.b32.xlu0 %v334_v17, %s1233_s26  ;;  %v1176_v17 = vld [vmem:[%s1513_s2 + $0x10] sm:$0xf] }
  0x21   : > { %535 = vrot.lane.b32.xlu1 %v532_v22, %s1234_s27 }
  0x22   : > { %436 = vrot.lane.b32.xlu0 %v433_v21, %s1232_s25 }
  0x25   : > { %633 = vrot.lane.b32.xlu1 %v624_v27, %s1235_s30 }
  0x26   : > { %537 = vrot.lane.b32.xlu0 %v531_v26, %s1234_s27 }
  0x29   : > { %637 = vrot.lane.b32.xlu1 %v631_v31, %s1235_s30  ;;  %v1182_v31 = vld [vmem:[%s1513_s2 + $0x18] sm:$0xf] }
  0x2a   : > { %635 = vrot.lane.b32.xlu0 %v632_v30, %s1235_s30 }
  0x2d   : > { %716 = vrot.lane.b32.xlu1 %v713_v33, %s1236_s6 }
  0x2e   : > { %714 = vrot.lane.b32.xlu0 %v705_v32, %s1236_s6 }
  0x31   : > { %810 = vrot.lane.b32.xlu1 %v801_v37, %s1237_s7 }
  0x32   : > { %718 = vrot.lane.b32.xlu0 %v712_v36, %s1236_s6 }
  0x35   : > { %814 = vrot.lane.b32.xlu1 %v808_v41, %s1237_s7 }
  0x36   : > { %812 = vrot.lane.b32.xlu0 %v809_v40, %s1237_s7 }
  0x39   : > { %912 = vrot.lane.b32.xlu1 %v909_v43, %s1238_s8 }
  0x3a   : > { %910 = vrot.lane.b32.xlu0 %v901_v42, %s1238_s8 }
  0x3d   : > { %1006 = vrot.lane.b32.xlu1 %v997_v47, %s1239_s9 }
  0x3e   : > { %914 = vrot.lane.b32.xlu0 %v908_v46, %s1238_s8  ;;  %s1090_s8 = sld [smem:[#allocation2]] }
  0x41   : > { %1010 = vrot.lane.b32.xlu1 %v1004_v50, %s1239_s9  ;;  %v227_v50 = vld [vmem:[%s1512_s1] ss:$2 sm:$0x3] }
  0x42   : > { %1008 = vrot.lane.b32.xlu0 %v1005_v49, %s1239_s9  ;;  %s1193_s9 = sshll.u32 %s1528_s21, 4 }
  0x43   : > { %s225_s12 = scalar_lea.vmem %s1516_s5, %s1193_s9 }
  0x46   : > { %1085 = vperm.xlu0 %1213, %v1082_v51   ;;  %v1392_v51 = vld [vmem:[%s1512_s1 + $0x1] ss:$2 sm:$0x3] }
  0x47   : > { %vm395_vm14 = vcmp.ge.f32.partialorder %v1392_v51, 0.0 }
  0x87   : > { %v435_v52 = vpop.permute.xlu1 %434 }
  0x88   : > { %v336_v53 = vpop.permute.xlu0 %335 }
  0x8b   : > { %v340_v55 = vpop.permute.xlu1 %339 }
  0x8c   : > { %v534_v54 = vpop.permute.xlu0 %533 }
  0x8f   : > { %v439_v57 = vpop.permute.xlu1 %438 }
  0x90   : > { %v338_v56 = vpop.permute.xlu0 %337 }
  0x91   : > { %v343_v58 = vsel %vm341_vm2, %v338_v56, %v340_v55  ;;  %v342_v59 = vsel %vm341_vm2, %v336_v53, %v338_v56  ;;  %v1395_v53 = vadd.f32 -1.0, %v1392_v51  ;;  %vm397_vm2 = vcmp.le.f32.partialorder %v1392_v51, 15.0 }
  0x92   : > { %1168 = vmatprep.subr.msk.bf16.mxu1 %vm245_vm0, %v343_v58  ;;  %v348_v60 = vsel %vm245_vm0, %v342_v59, 0  ;;  %v1414_v55 = vsub.s32 0, %v1283_v3 }
  0x93   : > { %354 = vmatpush1.bf16.msra.mxu1 %v348_v60  ;;  %v536_v63 = vpop.permute.xlu1 %535  ;;  %vm298_vm13 = vcmp.ge.f32.partialorder %v1395_v53, 0.0 }
  0x94   : > { %v437_v62 = vpop.permute.xlu0 %436  ;;  %v540_v4 = vsel %vm539_vm4, %v534_v54, %v536_v63  ;;  %v1400_v54 = vadd.f32 1.0, %v1392_v51 }
  0x95   : > { %v441_v0 = vsel %vm440_vm3, %v435_v52, %v437_v62  ;;  %v442_v1 = vsel %vm440_vm3, %v437_v62, %v439_v57  ;;  %v546_v10 = vsel %vm245_vm0, %v540_v4, 0  ;;  %v293_v52 = vadd.f32 -1.0, %v227_v50 }
  0x96   : > { %v447_v2 = vsel %vm245_vm0, %v441_v0, 0  ;;  %1171 = vmatprep.subr.msk.bf16.mxu0 %vm245_vm0, %v442_v1  ;;  %1169 = vmatmul.mubr.msk.bf16.vlgmr.msra.gmra.mrb[0].mxu1 %vm241_vm1, %v1167_v61  ;;  %vm494_vm3 = vcmp.ge.f32.partialorder %v1400_v54, 0.0  ;;  %v1421_v57 = vsub.s32 1, %v1283_v3 }
  0x97   : > { %453 = vmatpush1.bf16.msra.mxu0 %v447_v2  ;;  %583 = vmatprep.mubr.bf16.mxu1 %v1231_v6  ;;  %v634_v8 = vpop.permute.xlu1 %633  ;;  %vm294_vm10 = vcmp.ge.f32.partialorder %v293_v52, 0.0  ;;  %vm295_vm11 = vcmp.le.f32.partialorder %v293_v52, 15.0 }
  0x98   : > { %v538_v7 = vpop.permute.xlu0 %537  ;;  %vm296_vm12 = vmand %vm294_vm10, %vm295_vm11 }
  0x99   : > { %v541_v9 = vsel %vm539_vm4, %v536_v63, %v538_v7  ;;  %vm299_vm15 = vmand %vm296_vm12, %vm298_vm13  ;;  %v869_v7 = vadd.f32 1.0, %v227_v50 }
  0x9a   : > { %1174 = vmatprep.subr.msk.bf16.mxu1 %vm245_vm0, %v541_v9  ;;  %1172 = vmatmul.mubr.msk.bf16.vlgmr.msra.gmra.mrb[4].mxu0 %vm241_vm1, %v1170_v5 }
  0x9b   : > { %552 = vmatpush1.bf16.msra.mxu1 %v546_v10  ;;  %683 = vmatprep.mubr.bf16.mxu0 %v1231_v6  ;;  %v638_v13 = vpop.permute.xlu1 %637 }
  0x9c   : > { %v636_v12 = vpop.permute.xlu0 %635 }
  0x9d   : > { %v640_v14 = vsel %vm639_vm5, %v634_v8, %v636_v12  ;;  %v641_v15 = vsel %vm639_vm5, %v636_v12, %v638_v13 }
  0x9e   : > { %v646_v16 = vsel %vm245_vm0, %v640_v14, 0  ;;  %1177 = vmatprep.subr.msk.bf16.mxu0 %vm245_vm0, %v641_v15  ;;  %1175 = vmatmul.mubr.msk.bf16.vlgmr.msra.gmra.mrb[4].mxu1 %vm241_vm1, %v1173_v11 }
  0x9f   : > { %652 = vmatpush1.bf16.msra.mxu0 %v646_v16  ;;  %764 = vmatprep.mubr.bf16.mxu1 %v1231_v6  ;;  %v717_v19 = vpop.permute.xlu1 %716 }
  0xa0   : > { %v715_v18 = vpop.permute.xlu0 %714 }
  0xa1   : > { %v721_v20 = vsel %vm720_vm6, %v715_v18, %v717_v19 }
  0xa2   : > { %1178 = vmatmul.mubr.msk.bf16.vlgmr.msra.gmra.mrb[8].mxu0 %vm241_vm1, %v1176_v17  ;;  %v727_v24 = vsel %vm245_vm0, %v721_v20, 0 }
  0xa3   : > { %860 = vmatprep.mubr.bf16.mxu0 %v1231_v6  ;;  %v811_v22 = vpop.permute.xlu1 %810 }
  0xa4   : > { %v719_v21 = vpop.permute.xlu0 %718 }
  0xa5   : > { %v722_v23 = vsel %vm720_vm6, %v717_v19, %v719_v21  ;;  %vm593_vm6 = vcmp.ge.f32.partialorder %v227_v50, 0.0 }
  0xa6   : > { %1180 = vmatprep.subr.msk.bf16.mxu1 %vm245_vm0, %v722_v23 }
  0xa7   : > { %733 = vmatpush1.bf16.msra.mxu1 %v727_v24  ;;  %v815_v27 = vpop.permute.xlu1 %814 }
  0xa8   : > { %v813_v26 = vpop.permute.xlu0 %812 }
  0xa9   : > { %v817_v28 = vsel %vm816_vm7, %v811_v22, %v813_v26  ;;  %v818_v29 = vsel %vm816_vm7, %v813_v26, %v815_v27  ;;  %vm594_vm7 = vcmp.le.f32.partialorder %v227_v50, 15.0 }
  0xaa   : > { %v823_v30 = vsel %vm245_vm0, %v817_v28, 0  ;;  %1181 = vmatmul.mubr.msk.bf16.vlgmr.msra.gmra.mrb[8].mxu1 %vm241_vm1, %v1179_v25  ;;  %1183 = vmatprep.subr.msk.bf16.mxu0 %vm245_vm0, %v818_v29  ;;  %vm1423_vm10 = vmand %vm593_vm6, %vm594_vm7 }
  0xab   : > { %829 = vmatpush1.bf16.msra.mxu0 %v823_v30  ;;  %960 = vmatprep.mubr.bf16.mxu1 %v1231_v6  ;;  %v913_v33 = vpop.permute.xlu1 %912 }
  0xac   : > { %v911_v32 = vpop.permute.xlu0 %910 }
  0xad   : > { %v917_v34 = vsel %vm916_vm8, %v911_v32, %v913_v33 }
  0xae   : > { %1184 = vmatmul.mubr.msk.bf16.vlgmr.msra.gmra.mrb[12].mxu0 %vm241_vm1, %v1182_v31  ;;  %v923_v38 = vsel %vm245_vm0, %v917_v34, 0 }
  0xaf   : > { %1056 = vmatprep.mubr.bf16.mxu0 %v1231_v6  ;;  %v1007_v36 = vpop.permute.xlu1 %1006 }
  0xb0   : > { %v915_v35 = vpop.permute.xlu0 %914 }
  0xb1   : > { %v918_v37 = vsel %vm916_vm8, %v913_v33, %v915_v35  ;;  %vm495_vm8 = vmand %vm296_vm12, %vm494_vm3 }
  0xb2   : > { %1186 = vmatprep.subr.msk.bf16.mxu1 %vm245_vm0, %v918_v37 }
  0xb3   : > { %929 = vmatpush1.bf16.msra.mxu1 %v923_v38  ;;  %v1011_v41 = vpop.permute.xlu1 %1010 }
  0xb4   : > { %v1009_v40 = vpop.permute.xlu0 %1008 }
  0xb5   : > { %v1013_v42 = vsel %vm1012_vm9, %v1007_v36, %v1009_v40  ;;  %v1014_v43 = vsel %vm1012_vm9, %v1009_v40, %v1011_v41  ;;  %vm496_vm9 = vcmp.le.f32.partialorder %v1400_v54, 15.0 }
  0xb6   : > { %v1019_v44 = vsel %vm245_vm0, %v1013_v42, 0  ;;  %1187 = vmatmul.mubr.msk.bf16.vlgmr.msra.gmra.mrb[12].mxu1 %vm241_vm1, %v1185_v39  ;;  %1189 = vmatprep.subr.msk.bf16.mxu0 %vm245_vm0, %v1014_v43  ;;  %vm300_vm0 = vcmp.le.f32.partialorder %v1395_v53, 15.0  ;;  %vm497_vm11 = vmand %vm495_vm8, %vm496_vm9 }
  0xb7   : > { %1025 = vmatpush1.bf16.msra.mxu0 %v1019_v44  ;;  %vm301_vm4 = vmand %vm299_vm15, %vm300_vm0  ;;  %v498_v62 = vsel %vm497_vm11, 1, %v1231_v6  ;;  %vm870_vm11 = vcmp.ge.f32.partialorder %v869_v7, 0.0 }
  0xb8   : > { %v302_v56 = vsel %vm301_vm4, 1, %v1231_v6  ;;  %v502_v1 = vrot.slane %v498_v62, %v1414_v55  ;;  %v506_v2 = vrot.slane %v498_v62, %v1421_v57 }
  0xb9   : > { %v306_v60 = vrot.slane %v302_v56, %v1414_v55  ;;  %v310_v61 = vrot.slane %v302_v56, %v1421_v57 }
  0xba   : > { %1190 = vmatmul.mubr.msk.bf16.vlgmr.msra.gmra.mrb[16].mxu0 %vm241_vm1, %v1188_v45  ;;  %vm396_vm1 = vmand %vm296_vm12, %vm395_vm14  ;;  %vm1450_vm7 = vcmp.eq.s32.totalorder %v502_v1, 1  ;;  %vm1454_vm8 = vcmp.eq.s32.totalorder %v506_v2, 1 }
  0xbb   : > { %vm398_vm5 = vmand %vm396_vm1, %vm397_vm2  ;;  %vm311_vm15 = vcmp.eq.s32.totalorder %v306_v60, 1  ;;  %vm1441_vm4 = vcmp.eq.s32.totalorder %v310_v61, 1 }
  0xbc   : > { %v399_v59 = vsel %vm398_vm5, 1, %v1231_v6  ;;  %vm596_vm12 = vmand %vm1423_vm10, %vm298_vm13 }
  0xbd   : > { %v403_v3 = vrot.slane %v399_v59, %v1414_v55  ;;  %v407_v63 = vrot.slane %v399_v59, %v1421_v57  ;;  %vm597_vm1 = vmand %vm596_vm12, %vm300_vm0  ;;  %vm871_vm12 = vcmp.le.f32.partialorder %v869_v7, 15.0 }
  0xbe   : > { %v598_v5 = vsel %vm597_vm1, 1, %v1231_v6 }
  0xbf   : > { %vm408_vm5 = vcmp.eq.s32.totalorder %v403_v3, 1  ;;  %vm409_vm6 = vcmp.eq.s32.totalorder %v407_v63, 1  ;;  %v602_v17 = vrot.slane %v598_v5, %v1414_v55  ;;  %v606_v20 = vrot.slane %v598_v5, %v1421_v57 }
  0xc1   : > { %vm607_vm1 = vcmp.eq.s32.totalorder %v602_v17, 1 }
  0xef   : > { %v286_v46 = vpop.f32.mrb[0].mxu0 }
  0xf0   : > { %v288_v47 = vpop.f32.mrb[1].mxu0  ;;  %v313_v4 = vsel %vm311_vm15, %v286_v46, 0.0  ;;  %vm773_vm15 = vmand %vm1423_vm10, %vm494_vm3 }
  0xf1   : > { %v290_v48 = vpop.f32.mrb[2].mxu0  ;;  %v314_v8 = vsel %vm1441_vm4, %v288_v47, 0.0  ;;  %vm1468_vm4 = vmand %vm870_vm11, %vm871_vm12 }
  0xf2   : > { %v291_v49 = vpop.f32.mrb[3].mxu0  ;;  %vm873_vm10 = vmand %vm1468_vm4, %vm298_vm13 }
  0xf3   : > { %vm969_vm13 = vmand %vm1468_vm4, %vm395_vm14 }
  0xf4   : > { %vm970_vm11 = vmand %vm969_vm13, %vm397_vm2 }
  0xf5   : > { %vm1065_vm12 = vmand %vm1468_vm4, %vm494_vm3  ;;  %v971_v3 = vsel %vm970_vm11, 1, %v1231_v6 }
  0xf6   : > { %vm1066_vm2 = vmand %vm1065_vm12, %vm496_vm9 }
 0x169   : > { %v387_v9 = vpop.f32.mrb[0].mxu1 }
 0x16a   : > { %v410_v10 = vsel %vm408_vm5, %v387_v9, 0.0  ;;  %v389_v11 = vpop.f32.mrb[1].mxu1  ;;  %vm608_vm5 = vcmp.eq.s32.totalorder %v606_v20, 1  ;;  %v1067_v9 = vsel %vm1066_vm2, 1, %v1231_v6 }
 0x16b   : > { %v412_v13 = vadd.f32 %v410_v10, %v313_v4  ;;  %v411_v14 = vsel %vm409_vm6, %v389_v11, 0.0  ;;  %v391_v15 = vpop.f32.mrb[2].mxu1  ;;  %vm774_vm6 = vmand %vm773_vm15, %vm496_vm9  ;;  %v975_v4 = vrot.slane %v971_v3, %v1414_v55  ;;  %v1071_v10 = vrot.slane %v1067_v9, %v1414_v55 }
 0x16c   : > { %v413_v18 = vadd.f32 %v411_v14, %v314_v8  ;;  %v392_v19 = vpop.f32.mrb[3].mxu1  ;;  %v775_v38 = vsel %vm774_vm6, 1, %v1231_v6  ;;  %v979_v8 = vrot.slane %v971_v3, %v1421_v57  ;;  %v1075_v54 = vrot.slane %v1067_v9, %v1421_v57 }
 0x16d   : > { %v486_v21 = vpop.f32.mrb[4].mxu0  ;;  %v779_v43 = vrot.slane %v775_v38, %v1414_v55  ;;  %v783_v45 = vrot.slane %v775_v38, %v1421_v57  ;;  %vm980_vm3 = vcmp.eq.s32.totalorder %v975_v4, 1  ;;  %vm1076_vm9 = vcmp.eq.s32.totalorder %v1071_v10, 1 }
 0x16e   : > { %v509_v22 = vsel %vm1450_vm7, %v486_v21, 0.0  ;;  %v488_v23 = vpop.f32.mrb[5].mxu0  ;;  %vm874_vm7 = vmand %vm873_vm10, %vm300_vm0  ;;  %vm1077_vm4 = vcmp.eq.s32.totalorder %v1075_v54, 1  ;;  %v1086_v21 = vpop.permute.xlu0 %1085 }
 0x16f   : > { %v511_v24 = vadd.f32 %v509_v22, %v412_v13  ;;  %v510_v25 = vsel %vm1454_vm8, %v488_v23, 0.0  ;;  %v490_v26 = vpop.f32.mrb[6].mxu0  ;;  %v875_v47 = vsel %vm874_vm7, 1, %v1231_v6  ;;  %vm784_vm8 = vcmp.eq.s32.totalorder %v779_v43, 1 }
 0x170   : > { %v512_v28 = vadd.f32 %v510_v25, %v413_v18  ;;  %v491_v29 = vpop.f32.mrb[7].mxu0  ;;  %v879_v48 = vrot.slane %v875_v47, %v1414_v55  ;;  %vm785_vm0 = vcmp.eq.s32.totalorder %v783_v45, 1  ;;  %v883_v49 = vrot.slane %v875_v47, %v1421_v57 }
 0x171   : > { %v585_v30 = vpop.f32.mrb[4].mxu1 }
 0x172   : > { %v609_v31 = vsel %vm607_vm1, %v585_v30, 0.0  ;;  %v587_v32 = vpop.f32.mrb[5].mxu1  ;;  %vm884_vm14 = vcmp.eq.s32.totalorder %v879_v48, 1  ;;  %vm885_vm15 = vcmp.eq.s32.totalorder %v883_v49, 1  ;;  %vm981_vm1 = vcmp.eq.s32.totalorder %v979_v8, 1 }
 0x173   : > { %v611_v33 = vadd.f32 %v609_v31, %v511_v24  ;;  %v610_v34 = vsel %vm608_vm5, %v587_v32, 0.0  ;;  %v589_v35 = vpop.f32.mrb[6].mxu1  ;;  %v1093_v24 = vstv %s1090_s8 }
 0x174   : > { %v612_v36 = vadd.f32 %v610_v34, %v512_v28  ;;  %v590_v37 = vpop.f32.mrb[7].mxu1 }
 0x175   : > { %v685_v39 = vpop.f32.mrb[8].mxu0 }
 0x176   : > { %v692_v40 = vadd.f32 %v685_v39, %v611_v33  ;;  %v687_v41 = vpop.f32.mrb[9].mxu0 }
 0x177   : > { %v693_v42 = vadd.f32 %v687_v41, %v612_v36  ;;  %v689_v44 = vpop.f32.mrb[10].mxu0 }
 0x178   : > { %v690_v46 = vpop.f32.mrb[11].mxu0 }
 0x17d   : > { %v766_v50 = vpop.f32.mrb[8].mxu1 }
 0x17e   : > { %v786_v52 = vsel %vm784_vm8, %v766_v50, 0.0  ;;  %v768_v53 = vpop.f32.mrb[9].mxu1 }
 0x17f   : > { %v788_v56 = vadd.f32 %v786_v52, %v692_v40  ;;  %v787_v58 = vsel %vm785_vm0, %v768_v53, 0.0  ;;  %v770_v59 = vpop.f32.mrb[10].mxu1 }
 0x180   : > { %v789_v60 = vadd.f32 %v787_v58, %v693_v42  ;;  %v771_v61 = vpop.f32.mrb[11].mxu1 }
 0x181   : > { %v862_v62 = vpop.f32.mrb[12].mxu0 }
 0x182   : > { %v886_v51 = vsel %vm884_vm14, %v862_v62, 0.0  ;;  %v864_v63 = vpop.f32.mrb[13].mxu0 }
 0x183   : > { %v888_v0 = vadd.f32 %v886_v51, %v788_v56  ;;  %v887_v1 = vsel %vm885_vm15, %v864_v63, 0.0  ;;  %v866_v2 = vpop.f32.mrb[14].mxu0 }
 0x184   : > { %v889_v5 = vadd.f32 %v887_v1, %v789_v60  ;;  %v867_v7 = vpop.f32.mrb[15].mxu0 }
 0x189   : > { %v962_v11 = vpop.f32.mrb[12].mxu1 }
 0x18a   : > { %v982_v12 = vsel %vm980_vm3, %v962_v11, 0.0  ;;  %v964_v13 = vpop.f32.mrb[13].mxu1 }
 0x18b   : > { %v984_v14 = vadd.f32 %v982_v12, %v888_v0  ;;  %v983_v15 = vsel %vm981_vm1, %v964_v13, 0.0  ;;  %v966_v16 = vpop.f32.mrb[14].mxu1 }
 0x18c   : > { %v985_v17 = vadd.f32 %v983_v15, %v889_v5  ;;  %v967_v18 = vpop.f32.mrb[15].mxu1 }
 0x18d   : > { %v1058_v19 = vpop.f32.mrb[16].mxu0 }
 0x18e   : > { %v1078_v6 = vsel %vm1076_vm9, %v1058_v19, 0.0  ;;  %v1060_v20 = vpop.f32.mrb[17].mxu0 }
 0x18f   : > { %v1080_v55 = vadd.f32 %v1078_v6, %v984_v14  ;;  %v1079_v22 = vsel %vm1077_vm4, %v1060_v20, 0.0  ;;  %v1062_v23 = vpop.f32.mrb[18].mxu0 }
 0x190   : > { %v1081_v57 = vadd.f32 %v1079_v22, %v985_v17  ;;  %v1063_v25 = vpop.f32.mrb[19].mxu0 }
 0x191   : > { %v1088_v26 = vadd.f32 %v1086_v21, %v1080_v55 }
 0x192   : > { %v1089_v27 = vadd.f32 %v1086_v21, %v1081_v57 }
 0x193   : > { %vm1091_vm5 = vcmp.ge.f32.partialorder %v1088_v26, 0.0  ;;  %v1094_v28 = vmul.f32 %v1093_v24, %v1088_v26 }
 0x194   : > { %vm1092_vm6 = vcmp.ge.f32.partialorder %v1089_v27, 0.0  ;;  %v1095_v29 = vmul.f32 %v1093_v24, %v1089_v27 }
 0x195   : > { %v1096_v30 = vsel %vm1091_vm5, %v1088_v26, %v1094_v28 }
 0x196   : > { %v1097_v31 = vsel %vm1092_vm6, %v1089_v27, %v1095_v29  ;;  %1098 = vst [vmem:[%s225_s12] sm:$0xff] %v1096_v30 }
 0x197   : > { %1099 = vst [vmem:[%s225_s12 + $0x8] sm:$0xff] %v1097_v31 }
 0x198 PF: > { %s16_s20 = sadd.s32 1, %s1228_s20  }
 0x199   : > { %p13_p4 = scmp.ge.s32.totalorder %s16_s20, 4  }
 0x19b   :  { %15 = sbr.rel (!%p13_p4) target bundleno = 2 (0x2), region = 79 }

// kernel: pafem_forward.5
= control target key start
LH: loop header
LB: loop body
LE: loop exit
PB: predicated region body
PF: predicated region fallthrough
CT: control target
= control target key end

     0   :  { %13 = vsyncpa [#allocation3], 0  ;;  %s3200_s27 = smov 0   ;;  %s4244_s0 = inlined_call_operand.vmem [shape: bf16[2,8,460], index: 0, kind: input, shape index: {}]   ;;  %s4245_s1 = inlined_call_operand.vmem [shape: bf16[2,4,256], index: 1, kind: input, shape index: {}]   ;;  %s4246_s2 = inlined_call_operand.vmem [shape: f32[2,256], index: 2, kind: input, shape index: {}]   ;;  %s4247_s3 = inlined_call_operand.vmem [shape: bf16[28,4,8], index: 3, kind: input, shape index: {}]   ;;  %s4248_s4 = inlined_call_operand.vmem [shape: f32[4,4,1], index: 4, kind: input, shape index: {}]   ;;  %s4249_s5 = inlined_call_operand.vmem [shape: bf16[5,8,4], index: 5, kind: input, shape index: {}]   ;;  %s4250_s6 = inlined_call_operand.vmem [shape: f32[8,1], index: 6, kind: input, shape index: {}]   ;;  %s4251_s7 = inlined_call_operand.vmem [shape: f32[8], index: 7, kind: input, shape index: {}]   ;;  %s4252_s8 = inlined_call_operand.vmem [shape: f32[2,8,256], index: 8, kind: output, shape index: {}]  }
   0x1 LB: > { %s2924_s28 = sadd.s32 4294967295, %s3132_s27   ;;  %p2926_p0 = scmp.ge.s32.totalorder %s3132_s27, 1  ;;  %s3132_s27 = sphi %s3200_s27, %s19_s27  }
   0x2   : > { %p228_p1 = scmp.lt.s32.totalorder %s3132_s27, 3  ;;  %s256_s9 = sshll.u32 %s4251_s7, 4  ;;  %s257_s9 = int_to_ptr.vmem [resolvable:$true] %s256_s9 }
   0x3   : > { %p3064_p3 = scmp.eq.s32.totalorder %s2924_s28, 0  ;;  %s3107_s11 = scalar_lea.vmem %s257_s9, 16 }
   0x4   : > { %p3211_p2 = pnand %p2926_p0, %p228_p1  ;;  %p3108_p6 = scmp.ne.s32.totalorder %s257_s9, %s3107_s11 }
   0x5   : > { %p3115_p10 = scmp.lt.s32.totalorder %s257_s9, %s257_s9  ;;  %p3116_p11 = scmp.lt.s32.totalorder %s3107_s11, %s3107_s11 }
   0x6   : > { %p3060_p4 = pneg %p3211_p2 }
   0x7   : > { %p3117_p12 = por %p3116_p11, %p3115_p10 }
   0x8   : > { %p3061_p5 = pnand %p3064_p3, %p3060_p4 }
   0xa   : > { %p3109_p7 = pneg %p3061_p5 }
   0xc   : > { %p3110_p8 = pnand %p3109_p7, %p3108_p6 }
   0xe   : > { %p3111_p9 = pneg %p3110_p8 }
  0x10   : > { %p3118_p13 = pnand %p3117_p12, %p3111_p9 }
  0x12   : > { %3121 = shalt.err (!%p3118_p13)
}
  0x13   : > { %s3134_s12 = smov [#allocation2]   ;;  %285 = sbr.rel (%p3211_p2) target bundleno = 1187 (0x4a3), region = 52 }
  0x14   : > { %3063 = dma.vmem_to_smem (!%p3061_p5), %s257_s9, 16, %s3134_s12, [#allocation3]  }
  0x1a   : > { %3127 = dma.done.wait (%p3064_p3), [#allocation3], 16  }
  0x1b   : > { %3129 = vsyncadd (%p3064_p3), [#allocation3], 4294967280 }
  0x1c   : > { %291 = sfence }
  0x1d   : > { %p325_p0 = scmp.lt.s32.totalorder %s2924_s28, 1  ;;  %s3135_s17 = smov 26   ;;  %v4257_v4 = vmov 0   ;;  %v2973_v9 = vld [vmem:[%s4248_s4 + $0x4] sm:$0xf]  ;;  %vm367_vm0 = vcmask 211968  }
  0x1e   : > { %413 = vmatprep.mubr.bf16.mxu0 %v4257_v4  ;;  %485 = vmatprep.mubr.bf16.mxu1 %v4257_v4  ;;  %s3137_s18 = smov 60   ;;  %s3138_s19 = smov 58   ;;  %v347_v10 = vld [vmem:[%s4248_s4] sm:$0xf]  ;;  %v3007_v11 = vld [vmem:[%s4248_s4 + $0x8] sm:$0xf] }
  0x1f   : > { %s4354_s28 = smov (!%p325_p0, %s2924_s28), 1  ;;  %3095 = vset.pattern.permute.xlu1 %v4257_v4  ;;  %3096 = vset.pattern.permute.xlu0 %v4257_v4  ;;  %s3139_s20 = smov 56   ;;  %vm374_vm1 = vcmask 1043456   ;;  %vm441_vm2 = vcmask 490496   ;;  %v346_v20 = vld [vmem:[%s4247_s3] sm:$0x3] }
  0x20   : > { %s3053_s13 = sshll.u32 %s4354_s28, 4  ;;  %s3140_s21 = smov 28   ;;  %vm4262_vm3 = vcmask 64512   ;;  %v2943_v26 = vld [vmem:[%s4247_s3 + $0x2] sm:$0x3]  ;;  %vm524_vm4 = vcmask 474112  }
  0x21   : > { %s3230_s16 = scalar_lea.vmem %s4244_s0, %s3053_s13  ;;  %s3141_s22 = smov 24   ;;  %vm605_vm5 = vcmask 457728   ;;  %v2946_v34 = vld [vmem:[%s4247_s3 + $0x4] sm:$0x3]  ;;  %v2949_v40 = vld [vmem:[%s4247_s3 + $0x6] sm:$0x3] }
  0x22   : > { %v3233_v0 = vld [vmem:[%s3230_s16 + $0x8] ss:$0 sps:$4 sm:$0xff]   ;;  %v344_v1 = vld [vmem:[%s3230_s16] sm:$0xff]  ;;  %s3142_s23 = smov 124   ;;  %v3273_v8 = vld [vmem:[%s3230_s16 + $0xc] ss:$0 sps:$4 sm:$0xff]  }
  0x23   : > { %v3236_v2 = vcombine.low %v344_v1, %v344_v1  ;;  %365 = vrot.lane.b32.xlu1 %v3233_v0, %s3135_s17  ;;  %v3240_v3 = vcombine.high %v344_v1, %v344_v1  ;;  %v886_v5 = vld [vmem:[%s3230_s16 + $0x4] sm:$0xff]  ;;  %s3143_s24 = smov 122   ;;  %s3144_s25 = smov 120   ;;  %vm686_vm6 = vcmask 228352   ;;  %vm816_vm7 = vcmask 195584  }
  0x24   : > { %v3265_v6 = vcombine.high %v886_v5, %v886_v5  ;;  %v3268_v7 = vcombine.low %v886_v5, %v886_v5  ;;  %s3145_s10 = smov 94   ;;  %s3146_s11 = smov 90   ;;  %v2952_v48 = vld [vmem:[%s4247_s3 + $0x8] sm:$0x3]  ;;  %v2955_v50 = vld [vmem:[%s4247_s3 + $0xa] sm:$0x3] }
  0x25   : > { %361 = vrot.lane.b32.xlu0 %v3236_v2, %s3135_s17  ;;  %s3147_s12 = smov 86   ;;  %s3148_s14 = smov 30   ;;  %v2827_v54 = vld [vmem:[%s4250_s6] sm:$0xff]  ;;  %v3041_v55 = vld [vmem:[%s4248_s4 + $0xc] sm:$0xf]  ;;  %vm904_vm8 = vcmask 1014784  }
  0x26   : > { %s3149_s15 = smov 22   ;;  %s3152_s26 = smov 20   ;;  %v2958_v60 = vld [vmem:[%s4247_s3 + $0xc] sm:$0x3]  ;;  %vm986_vm9 = vcmask 998400   ;;  %vm1064_vm10 = vcmask 982016  }
  0x27   : > { %435 = vrot.lane.b32.xlu1 %v3236_v2, %s3137_s18  ;;  %s3153_s29 = smov 64   ;;  %v2961_v1 = vld [vmem:[%s4247_s3 + $0xe] sm:$0x3]  ;;  %vm4254_vm11 = vcmask 769024   ;;  %vm4255_vm12 = vcmask 703488   ;;  %vm2257_vm13 = vcmask 261120  }
  0x28   : > { %vm2383_vm14 = vcmask 162816   ;;  %vm4253_vm15 = vcmask 523264   ;;  %s2974_s30 = sld [smem:[#allocation2 + $0x1]] }
  0x29   : > { %363 = vrot.lane.b32.xlu0 %v3240_v3, %s3135_s17  ;;  %s3538_s17 = sld [smem:[#allocation2]] }
  0x2b   : > { %439 = vrot.lane.b32.xlu1 %v3233_v0, %s3137_s18 }
  0x2d   : > { %437 = vrot.lane.b32.xlu0 %v3240_v3, %s3137_s18 }
  0x2f   : > { %520 = vrot.lane.b32.xlu1 %v3240_v3, %s3138_s19 }
  0x31   : > { %518 = vrot.lane.b32.xlu0 %v3236_v2, %s3138_s19 }
  0x33   : > { %599 = vrot.lane.b32.xlu1 %v3236_v2, %s3139_s20 }
  0x35   : > { %522 = vrot.lane.b32.xlu0 %v3233_v0, %s3138_s19 }
  0x37   : > { %603 = vrot.lane.b32.xlu1 %v3233_v0, %s3139_s20 }
  0x39   : > { %601 = vrot.lane.b32.xlu0 %v3240_v3, %s3139_s20  ;;  %s3150_s20 = smov 116  }
  0x3b   : > { %682 = vrot.lane.b32.xlu1 %v3240_v3, %s3140_s21 }
  0x3d   : > { %680 = vrot.lane.b32.xlu0 %v3236_v2, %s3140_s21 }
  0x3f   : > { %810 = vrot.lane.b32.xlu1 %v3236_v2, %s3141_s22 }
  0x41   : > { %684 = vrot.lane.b32.xlu0 %v3233_v0, %s3140_s21  ;;  %s3151_s21 = smov 32  }
  0x43   : > { %814 = vrot.lane.b32.xlu1 %v3233_v0, %s3141_s22 }
  0x45   : > { %812 = vrot.lane.b32.xlu0 %v3240_v3, %s3141_s22  ;;  %s339_s22 = scalar_lea.vmem %s4252_s8, %s3053_s13 }
  0x47   : > { %900 = vrot.lane.b32.xlu1 %v3265_v6, %s3142_s23 }
  0x49   : > { %898 = vrot.lane.b32.xlu0 %v3268_v7, %s3142_s23 }
  0x4b   : > { %980 = vrot.lane.b32.xlu1 %v3268_v7, %s3143_s24 }
  0x4d   : > { %902 = vrot.lane.b32.xlu0 %v3273_v8, %s3142_s23 }
  0x4f   : > { %984 = vrot.lane.b32.xlu1 %v3273_v8, %s3143_s24 }
  0x51   : > { %982 = vrot.lane.b32.xlu0 %v3265_v6, %s3143_s24 }
  0x53   : > { %1060 = vrot.lane.b32.xlu1 %v3265_v6, %s3144_s25 }
  0x55   : > { %1058 = vrot.lane.b32.xlu0 %v3268_v7, %s3144_s25 }
  0x57   : > { %1138 = vperm.xlu1 %3095, %v2973_v9  }
  0x59   : > { %1062 = vrot.lane.b32.xlu0 %v3273_v8, %s3144_s25 }
  0x5b   : > { %1259 = vrot.lane.b32.xlu1 %v3236_v2, %s3145_s10 }
  0x5d   : > { %350 = vperm.xlu0 %3096, %v347_v10  }
  0x5f   : > { %1261 = vrot.lane.b32.xlu1 %v3240_v3, %s3145_s10 }
  0x61   : > { %1263 = vrot.lane.b32.xlu0 %v3233_v0, %s3145_s10 }
  0x63   : > { %1342 = vrot.lane.b32.xlu1 %v3236_v2, %s3146_s11 }
  0x65   : > { %1344 = vrot.lane.b32.xlu0 %v3240_v3, %s3146_s11 }
  0x67   : > { %1346 = vrot.lane.b32.xlu1 %v3233_v0, %s3146_s11 }
  0x69   : > { %1420 = vrot.lane.b32.xlu0 %v3236_v2, %s3147_s12 }
  0x6b   : > { %1422 = vrot.lane.b32.xlu1 %v3240_v3, %s3147_s12 }
  0x6d   : > { %1424 = vrot.lane.b32.xlu0 %v3233_v0, %s3147_s12 }
  0x6f   : > { %1501 = vrot.lane.b32.xlu1 %v3236_v2, %s3148_s14 }
  0x71   : > { %1503 = vrot.lane.b32.xlu0 %v3240_v3, %s3148_s14 }
  0x73   : > { %1505 = vrot.lane.b32.xlu1 %v3233_v0, %s3148_s14 }
  0x75   : > { %1627 = vrot.lane.b32.xlu0 %v3236_v2, %s3149_s15 }
  0x77   : > { %1629 = vrot.lane.b32.xlu1 %v3240_v3, %s3149_s15 }
  0x79   : > { %1631 = vrot.lane.b32.xlu0 %v3233_v0, %s3149_s15  ;;  %s3042_s15 = sld [smem:[#allocation2 + $0x3]] }
  0x7b   : > { %1705 = vrot.lane.b32.xlu1 %v3268_v7, %s3145_s10 }
  0x7d   : > { %1707 = vrot.lane.b32.xlu0 %v3265_v6, %s3145_s10 }
  0x7f   : > { %1709 = vrot.lane.b32.xlu1 %v3273_v8, %s3145_s10 }
  0x81   : > { %1786 = vrot.lane.b32.xlu0 %v3268_v7, %s3146_s11 }
  0x83   : > { %1788 = vrot.lane.b32.xlu1 %v3265_v6, %s3146_s11 }
  0x85   : > { %1790 = vrot.lane.b32.xlu0 %v3273_v8, %s3146_s11 }
  0x87   : > { %1863 = vrot.lane.b32.xlu1 %v3268_v7, %s3147_s12 }
  0x89   : > { %1865 = vrot.lane.b32.xlu0 %v3265_v6, %s3147_s12 }
  0x8b   : > { %1867 = vrot.lane.b32.xlu1 %v3273_v8, %s3147_s12  ;;  %s3154_s12 = smov 52  }
  0x8d   : > { %1942 = vperm.xlu0 %3096, %v3007_v11  }
  0x8f   : > { %2093 = vrot.lane.b32.xlu1 %v3236_v2, %s3143_s24 }
  0x91   : > { %2095 = vrot.lane.b32.xlu0 %v3240_v3, %s3143_s24 }
  0x93   : > { %2097 = vrot.lane.b32.xlu1 %v3233_v0, %s3143_s24  ;;  %s3054_s24 = sshll.u32 %s4354_s28, 2 }
  0x95   : > { %2170 = vrot.lane.b32.xlu0 %v3236_v2, %s3150_s20  ;;  %v366_v12 = vpop.permute.xlu1 %365 }
  0x97   : > { %v362_v13 = vpop.permute.xlu0 %361  ;;  %2172 = vrot.lane.b32.xlu1 %v3240_v3, %s3150_s20 }
  0x99   : > { %2174 = vrot.lane.b32.xlu0 %v3233_v0, %s3150_s20  ;;  %v436_v14 = vpop.permute.xlu1 %435 }
  0x9b   : > { %v364_v15 = vpop.permute.xlu0 %363  ;;  %2251 = vrot.lane.b32.xlu1 %v3236_v2, %s3151_s21 }
  0x9c   : > { %v368_v16 = vsel %vm367_vm0, %v362_v13, %v364_v15  ;;  %v3327_v17 = vsel %vm367_vm0, %v364_v15, %v366_v12 }
  0x9d   : > { %v3331_v18 = vsel %vm374_vm1, %v368_v16, 0  ;;  %2941 = vmatprep.subr.msk.bf16.mxu0 %vm374_vm1, %v3327_v17  ;;  %2253 = vrot.lane.b32.xlu0 %v3240_v3, %s3151_s21  ;;  %v440_v19 = vpop.permute.xlu1 %439 }
  0x9e   : > { %382 = vmatpush1.bf16.msra.mxu0 %v3331_v18 }
  0x9f   : > { %v438_v21 = vpop.permute.xlu0 %437  ;;  %2255 = vrot.lane.b32.xlu1 %v3233_v0, %s3151_s21 }
  0xa0   : > { %v443_v22 = vsel %vm441_vm2, %v438_v21, %v440_v19  ;;  %v442_v23 = vsel %vm441_vm2, %v436_v14, %v438_v21  ;;  %v2970_v14 = vld [vmem:[%s4247_s3 + $0x12] sm:$0x3] }
  0xa1   : > { %2944 = vmatprep.subr.msk.bf16.mxu1 %vm374_vm1, %v443_v22  ;;  %v448_v24 = vsel %vm374_vm1, %v442_v23, 0  ;;  %2942 = vmatmul.mubr.msk.bf16.vlgmr.msra.gmra.mrb[0].mxu0 %vm4262_vm3, %v346_v20  ;;  %v521_v25 = vpop.permute.xlu1 %520 }
  0xa2   : > { %454 = vmatpush1.bf16.msra.mxu1 %v448_v24  ;;  %568 = vmatprep.mubr.bf16.mxu0 %v4257_v4 }
  0xa3   : > { %v519_v27 = vpop.permute.xlu0 %518  ;;  %2377 = vrot.lane.b32.xlu0 %v3236_v2, %s3152_s26  ;;  %2379 = vrot.lane.b32.xlu1 %v3240_v3, %s3152_s26 }
  0xa4   : > { %v525_v28 = vsel %vm524_vm4, %v519_v27, %v521_v25 }
  0xa5   : > { %2945 = vmatmul.mubr.msk.bf16.vlgmr.msra.gmra.mrb[0].mxu1 %vm4262_vm3, %v2943_v26  ;;  %v600_v29 = vpop.permute.xlu1 %599  ;;  %v531_v32 = vsel %vm374_vm1, %v525_v28, 0 }
  0xa6   : > { %649 = vmatprep.mubr.bf16.mxu1 %v4257_v4 }
  0xa7   : > { %v523_v30 = vpop.permute.xlu0 %522  ;;  %2381 = vrot.lane.b32.xlu0 %v3233_v0, %s3152_s26  ;;  %2455 = vrot.lane.b32.xlu1 %v3268_v7, %s3153_s29 }
  0xa8   : > { %v526_v31 = vsel %vm524_vm4, %v521_v25, %v523_v30 }
  0xa9   : > { %2947 = vmatprep.subr.msk.bf16.mxu0 %vm374_vm1, %v526_v31  ;;  %v604_v33 = vpop.permute.xlu1 %603 }
  0xaa   : > { %537 = vmatpush1.bf16.msra.mxu0 %v531_v32 }
  0xab   : > { %v602_v35 = vpop.permute.xlu0 %601  ;;  %2457 = vrot.lane.b32.xlu0 %v3265_v6, %s3153_s29  ;;  %2459 = vrot.lane.b32.xlu1 %v3273_v8, %s3153_s29  ;;  %s334_s29 = scalar_lea.vmem %s4245_s1, %s3054_s24 }
  0xac   : > { %v606_v36 = vsel %vm605_vm5, %v600_v29, %v602_v35  ;;  %v607_v37 = vsel %vm605_vm5, %v602_v35, %v604_v33 }
  0xad   : > { %v612_v38 = vsel %vm374_vm1, %v606_v36, 0  ;;  %2950 = vmatprep.subr.msk.bf16.mxu1 %vm374_vm1, %v607_v37  ;;  %2948 = vmatmul.mubr.msk.bf16.vlgmr.msra.gmra.mrb[4].mxu0 %vm4262_vm3, %v2946_v34  ;;  %v683_v39 = vpop.permute.xlu1 %682 }
  0xae   : > { %618 = vmatpush1.bf16.msra.mxu1 %v612_v38  ;;  %730 = vmatprep.mubr.bf16.mxu0 %v4257_v4 }
  0xaf   : > { %2956 = vmatprep.subr.msk.bf16.mxu1 %vm374_vm1, %v3327_v17  ;;  %v681_v41 = vpop.permute.xlu0 %680  ;;  %2537 = vrot.lane.b32.xlu0 %v3268_v7, %s3138_s19 }
  0xb0   : > { %2539 = vrot.lane.b32.xlu1 %v3265_v6, %s3138_s19  ;;  %v687_v42 = vsel %vm686_vm6, %v681_v41, %v683_v39 }
  0xb1   : > { %2951 = vmatmul.mubr.msk.bf16.vlgmr.msra.gmra.mrb[4].mxu1 %vm4262_vm3, %v2949_v40  ;;  %v811_v43 = vpop.permute.xlu1 %810  ;;  %v693_v46 = vsel %vm374_vm1, %v687_v42, 0 }
  0xb2   : > { %766 = vmatpush1.bf16.msra.mxu1 %v3331_v18  ;;  %797 = vmatprep.mubr.bf16.mxu1 %v4257_v4 }
  0xb3   : > { %v685_v44 = vpop.permute.xlu0 %684  ;;  %2541 = vrot.lane.b32.xlu0 %v3273_v8, %s3138_s19  ;;  %s3050_s19 = sld [smem:[#allocation2 + $0x4]] }
  0xb4   : > { %v688_v45 = vsel %vm686_vm6, %v683_v39, %v685_v44  ;;  %2614 = vrot.lane.b32.xlu1 %v3268_v7, %s3154_s12  ;;  %v2967_v7 = vld [vmem:[%s4247_s3 + $0x10] sm:$0x3] }
  0xb5   : > { %2953 = vmatprep.subr.msk.bf16.mxu0 %vm374_vm1, %v688_v45  ;;  %v815_v47 = vpop.permute.xlu1 %814 }
  0xb6   : > { %699 = vmatpush1.bf16.msra.mxu0 %v693_v46 }
  0xb7   : > { %v813_v49 = vpop.permute.xlu0 %812  ;;  %2616 = vrot.lane.b32.xlu0 %v3265_v6, %s3154_s12 }
  0xb8   : > { %v817_v51 = vsel %vm816_vm7, %v811_v43, %v813_v49  ;;  %v818_v52 = vsel %vm816_vm7, %v813_v49, %v815_v47  ;;  %2618 = vrot.lane.b32.xlu1 %v3273_v8, %s3154_s12  ;;  %s3008_s12 = sld [smem:[#allocation2 + $0x2]] }
  0xb9   : > { %v823_v53 = vsel %vm374_vm1, %v817_v51, 0  ;;  %2954 = vmatmul.mubr.msk.bf16.vlgmr.msra.gmra.mrb[8].mxu0 %vm4262_vm3, %v2952_v48  ;;  %2959 = vmatprep.subr.msk.bf16.mxu0 %vm374_vm1, %v818_v52  ;;  %v901_v56 = vpop.permute.xlu1 %900 }
  0xba   : > { %829 = vmatpush1.bf16.msra.mxu0 %v823_v53  ;;  %2957 = vmatmul.mubr.msk.bf16.vlgmr.msra.gmra.mrb[8].mxu1 %vm4262_vm3, %v2955_v50 }
  0xbb   : > { %v899_v57 = vpop.permute.xlu0 %898  ;;  %860 = vmatprep.mubr.bf16.mxu0 %v4257_v4  ;;  %948 = vmatprep.mubr.bf16.mxu1 %v4257_v4 }
  0xbc   : > { %2830 = vperm.xlu1 %3095, %v2827_v54   ;;  %2694 = vperm.xlu0 %3096, %v3041_v55   ;;  %v905_v58 = vsel %vm904_vm8, %v899_v57, %v901_v56 }
  0xbd   : > { %v981_v59 = vpop.permute.xlu1 %980  ;;  %v911_v63 = vsel %vm374_vm1, %v905_v58, 0 }
  0xbf   : > { %v903_v61 = vpop.permute.xlu0 %902 }
  0xc0   : > { %v906_v62 = vsel %vm904_vm8, %v901_v56, %v903_v61 }
  0xc1   : > { %2960 = vmatmul.mubr.msk.bf16.vlgmr.msra.gmra.mrb[12].mxu0 %vm4262_vm3, %v2958_v60  ;;  %2965 = vmatprep.subr.msk.bf16.mxu1 %vm374_vm1, %v906_v62  ;;  %v985_v0 = vpop.permute.xlu1 %984 }
  0xc2   : > { %917 = vmatpush1.bf16.msra.mxu1 %v911_v63  ;;  %1030 = vmatprep.mubr.bf16.mxu0 %v4257_v4 }
  0xc3   : > { %v983_v2 = vpop.permute.xlu0 %982 }
  0xc4   : > { %v987_v3 = vsel %vm986_vm9, %v981_v59, %v983_v2  ;;  %v988_v5 = vsel %vm986_vm9, %v983_v2, %v985_v0 }
  0xc5   : > { %v993_v6 = vsel %vm374_vm1, %v987_v3, 0  ;;  %2966 = vmatmul.mubr.msk.bf16.vlgmr.msra.gmra.mrb[12].mxu1 %vm4262_vm3, %v2961_v1  ;;  %2968 = vmatprep.subr.msk.bf16.mxu0 %vm374_vm1, %v988_v5  ;;  %v1061_v8 = vpop.permute.xlu1 %1060 }
  0xc6   : > { %999 = vmatpush1.bf16.msra.mxu0 %v993_v6  ;;  %1108 = vmatprep.mubr.bf16.mxu1 %v4257_v4 }
  0xc7   : > { %v1059_v9 = vpop.permute.xlu0 %1058 }
  0xc8   : > { %v1065_v10 = vsel %vm1064_vm10, %v1059_v9, %v1061_v8 }
  0xc9   : > { %2969 = vmatmul.mubr.msk.bf16.vlgmr.msra.gmra.mrb[16].mxu0 %vm4262_vm3, %v2967_v7  ;;  %v1071_v13 = vsel %vm374_vm1, %v1065_v10, 0 }
  0xca   : > { %1198 = vmatprep.mubr.bf16.mxu0 %v4257_v4 }
  0xcb   : > { %v1063_v11 = vpop.permute.xlu0 %1062 }
  0xcc   : > { %v1066_v12 = vsel %vm1064_vm10, %v1061_v8, %v1063_v11 }
  0xcd   : > { %2971 = vmatprep.subr.msk.bf16.mxu1 %vm374_vm1, %v1066_v12  ;;  %v3527_v12 = vld [vmem:[%s4246_s2] ss:$2 sm:$0x3] }
  0xce   : > { %1077 = vmatpush1.bf16.msra.mxu1 %v1071_v13  ;;  %v3532_v13 = vld [vmem:[%s4246_s2 + $0x1] ss:$2 sm:$0x3] }
  0xcf   : > { %vm578_vm6 = vcmp.ge.f32.partialorder %v3532_v13, 0.0  ;;  %vm4256_vm10 = vcmp.le.f32.partialorder %v3532_v13, 15.0 }
  0xd1   : > { %2972 = vmatmul.mubr.msk.bf16.vlgmr.msra.gmra.mrb[16].mxu1 %vm4262_vm3, %v2970_v14  ;;  %v494_v14 = vadd.f32 -2.0, %v3527_v12 }
  0xd2   : > { %1248 = vmatprep.mubr.bf16.mxu1 %v4257_v4 }
  0xd3   : > { %vm495_vm0 = vcmp.ge.f32.partialorder %v494_v14, 0.0  ;;  %vm496_vm2 = vcmp.le.f32.partialorder %v494_v14, 15.0 }
  0xd6   : > { %v3432_v15 = vpop.permute.xlu1 %1138 }
  0xda   : > { %v1260_v16 = vpop.permute.xlu1 %1259 }
  0xdc   : > { %v3434_v19 = vpop.permute.xlu0 %350 }
  0xde   : > { %v1262_v20 = vpop.permute.xlu1 %1261 }
  0xdf   : > { %v3437_v21 = vsel %vm4254_vm11, %v1260_v16, %v1262_v20  ;;  %v3536_v16 = vadd.f32 -2.0, %v3532_v13 }
  0xe0   : > { %v1264_v22 = vpop.permute.xlu0 %1263 }
  0xe1   : > { %v3440_v23 = vsel %vm4254_vm11, %v1262_v20, %v1264_v22  ;;  %vm499_vm5 = vcmp.ge.f32.partialorder %v3536_v16, 0.0  ;;  %v504_v22 = vlaneseq  ;;  %vm501_vm8 = vcmp.le.f32.partialorder %v3536_v16, 15.0 }
  0xe2   : > { %v3442_v24 = vpop.permute.xlu1 %1342 }
  0xe4   : > { %v3444_v25 = vpop.permute.xlu0 %1344 }
  0xe6   : > { %v3446_v26 = vpop.permute.xlu1 %1346 }
  0xe8   : > { %v1421_v27 = vpop.permute.xlu0 %1420 }
  0xea   : > { %v3448_v28 = vpop.permute.xlu1 %1422 }
  0xeb   : > { %v3452_v29 = vsel %vm4255_vm12, %v1421_v27, %v3448_v28  ;;  %v3547_v27 = vadd.f32 2.0, %v3532_v13  ;;  %vm4260_vm12 = vcmask 736256  }
  0xec   : > { %v3454_v30 = vpop.permute.xlu0 %1424 }
  0xee   : > { %v3456_v31 = vpop.permute.xlu1 %1501 }
  0xf0   : > { %v3458_v32 = vpop.permute.xlu0 %1503 }
  0xf2   : > { %v3460_v33 = vpop.permute.xlu1 %1505 }
  0xf4   : > { %v3462_v34 = vpop.permute.xlu0 %1627 }
  0xf6   : > { %v3464_v35 = vpop.permute.xlu1 %1629 }
  0xf8   : > { %v3466_v36 = vpop.permute.xlu0 %1631 }
  0xfa   : > { %v1706_v37 = vpop.permute.xlu1 %1705 }
  0xfc   : > { %v3468_v38 = vpop.permute.xlu0 %1707 }
  0xfd   : > { %v3472_v39 = vsel %vm4254_vm11, %v1706_v37, %v3468_v38  ;;  %v505_v37 = vshrl.u32 %v504_v22, 7 }
  0xfe   : > { %v3474_v40 = vpop.permute.xlu1 %1709 }
 0x100   : > { %v3476_v41 = vpop.permute.xlu0 %1786 }
 0x102   : > { %v3478_v42 = vpop.permute.xlu1 %1788 }
 0x104   : > { %v3480_v43 = vpop.permute.xlu0 %1790 }
 0x106   : > { %v3482_v44 = vpop.permute.xlu1 %1863 }
 0x108   : > { %v3484_v45 = vpop.permute.xlu0 %1865 }
 0x10a   : > { %v3486_v46 = vpop.permute.xlu1 %1867 }
 0x10c   : > { %v3488_v47 = vpop.permute.xlu0 %1942 }
 0x10e   : > { %v2094_v48 = vpop.permute.xlu1 %2093 }
 0x110   : > { %v2096_v49 = vpop.permute.xlu0 %2095 }
 0x111   : > { %v3491_v50 = vsel %vm986_vm9, %v2094_v48, %v2096_v49 }
 0x112   : > { %v2098_v51 = vpop.permute.xlu1 %2097 }
 0x113   : > { %v3494_v52 = vsel %vm986_vm9, %v2096_v49, %v2098_v51  ;;  %v425_v49 = vstv %s3538_s17  ;;  %v3565_v51 = vsub.s32 0, %v505_v37 }
 0x114   : > { %v3496_v53 = vpop.permute.xlu0 %2170 }
 0x116   : > { %v3498_v54 = vpop.permute.xlu1 %2172 }
 0x118   : > { %v3500_v55 = vpop.permute.xlu0 %2174 }
 0x11a   : > { %v2252_v56 = vpop.permute.xlu1 %2251 }
 0x11c   : > { %v2254_v57 = vpop.permute.xlu0 %2253 }
 0x11d   : > { %v3502_v58 = vsel %vm2257_vm13, %v2252_v56, %v2254_v57 }
 0x11e   : > { %v2256_v59 = vpop.permute.xlu1 %2255 }
 0x11f   : > { %v3504_v60 = vsel %vm2257_vm13, %v2254_v57, %v2256_v59 }
 0x120   : > { %v2378_v61 = vpop.permute.xlu0 %2377 }
 0x122   : > { %v2380_v62 = vpop.permute.xlu1 %2379 }
 0x123   : > { %v3506_v63 = vsel %vm2383_vm14, %v2378_v61, %v2380_v62  ;;  %v3569_v61 = vsub.s32 1, %v505_v37 }
 0x124   : > { %v2382_v0 = vpop.permute.xlu0 %2381 }
 0x125   : > { %v3508_v1 = vsel %vm2383_vm14, %v2380_v62, %v2382_v0  ;;  %vm659_vm14 = vcmp.ge.f32.partialorder %v3547_v27, 0.0 }
 0x126   : > { %v2456_v2 = vpop.permute.xlu1 %2455 }
 0x128   : > { %v3510_v3 = vpop.permute.xlu0 %2457 }
 0x129   : > { %v3514_v5 = vsel %vm4253_vm15, %v2456_v2, %v3510_v3  ;;  %vm740_vm15 = vcmp.ge.f32.partialorder %v3527_v12, 0.0 }
 0x12a   : > { %v3516_v6 = vpop.permute.xlu1 %2459 }
 0x12c   : > { %v2538_v7 = vpop.permute.xlu0 %2537 }
 0x12e   : > { %v2540_v8 = vpop.permute.xlu1 %2539 }
 0x12f   : > { %v3519_v9 = vsel %vm524_vm4, %v2538_v7, %v2540_v8 }
 0x130   : > { %4264 = vst [vmem:[#allocation5_spill] sm:$0xff] %v3519_v9  ;;  %v2542_v10 = vpop.permute.xlu0 %2541 }
 0x131   : > { %v3522_v11 = vsel %vm524_vm4, %v2540_v8, %v2542_v10  ;;  %vm3540_vm4 = vmand %vm495_vm0, %vm496_vm2 }
 0x132   : > { %vm500_vm7 = vmand %vm3540_vm4, %vm499_vm5 }
 0x133   : > { %vm579_vm9 = vmand %vm3540_vm4, %vm578_vm6 }
 0x134   : > { %vm502_vm13 = vmand %vm500_vm7, %vm501_vm8  ;;  %vm661_vm7 = vcmp.le.f32.partialorder %v3547_v27, 15.0 }
 0x135   : > { %vm581_vm0 = vmand %vm579_vm9, %vm4256_vm10  ;;  %v503_v59 = vsel %vm502_vm13, 1, %v4257_v4  ;;  %vm741_vm13 = vcmp.le.f32.partialorder %v3527_v12, 15.0 }
 0x136   : > { %vm660_vm2 = vmand %vm3540_vm4, %vm659_vm14  ;;  %v582_v2 = vsel %vm581_vm0, 1, %v4257_v4  ;;  %v507_v20 = vrot.slane %v503_v59, %v3565_v51  ;;  %v511_v37 = vrot.slane %v503_v59, %v3569_v61  ;;  %vm4259_vm0 = vcmask 1041408  }
 0x137   : > { %vm662_vm4 = vmand %vm660_vm2, %vm661_vm7 }
 0x138   : > { %vm3589_vm10 = vmand %vm740_vm15, %vm741_vm13  ;;  %vm1507_vm15 = vcmask 244736   ;;  %vm3606_vm2 = vcmp.eq.s32.totalorder %v511_v37, 1 }
 0x174   : > { %v415_v48 = vpop.f32.mrb[0].mxu0 }
 0x175   : > { %v416_v56 = vadd.f32 %v415_v48, %v3434_v19  ;;  %v417_v57 = vpop.f32.mrb[1].mxu0 }
 0x176   : > { %v418_v62 = vadd.f32 %v417_v57, %v3434_v19  ;;  %v419_v0 = vpop.f32.mrb[2].mxu0 }
 0x177   : > { %vm423_vm9 = vcmp.ge.f32.partialorder %v416_v56, 0.0  ;;  %v426_v7 = vmul.f32 %v425_v49, %v416_v56  ;;  %v420_v8 = vpop.f32.mrb[3].mxu0 }
 0x178   : > { %vm424_vm11 = vcmp.ge.f32.partialorder %v418_v62, 0.0  ;;  %v427_v10 = vmul.f32 %v425_v49, %v418_v62  ;;  %v487_v14 = vpop.f32.mrb[0].mxu1  ;;  %v586_v8 = vrot.slane %v582_v2, %v3565_v51 }
 0x179   : > { %v428_v19 = vsel %vm423_vm9, %v416_v56, %v426_v7  ;;  %v489_v22 = vpop.f32.mrb[1].mxu1  ;;  %v590_v56 = vrot.slane %v582_v2, %v3569_v61  ;;  %v4269_v7 = vmov 0   ;;  %vm3615_vm9 = vmand %vm3589_vm10, %vm499_vm5 }
 0x17a   : > { %v430_v48 = vpack.c.bf16 %v428_v19, %v428_v19  ;;  %v429_v57 = vsel %vm424_vm11, %v418_v62, %v427_v10  ;;  %v491_v0 = vpop.f32.mrb[2].mxu1  ;;  %v663_v59 = vsel %vm662_vm4, 1, %v4269_v7  ;;  %v1349_v62 = vsel %vm4260_vm12, %v3442_v24, %v3444_v25 }
 0x17b   : > { %v431_v4 = vpack.c.bf16 %v429_v57, %v429_v57  ;;  %v492_v9 = vpop.f32.mrb[3].mxu1  ;;  %v1350_v10 = vsel %vm4260_vm12, %v3444_v25, %v3446_v26  ;;  %vm3601_vm11 = vcmp.eq.s32.totalorder %v507_v20, 1  ;;  %vm3619_vm13 = vcmp.eq.s32.totalorder %v586_v8, 1 }
 0x17c   : > { %v1211_v0 = vsel %vm4259_vm0, %v430_v48, 0  ;;  %v667_v26 = vrot.slane %v663_v59, %v3565_v51  ;;  %v671_v2 = vrot.slane %v663_v59, %v3569_v61  ;;  %vm4261_vm4 = vcmask 31744  }
 0x17d   : > { %2978 = vmatprep.subr.msk.bf16.mxu1 %vm4259_vm0, %v431_v4  ;;  %v432_v4 = vld [vmem:[%s4249_s5] sm:$0xf]  ;;  %v1355_v20 = vsel %vm374_vm1, %v1349_v62, 0  ;;  %v514_v37 = vsel %vm3601_vm11, %v487_v14, 0.0  ;;  %vm3631_vm0 = vcmp.eq.s32.totalorder %v590_v56, 1  ;;  %v957_v57 = vadd.f32 2.0, %v3527_v12  ;;  %vm744_vm11 = vmand %vm3615_vm9, %vm501_vm8 }
 0x17e   : > { %1217 = vmatpush1.bf16.msra.mxu1 %v1211_v0  ;;  %v1509_v8 = vsel %vm1507_vm15, %v3458_v32, %v3460_v33  ;;  %v515_v59 = vsel %vm3606_vm2, %v489_v22, 0.0  ;;  %vm3651_vm12 = vcmp.eq.s32.totalorder %v667_v26, 1  ;;  %vm3655_vm2 = vcmp.eq.s32.totalorder %v671_v2, 1 }
 0x17f   : > { %2984 = vmatprep.subr.msk.bf16.mxu1 %vm374_vm1, %v1350_v10  ;;  %v745_v25 = vsel %vm744_vm11, 1, %v4269_v7  ;;  %vm958_vm9 = vcmp.ge.f32.partialorder %v957_v57, 0.0  ;;  %v1508_v26 = vsel %vm1507_vm15, %v3456_v31, %v3458_v32  ;;  %v2983_v32 = vld [vmem:[%s4247_s3 + $0x16] sm:$0x3] }
 0x180   : > { %v570_v0 = vpop.f32.mrb[4].mxu0 }
 0x181   : > { %v593_v14 = vsel %vm3619_vm13, %v570_v0, 0.0  ;;  %v572_v56 = vpop.f32.mrb[5].mxu0  ;;  %2979 = vmatmul.mubr.msk.bf16.vlgmr.msra.gmra.mrb[20].mxu1 %vm4261_vm4, %v432_v4  ;;  %vm959_vm13 = vcmp.le.f32.partialorder %v957_v57, 15.0  ;;  %vm869_vm4 = vmand %vm3589_vm10, %vm659_vm14 }
 0x182   : > { %v595_v62 = vadd.f32 %v593_v14, %v514_v37  ;;  %v594_v10 = vsel %vm3631_vm0, %v572_v56, 0.0  ;;  %v574_v19 = vpop.f32.mrb[6].mxu0  ;;  %1361 = vmatpush1.bf16.msra.mxu1 %v1355_v20  ;;  %1392 = vmatprep.mubr.bf16.mxu1 %v4269_v7  ;;  %vm1633_vm0 = vcmask 179200   ;;  %vm3674_vm11 = vmand %vm958_vm9, %vm959_vm13  ;;  %v753_v56 = vrot.slane %v745_v25, %v3569_v61 }
 0x183   : > { %v596_v9 = vadd.f32 %v594_v10, %v515_v59  ;;  %v575_v24 = vpop.f32.mrb[7].mxu0  ;;  %2990 = vmatprep.subr.msk.bf16.mxu1 %vm374_vm1, %v1509_v8  ;;  %v749_v8 = vrot.slane %v745_v25, %v3565_v51  ;;  %v1514_v59 = vsel %vm374_vm1, %v1508_v26, 0  ;;  %vm961_vm15 = vmand %vm3674_vm11, %vm499_vm5  ;;  %v1634_v33 = vsel %vm1633_vm0, %v3462_v34, %v3464_v35 }
 0x184   : > { %v651_v2 = vpop.f32.mrb[4].mxu1  ;;  %vm3694_vm9 = vcmp.eq.s32.totalorder %v753_v56, 1  ;;  %vm3705_vm5 = vmand %vm961_vm15, %vm501_vm8  ;;  %vm4292_vm8 = vcmask 736256   ;;  %vm4293_vm13 = vcmp.le.f32.partialorder %v3532_v13, 15.0 }
 0x185   : > { %v674_v4 = vsel %vm3651_vm12, %v651_v2, 0.0  ;;  %v653_v20 = vpop.f32.mrb[5].mxu1  ;;  %vm870_vm12 = vmand %vm869_vm4, %vm661_vm7 }
 0x186   : > { %v676_v37 = vadd.f32 %v674_v4, %v595_v62  ;;  %v675_v48 = vsel %vm3655_vm2, %v653_v20, 0.0  ;;  %v655_v57 = vpop.f32.mrb[6].mxu1  ;;  %v1635_v62 = vsel %vm1633_vm0, %v3464_v35, %v3466_v36  ;;  %vm754_vm2 = vcmp.eq.s32.totalorder %v749_v8, 1  ;;  %vm3713_vm4 = vmand %vm3674_vm11, %vm578_vm6  ;;  %v2989_v20 = vld [vmem:[%s4247_s3 + $0x1a] sm:$0x3] }
 0x187   : > { %v677_v0 = vadd.f32 %v675_v48, %v596_v9  ;;  %v656_v14 = vpop.f32.mrb[7].mxu1  ;;  %v871_v36 = vsel %vm870_vm12, 1, %v4269_v7  ;;  %v1640_v48 = vsel %vm374_vm1, %v1634_v33, 0  ;;  %vm1040_vm0 = vmand %vm3713_vm4, %vm4293_vm13 }
 0x188   : > { %v875_v4 = vrot.slane %v871_v36, %v3565_v51  ;;  %v1793_v14 = vsel %vm4292_vm8, %v3478_v42, %v3480_v43  ;;  %v1041_v33 = vsel %vm1040_vm0, 1, %v4269_v7 }
 0x189   : > { %2985 = vmatmul.mubr.msk.bf16.vlgmr.msra.gmra.mrb[24].mxu1 %vm4262_vm3, %v2983_v32  ;;  %v1049_v31 = vrot.slane %v1041_v33, %v3569_v61 }
 0x18a   : > { %1520 = vmatpush1.bf16.msra.mxu1 %v1514_v59  ;;  %1551 = vmatprep.mubr.bf16.mxu1 %v4269_v7  ;;  %v879_v59 = vrot.slane %v871_v36, %v3569_v61  ;;  %vm880_vm12 = vcmp.eq.s32.totalorder %v875_v4, 1 }
 0x18b   : > { %2996 = vmatprep.subr.msk.bf16.mxu1 %vm374_vm1, %v1635_v62 }
 0x18c   : > { %v732_v22 = vpop.f32.mrb[8].mxu0  ;;  %vm3738_vm15 = vcmp.eq.s32.totalorder %v879_v59, 1 }
 0x18d   : > { %v756_v9 = vsel %vm754_vm2, %v732_v22, 0.0  ;;  %v734_v24 = vpop.f32.mrb[9].mxu0  ;;  %v799_v25 = vpop.f32.mrb[8].mxu1  ;;  %vm4296_vm2 = vmmov %vm4292_vm8  ;;  %vm1051_vm8 = vcmp.eq.s32.totalorder %v1049_v31, 1 }
 0x18e   : > { %v758_v2 = vadd.f32 %v756_v9, %v676_v37  ;;  %v757_v34 = vsel %vm3694_vm9, %v734_v24, 0.0  ;;  %v801_v35 = vpop.f32.mrb[9].mxu1  ;;  %v736_v16 = vpop.f32.mrb[10].mxu0  ;;  %v963_v37 = vsel %vm3705_vm5, 1, %v4269_v7  ;;  %v1792_v22 = vsel %vm4296_vm2, %v3476_v41, %v3478_v42  ;;  %vm1117_vm9 = vmand %vm3674_vm11, %vm659_vm14  ;;  %v2995_v41 = vld [vmem:[%s4247_s3 + $0x1e] sm:$0x3] }
 0x18f   : > { %v759_v57 = vadd.f32 %v757_v34, %v677_v0  ;;  %v737_v8 = vpop.f32.mrb[11].mxu0  ;;  %v803_v32 = vpop.f32.mrb[10].mxu1  ;;  %v967_v10 = vrot.slane %v963_v37, %v3565_v51  ;;  %v971_v43 = vrot.slane %v963_v37, %v3569_v61  ;;  %v1045_v34 = vrot.slane %v1041_v33, %v3565_v51  ;;  %vm1118_vm14 = vmand %vm1117_vm9, %vm661_vm7  ;;  %v3001_v33 = vld [vmem:[%s4247_s3 + $0x22] sm:$0x3] }
 0x190   : > { %v806_v56 = vadd.f32 %v799_v25, %v758_v2  ;;  %v804_v62 = vpop.f32.mrb[11].mxu1  ;;  %v1798_v42 = vsel %vm374_vm1, %v1792_v22, 0  ;;  %vm4299_vm9 = vcmask 703488  }
 0x191   : > { %v807_v0 = vadd.f32 %v801_v35, %v759_v57  ;;  %2991 = vmatmul.mubr.msk.bf16.vlgmr.msra.gmra.mrb[28].mxu1 %vm4262_vm3, %v2989_v20  ;;  %vm972_vm5 = vcmp.eq.s32.totalorder %v967_v10, 1  ;;  %vm973_vm4 = vcmp.eq.s32.totalorder %v971_v43, 1  ;;  %vm1050_vm11 = vcmp.eq.s32.totalorder %v1045_v34, 1 }
 0x192   : > { %1646 = vmatpush1.bf16.msra.mxu1 %v1640_v48  ;;  %1677 = vmatprep.mubr.bf16.mxu1 %v4269_v7 }
 0x193   : > { %3002 = vmatprep.subr.msk.bf16.mxu1 %vm374_vm1, %v1793_v14  ;;  %v1119_v14 = vsel %vm1118_vm14, 1, %v4269_v7  ;;  %vm4302_vm14 = vmmov %vm4299_vm9 }
 0x194   : > { %v862_v19 = vpop.f32.mrb[12].mxu0  ;;  %v1123_v43 = vrot.slane %v1119_v14, %v3565_v51 }
 0x195   : > { %v882_v9 = vsel %vm880_vm12, %v862_v19, 0.0  ;;  %v864_v24 = vpop.f32.mrb[13].mxu0 }
 0x196   : > { %v884_v25 = vadd.f32 %v882_v9, %v806_v56  ;;  %v883_v26 = vsel %vm3738_vm15, %v864_v24, 0.0  ;;  %v866_v2 = vpop.f32.mrb[14].mxu0  ;;  %v1127_v9 = vrot.slane %v1119_v14, %v3569_v61  ;;  %vm1128_vm7 = vcmp.eq.s32.totalorder %v1123_v43, 1  ;;  %v2975_v14 = vld [vmem:[%s4249_s5 + $0x4] sm:$0xf] }
 0x197   : > { %v885_v35 = vadd.f32 %v883_v26, %v807_v0  ;;  %v867_v16 = vpop.f32.mrb[15].mxu0  ;;  %vm4297_vm15 = vcmask 1041408  }
 0x198   : > { %v950_v4 = vpop.f32.mrb[12].mxu1  ;;  %vm1129_vm13 = vcmp.eq.s32.totalorder %v1127_v9, 1  ;;  %vm4298_vm2 = vmmov %vm4297_vm15  ;;  %v2617_v9 = vpop.permute.xlu0 %2616 }
 0x199   : > { %v974_v20 = vsel %vm972_vm5, %v950_v4, 0.0  ;;  %v952_v48 = vpop.f32.mrb[13].mxu1  ;;  %2997 = vmatmul.mubr.msk.bf16.vlgmr.msra.gmra.mrb[32].mxu1 %vm4262_vm3, %v2995_v41  ;;  %vm4300_vm5 = vcmask 31744  }
 0x19a   : > { %v976_v57 = vadd.f32 %v974_v20, %v884_v25  ;;  %v975_v8 = vsel %vm973_vm4, %v952_v48, 0.0  ;;  %v954_v32 = vpop.f32.mrb[14].mxu1  ;;  %1804 = vmatpush1.bf16.msra.mxu1 %v1798_v42  ;;  %1835 = vmatprep.mubr.bf16.mxu1 %v4269_v7  ;;  %v1146_v42 = vstv %s2974_s30  ;;  %vm4301_vm4 = vcmask 769024  }
 0x19b   : > { %v977_v59 = vadd.f32 %v975_v8, %v885_v35  ;;  %v955_v37 = vpop.f32.mrb[15].mxu1 }
 0x19c   : > { %v1032_v56 = vpop.f32.mrb[16].mxu0 }
 0x19d   : > { %v1052_v62 = vsel %vm1050_vm11, %v1032_v56, 0.0  ;;  %v1034_v27 = vpop.f32.mrb[17].mxu0  ;;  %v1272_v56 = vsel %vm374_vm1, %v3437_v21, 0  ;;  %v2986_v21 = vld [vmem:[%s4247_s3 + $0x18] sm:$0x3]  ;;  %vm4303_vm11 = vmmov %vm4299_vm9 }
 0x19e   : > { %v1054_v0 = vadd.f32 %v1052_v62, %v976_v57  ;;  %v1053_v10 = vsel %vm1051_vm8, %v1034_v27, 0.0  ;;  %v1036_v36 = vpop.f32.mrb[18].mxu0  ;;  %v2980_v62 = vld [vmem:[%s4247_s3 + $0x14] sm:$0x3]  ;;  %v1717_v27 = vsel %vm374_vm1, %v3472_v39, 0  ;;  %vm2176_vm8 = vcmask 949248  }
 0x19f   : > { %v1055_v22 = vadd.f32 %v1053_v10, %v977_v59  ;;  %v1037_v19 = vpop.f32.mrb[19].mxu0  ;;  %v2178_v36 = vsel %vm2176_vm8, %v3498_v54, %v3500_v55  ;;  %v2177_v43 = vsel %vm2176_vm8, %v3496_v53, %v3498_v54  ;;  %v3020_v55 = vld [vmem:[%s4247_s3 + $0x2a] sm:$0x3]  ;;  %v2615_v54 = vpop.permute.xlu1 %2614 }
 0x1a1   : > { %3003 = vmatmul.mubr.msk.bf16.vlgmr.msra.gmra.mrb[36].mxu1 %vm4262_vm3, %v3001_v33  ;;  %v3012_v33 = vld [vmem:[%s4247_s3 + $0x26] sm:$0x3] }
 0x1a2   : > { %2000 = vmatprep.mubr.bf16.mxu1 %v4269_v7 }
 0x1a3   : > { %v2619_v19 = vpop.permute.xlu1 %2618 }
 0x1a4   : > { %v1110_v24 = vpop.f32.mrb[16].mxu1 }
 0x1a5   : > { %v1130_v25 = vsel %vm1128_vm7, %v1110_v24, 0.0  ;;  %v1112_v26 = vpop.f32.mrb[17].mxu1  ;;  %vm4304_vm7 = vcmask 523264  }
 0x1a6   : > { %v1132_v2 = vadd.f32 %v1130_v25, %v1054_v0  ;;  %v1131_v34 = vsel %vm1129_vm13, %v1112_v26, 0.0  ;;  %v1114_v41 = vpop.f32.mrb[18].mxu1  ;;  %v2998_v0 = vld [vmem:[%s4247_s3 + $0x20] sm:$0x3]  ;;  %v2463_v53 = vsel %vm4304_vm7, %v3510_v3, %v3516_v6  ;;  %vm2620_vm13 = vcmask 424960  }
 0x1a7   : > { %v1133_v35 = vadd.f32 %v1131_v34, %v1055_v22  ;;  %v1115_v16 = vpop.f32.mrb[19].mxu1  ;;  %v2183_v22 = vsel %vm374_vm1, %v2177_v43, 0  ;;  %v2622_v24 = vsel %vm2620_vm13, %v2617_v9, %v2619_v19  ;;  %v3026_v3 = vld [vmem:[%s4247_s3 + $0x2e] sm:$0x3]  ;;  %v3038_v41 = vld [vmem:[%s4247_s3 + $0x36] sm:$0x3] }
 0x1a8   : > { %v1141_v31 = vadd.f32 %v3432_v15, %v1132_v2 }
 0x1a9   : > { %v1142_v4 = vadd.f32 %v3432_v15, %v1133_v35  ;;  %v1428_v15 = vsel %vm4299_vm9, %v3448_v28, %v3454_v30  ;;  %v1712_v28 = vsel %vm4301_vm4, %v3468_v38, %v3474_v40  ;;  %v1870_v30 = vsel %vm4302_vm14, %v3484_v45, %v3486_v46  ;;  %v2011_v40 = vld [vmem:[%s3230_s16] sm:$0xff] }
 0x1aa   : > { %v1147_v20 = vmul.f32 %v1146_v42, %v1141_v31  ;;  %vm1144_vm0 = vcmp.ge.f32.partialorder %v1141_v31, 0.0  ;;  %v1869_v38 = vsel %vm4303_vm11, %v3482_v44, %v3484_v45  ;;  %v3014_v10 = vcombine.high %v2011_v40, %v2011_v40  ;;  %v3004_v44 = vld [vmem:[%s4247_s3 + $0x24] sm:$0x3] }
 0x1ab   : > { %vm1145_vm12 = vcmp.ge.f32.partialorder %v1142_v4, 0.0  ;;  %v1148_v48 = vmul.f32 %v1146_v42, %v1142_v4  ;;  %v1875_v46 = vsel %vm374_vm1, %v1869_v38, 0  ;;  %v3013_v39 = vcombine.low %v2011_v40, %v2011_v40 }
 0x1ac   : > { %v1149_v57 = vsel %vm1144_vm0, %v1141_v31, %v1147_v20  ;;  %vm4305_vm14 = vcmp.le.f32.partialorder %v3532_v13, 15.0 }
 0x1ad   : > { %v1150_v8 = vsel %vm1145_vm12, %v1142_v4, %v1148_v48  ;;  %v1151_v32 = vpack.c.bf16 %v1149_v57, %v1149_v57  ;;  %v2023_v45 = vsel %vm374_vm1, %v3013_v39, 0 }
 0x1ae   : > { %v1152_v59 = vpack.c.bf16 %v1150_v8, %v1150_v8 }
 0x1af   : > { %v1161_v37 = vsel %vm4297_vm15, %v1151_v32, 0 }
 0x1b0   : > { %2976 = vmatprep.subr.msk.bf16.mxu0 %vm4298_vm2, %v1152_v59 }
 0x1b1   : > { %1167 = vmatpush1.bf16.msra.mxu0 %v1161_v37 }
 0x1b2   : > { %2981 = vmatprep.subr.msk.bf16.mxu0 %vm374_vm1, %v3440_v23  ;;  %v1433_v23 = vsel %vm374_vm1, %v3452_v29, 0  ;;  %v2992_v29 = vld [vmem:[%s4247_s3 + $0x1c] sm:$0x3] }
 0x1b4   : > { %2977 = vmatmul.mubr.msk.bf16.vlgmr.msra.gmra.mrb[20].mxu0 %vm4300_vm5, %v2975_v14  ;;  %v1318_v14 = vadd.f32 -4.0, %v3527_v12 }
 0x1b5   : > { %1278 = vmatpush1.bf16.msra.mxu0 %v1272_v56  ;;  %1309 = vmatprep.mubr.bf16.mxu0 %v4269_v7 }
 0x1b6   : > { %2987 = vmatprep.subr.msk.bf16.mxu0 %vm374_vm1, %v1428_v15  ;;  %vm1319_vm0 = vcmp.ge.f32.partialorder %v1318_v14, 0.0  ;;  %vm1320_vm12 = vcmp.le.f32.partialorder %v1318_v14, 15.0 }
 0x1b7   : > { %vm1321_vm15 = vmand %vm1319_vm0, %vm1320_vm12 }
 0x1b8   : > { %vm1401_vm9 = vmand %vm1321_vm15, %vm578_vm6 }
 0x1b9   : > { %vm1402_vm11 = vmand %vm1401_vm9, %vm4305_vm14 }
 0x1bc   : > { %2982 = vmatmul.mubr.msk.bf16.vlgmr.msra.gmra.mrb[24].mxu0 %vm4262_vm3, %v2980_v62 }
 0x1bd   : > { %1439 = vmatpush1.bf16.msra.mxu0 %v1433_v23  ;;  %1470 = vmatprep.mubr.bf16.mxu0 %v4269_v7 }
 0x1be   : > { %2993 = vmatprep.subr.msk.bf16.mxu0 %vm374_vm1, %v3327_v17 }
 0x1c4   : > { %2988 = vmatmul.mubr.msk.bf16.vlgmr.msra.gmra.mrb[28].mxu0 %vm4262_vm3, %v2986_v21  ;;  %v3894_v21 = vadd.f32 -4.0, %v3532_v13 }
 0x1c5   : > { %1583 = vmatpush1.bf16.msra.mxu0 %v3331_v18  ;;  %1614 = vmatprep.mubr.bf16.mxu0 %v4269_v7 }
 0x1c6   : > { %2999 = vmatprep.subr.msk.bf16.mxu0 %vm374_vm1, %v1712_v28  ;;  %vm1323_vm2 = vcmp.ge.f32.partialorder %v3894_v21, 0.0  ;;  %v3900_v28 = vadd.f32 4.0, %v3532_v13  ;;  %vm1325_vm4 = vcmp.le.f32.partialorder %v3894_v21, 15.0 }
 0x1c7   : > { %vm1324_vm5 = vmand %vm1321_vm15, %vm1323_vm2 }
 0x1c8   : > { %vm1326_vm8 = vmand %vm1324_vm5, %vm1325_vm4  ;;  %vm1480_vm7 = vcmp.ge.f32.partialorder %v3900_v28, 0.0  ;;  %vm1482_vm0 = vcmp.le.f32.partialorder %v3900_v28, 15.0 }
 0x1c9   : > { %vm1560_vm12 = vmand %vm3589_vm10, %vm1323_vm2 }
 0x1ca   : > { %vm1561_vm9 = vmand %vm1560_vm12, %vm1325_vm4 }
 0x1cc   : > { %2994 = vmatmul.mubr.msk.bf16.vlgmr.msra.gmra.mrb[32].mxu0 %vm4262_vm3, %v2992_v29  ;;  %v1403_v29 = vsel %vm1402_vm11, 1, %v4269_v7 }
 0x1cd   : > { %1723 = vmatpush1.bf16.msra.mxu0 %v1717_v27  ;;  %1754 = vmatprep.mubr.bf16.mxu0 %v4269_v7  ;;  %v1407_v38 = vrot.slane %v1403_v29, %v3565_v51 }
 0x1ce   : > { %3005 = vmatprep.subr.msk.bf16.mxu0 %vm374_vm1, %v1870_v30  ;;  %v1327_v30 = vsel %vm1326_vm8, 1, %v4269_v7 }
 0x1cf   : > { %vm1412_vm5 = vcmp.eq.s32.totalorder %v1407_v38, 1 }
 0x1d4   : > { %3000 = vmatmul.mubr.msk.bf16.vlgmr.msra.gmra.mrb[36].mxu0 %vm4262_vm3, %v2998_v0 }
 0x1d5   : > { %1881 = vmatpush1.bf16.msra.mxu0 %v1875_v46  ;;  %1912 = vmatprep.mubr.bf16.mxu0 %v4269_v7  ;;  %v1411_v46 = vrot.slane %v1403_v29, %v3569_v61 }
 0x1d6   : > { %3015 = vmatprep.subr.msk.bf16.mxu0 %vm374_vm1, %v3014_v10 }
 0x1d7   : > { %vm3931_vm14 = vcmp.eq.s32.totalorder %v1411_v46, 1 }
 0x1dc   : > { %3006 = vmatmul.mubr.msk.bf16.vlgmr.msra.gmra.mrb[40].mxu0 %vm4262_vm3, %v3004_v44  ;;  %v1331_v44 = vrot.slane %v1327_v30, %v3565_v51 }
 0x1dd   : > { %2029 = vmatpush1.bf16.msra.mxu0 %v2023_v45  ;;  %2060 = vmatprep.mubr.bf16.mxu0 %v4269_v7 }
 0x1de   : > { %3021 = vmatprep.subr.msk.bf16.mxu0 %vm374_vm1, %v2178_v36  ;;  %v1335_v36 = vrot.slane %v1327_v30, %v3569_v61  ;;  %vm1336_vm11 = vcmp.eq.s32.totalorder %v1331_v44, 1 }
 0x1e0   : > { %vm1337_vm8 = vcmp.eq.s32.totalorder %v1335_v36, 1 }
 0x1e4   : > { %3016 = vmatmul.mubr.msk.bf16.vlgmr.msra.gmra.mrb[44].mxu0 %vm4262_vm3, %v3012_v33 }
 0x1e5   : > { %2189 = vmatpush1.bf16.msra.mxu0 %v2183_v22  ;;  %2220 = vmatprep.mubr.bf16.mxu0 %v4269_v7  ;;  %v1562_v22 = vsel %vm1561_vm9, 1, %v4269_v7 }
 0x1e6   : > { %3027 = vmatprep.subr.msk.bf16.mxu0 %vm374_vm1, %v3327_v17  ;;  %v2468_v17 = vsel %vm374_vm1, %v3514_v5, 0  ;;  %v3032_v5 = vld [vmem:[%s4247_s3 + $0x32] sm:$0x3] }
 0x1ec   : > { %3022 = vmatmul.mubr.msk.bf16.vlgmr.msra.gmra.mrb[48].mxu0 %vm4262_vm3, %v3020_v55  ;;  %v1763_v55 = vadd.f32 4.0, %v3527_v12 }
 0x1ed   : > { %2333 = vmatpush1.bf16.msra.mxu0 %v3331_v18  ;;  %2364 = vmatprep.mubr.bf16.mxu0 %v4269_v7  ;;  %v2621_v18 = vsel %vm2620_vm13, %v2615_v54, %v2617_v9  ;;  %vm1481_vm13 = vmand %vm1321_vm15, %vm1480_vm7 }
 0x1ee   : > { %3033 = vmatprep.subr.msk.bf16.mxu0 %vm374_vm1, %v2463_v53  ;;  %v2627_v6 = vsel %vm374_vm1, %v2621_v18, 0  ;;  %vm1483_vm15 = vmand %vm1481_vm13, %vm1482_vm0  ;;  %vm1764_vm12 = vcmp.ge.f32.partialorder %v1763_v55, 0.0 }
 0x1ef   : > { %v1484_v33 = vsel %vm1483_vm15, 1, %v4269_v7  ;;  %vm1686_vm13 = vmand %vm3589_vm10, %vm1480_vm7  ;;  %vm1765_vm15 = vcmp.le.f32.partialorder %v1763_v55, 15.0 }
 0x1f0   : > { %vm1687_vm9 = vmand %vm1686_vm13, %vm1482_vm0 }
 0x1f4   : > { %3028 = vmatmul.mubr.msk.bf16.vlgmr.msra.gmra.mrb[52].mxu0 %vm4262_vm3, %v3026_v3  ;;  %v1566_v3 = vrot.slane %v1562_v22, %v3565_v51 }
 0x1f5   : > { %2474 = vmatpush1.bf16.msra.mxu0 %v2468_v17  ;;  %2505 = vmatprep.mubr.bf16.mxu0 %v4269_v7 }
 0x1f6   : > { %3039 = vmatprep.subr.msk.bf16.mxu0 %vm374_vm1, %v2622_v24  ;;  %v1488_v24 = vrot.slane %v1484_v33, %v3565_v51 }
 0x1fc   : > { %3034 = vmatmul.mubr.msk.bf16.vlgmr.msra.gmra.mrb[56].mxu0 %vm4262_vm3, %v3032_v5 }
 0x1fd   : > { %2633 = vmatpush1.bf16.msra.mxu0 %v2627_v6  ;;  %2664 = vmatprep.mubr.bf16.mxu0 %v4269_v7 }
 0x204   : > { %3040 = vmatmul.mubr.msk.bf16.vlgmr.msra.gmra.mrb[60].mxu0 %vm4262_vm3, %v3038_v41 }
 0x205   : > { %2816 = vmatprep.mubr.bf16.mxu0 %v4269_v7 }
 0x254   : > { %v1250_v25 = vpop.f32.mrb[20].mxu1 }
 0x255   : > { %v1252_v26 = vpop.f32.mrb[21].mxu1 }
 0x256   : > { %v1254_v2 = vpop.f32.mrb[22].mxu1 }
 0x257   : > { %v1255_v34 = vpop.f32.mrb[23].mxu1  ;;  %v1570_v2 = vrot.slane %v1562_v22, %v3569_v61 }
 0x259   : > { %vm3960_vm3 = vcmp.eq.s32.totalorder %v1570_v2, 1 }
 0x25c   : > { %v1394_v42 = vpop.f32.mrb[24].mxu1 }
 0x25d   : > { %v3878_v35 = vpop.f32.mrb[25].mxu1  ;;  %v1414_v53 = vsel %vm1412_vm5, %v1394_v42, 0.0  ;;  %vm3951_vm5 = vmand %vm1764_vm12, %vm1765_vm15  ;;  %v1688_v42 = vsel %vm1687_vm9, 1, %v4269_v7  ;;  %vm4314_vm15 = vcmp.le.f32.partialorder %v3532_v13, 15.0 }
 0x25e   : > { %v1398_v16 = vpop.f32.mrb[26].mxu1  ;;  %v1415_v17 = vsel %vm3931_vm14, %v3878_v35, 0.0  ;;  %vm1493_vm14 = vcmp.eq.s32.totalorder %v1488_v24, 1  ;;  %vm1767_vm13 = vmand %vm3951_vm5, %vm1323_vm2  ;;  %v1696_v29 = vrot.slane %v1688_v42, %v3569_v61 }
 0x25f   : > { %v1399_v31 = vpop.f32.mrb[27].mxu1  ;;  %vm1844_vm12 = vmand %vm3951_vm5, %vm578_vm6 }
 0x260   : > { %vm1768_vm2 = vmand %vm1767_vm13, %vm1325_vm4 }
 0x261   : > { %vm1845_vm9 = vmand %vm1844_vm12, %vm4314_vm15  ;;  %v1769_v46 = vsel %vm1768_vm2, 1, %v4269_v7 }
 0x262   : > { %v1773_v22 = vrot.slane %v1769_v46, %v3565_v51 }
 0x264   : > { %v3880_v4 = vpop.f32.mrb[28].mxu1 }
 0x265   : > { %v3882_v20 = vpop.f32.mrb[29].mxu1 }
 0x266   : > { %v1557_v48 = vpop.f32.mrb[30].mxu1 }
 0x267   : > { %v1558_v57 = vpop.f32.mrb[31].mxu1 }
 0x26c   : > { %v3884_v8 = vpop.f32.mrb[32].mxu1 }
 0x26d   : > { %v3886_v32 = vpop.f32.mrb[33].mxu1 }
 0x26e   : > { %v1683_v59 = vpop.f32.mrb[34].mxu1 }
 0x26f   : > { %v1684_v37 = vpop.f32.mrb[35].mxu1  ;;  %v1692_v59 = vrot.slane %v1688_v42, %v3565_v51 }
 0x274   : > { %v3889_v15 = vpop.f32.mrb[36].mxu1 }
 0x275   : > { %v3891_v56 = vpop.f32.mrb[37].mxu1 }
 0x276   : > { %v1841_v62 = vpop.f32.mrb[38].mxu1 }
 0x277   : > { %v1842_v23 = vpop.f32.mrb[39].mxu1 }
 0x278   : > { %v1574_v23 = vsel %vm3960_vm3, %v3882_v20, 0.0  ;;  %v1846_v20 = vsel %vm1845_vm9, 1, %v4269_v7  ;;  %vm1921_vm3 = vmand %vm3951_vm5, %vm1480_vm7  ;;  %vm4321_vm9 = vcmask 1041408  }
 0x279   : > { %v1850_v55 = vrot.slane %v1846_v20, %v3565_v51  ;;  %vm1922_vm4 = vmand %vm1921_vm3, %vm1482_vm0  ;;  %vm4324_vm3 = vcmask 64512  }
 0x27a   : > { %v1923_v24 = vsel %vm1922_vm4, 1, %v4269_v7  ;;  %vm4325_vm4 = vmmov %vm4324_vm3 }
 0x27b   : > { %vm4004_vm13 = vcmp.eq.s32.totalorder %v1850_v55, 1  ;;  %v1927_v2 = vrot.slane %v1923_v24, %v3565_v51  ;;  %v1931_v42 = vrot.slane %v1923_v24, %v3569_v61 }
 0x27c   : > { %v1857_v28 = vsel %vm4004_vm13, %v3889_v15, 0.0  ;;  %vm4328_vm13 = vmmov %vm4324_vm3 }
 0x27d   : > { %vm1932_vm0 = vcmp.eq.s32.totalorder %v1927_v2, 1  ;;  %vm1933_vm12 = vcmp.eq.s32.totalorder %v1931_v42, 1  ;;  %v3046_v2 = vld [vmem:[%s4249_s5 + $0x10] sm:$0xf] }
 0x27e   : > { %v3106_v42 = vld [vmem:[%s4246_s2 + $0x1] ss:$2 sm:$0x3] }
 0x287   : > { %v1200_v27 = vpop.f32.mrb[20].mxu0 }
 0x288   : > { %v3920_v40 = vadd.f32 %v1250_v25, %v1200_v27  ;;  %v1202_v0 = vpop.f32.mrb[21].mxu0 }
 0x289   : > { %v3923_v10 = vadd.f32 %v1252_v26, %v1202_v0  ;;  %v1204_v39 = vpop.f32.mrb[22].mxu0  ;;  %v1492_v26 = vrot.slane %v1484_v33, %v3569_v61 }
 0x28a   : > { %v1205_v45 = vpop.f32.mrb[23].mxu0 }
 0x28f   : > { %v1311_v54 = vpop.f32.mrb[24].mxu0 }
 0x290   : > { %v1338_v19 = vsel %vm1336_vm11, %v1311_v54, 0.0  ;;  %v1313_v9 = vpop.f32.mrb[25].mxu0  ;;  %vm3955_vm11 = vcmp.eq.s32.totalorder %v1566_v3, 1 }
 0x291   : > { %v1416_v18 = vadd.f32 %v1414_v53, %v1338_v19  ;;  %v1339_v12 = vsel %vm1337_vm8, %v1313_v9, 0.0  ;;  %v1315_v6 = vpop.f32.mrb[26].mxu0  ;;  %vm1494_vm8 = vcmp.eq.s32.totalorder %v1492_v26, 1  ;;  %v1573_v57 = vsel %vm3955_vm11, %v3880_v4, 0.0 }
 0x292   : > { %v1417_v5 = vadd.f32 %v1415_v17, %v1339_v12  ;;  %v1316_v25 = vpop.f32.mrb[27].mxu0  ;;  %vm3984_vm11 = vcmp.eq.s32.totalorder %v1696_v29, 1  ;;  %v1854_v17 = vrot.slane %v1846_v20, %v3569_v61 }
 0x293   : > { %v1700_v36 = vsel %vm3984_vm11, %v3886_v32, 0.0  ;;  %vm4323_vm11 = vcmask 31744  }
 0x294   : > { %vm4008_vm5 = vcmp.eq.s32.totalorder %v1854_v17, 1 }
 0x295   : > { %v1858_v26 = vsel %vm4008_vm5, %v3891_v56, 0.0  ;;  %vm4331_vm5 = vmmov %vm4323_vm11 }
 0x297   : > { %v1472_v16 = vpop.f32.mrb[28].mxu0 }
 0x298   : > { %v1495_v31 = vsel %vm1493_vm14, %v1472_v16, 0.0  ;;  %v1474_v48 = vpop.f32.mrb[29].mxu0  ;;  %vm1697_vm14 = vcmp.eq.s32.totalorder %v1692_v59, 1 }
 0x299   : > { %v1497_v37 = vadd.f32 %v1495_v31, %v1416_v18  ;;  %v1496_v14 = vsel %vm1494_vm8, %v1474_v48, 0.0  ;;  %v1476_v62 = vpop.f32.mrb[30].mxu0  ;;  %v1699_v44 = vsel %vm1697_vm14, %v3884_v8, 0.0  ;;  %v1777_v8 = vrot.slane %v1769_v46, %v3569_v61  ;;  %vm4322_vm14 = vmmov %vm4321_vm9 }
 0x29a   : > { %v1498_v30 = vadd.f32 %v1496_v14, %v1417_v5  ;;  %v1477_v27 = vpop.f32.mrb[31].mxu0  ;;  %vm1778_vm8 = vcmp.eq.s32.totalorder %v1773_v22, 1  ;;  %v1950_v14 = vstv %s3008_s12 }
 0x29b   : > { %v1575_v4 = vadd.f32 %v1573_v57, %v1497_v37  ;;  %vm1779_vm7 = vcmp.eq.s32.totalorder %v1777_v8, 1 }
 0x29c   : > { %v1576_v38 = vadd.f32 %v1574_v23, %v1498_v30 }
 0x29f   : > { %v1616_v39 = vpop.f32.mrb[32].mxu0 }
 0x2a0   : > { %v1623_v45 = vadd.f32 %v1616_v39, %v1575_v4  ;;  %v1618_v21 = vpop.f32.mrb[33].mxu0 }
 0x2a1   : > { %v1624_v43 = vadd.f32 %v1618_v21, %v1576_v38  ;;  %v1620_v33 = vpop.f32.mrb[34].mxu0  ;;  %v2264_v21 = vsel %vm374_vm1, %v3502_v58, 0  ;;  %v3029_v58 = vld [vmem:[%s4247_s3 + $0x30] sm:$0x3] }
 0x2a2   : > { %v1701_v53 = vadd.f32 %v1699_v44, %v1623_v45  ;;  %v1621_v54 = vpop.f32.mrb[35].mxu0  ;;  %v3009_v44 = vld [vmem:[%s4249_s5 + $0x8] sm:$0xf] }
 0x2a3   : > { %v1702_v19 = vadd.f32 %v1700_v36, %v1624_v43  ;;  %v3017_v45 = vld [vmem:[%s4247_s3 + $0x28] sm:$0x3] }
 0x2a7   : > { %v1756_v3 = vpop.f32.mrb[36].mxu0 }
 0x2a8   : > { %v1780_v18 = vsel %vm1778_vm8, %v1756_v3, 0.0  ;;  %v1758_v12 = vpop.f32.mrb[37].mxu0  ;;  %vm4327_vm8 = vmmov %vm4324_vm3 }
 0x2a9   : > { %v1782_v6 = vadd.f32 %v1780_v18, %v1701_v53  ;;  %v1781_v5 = vsel %vm1779_vm7, %v1758_v12, 0.0  ;;  %v1760_v25 = vpop.f32.mrb[38].mxu0 }
 0x2aa   : > { %v1783_v34 = vadd.f32 %v1781_v5, %v1702_v19  ;;  %v1761_v41 = vpop.f32.mrb[39].mxu0  ;;  %v3047_v5 = vld.sshfl [vmem:[%s334_s29] sm:$0x33 pattern:$0x76325410] }
 0x2ab   : > { %v1859_v35 = vadd.f32 %v1857_v28, %v1782_v6  ;;  %v2774_v25 = vcombine.high %v3047_v5, %v3047_v5 }
 0x2ac   : > { %v1860_v16 = vadd.f32 %v1858_v26, %v1783_v34  ;;  %v3105_v34 = vld [vmem:[%s4246_s2] ss:$2 sm:$0x3] }
 0x2ad   : > { %v2069_v41 = vadd.f32 -6.0, %v3105_v34 }
 0x2af   : > { %v1914_v31 = vpop.f32.mrb[40].mxu0 }
 0x2b0   : > { %v1934_v15 = vsel %vm1932_vm0, %v1914_v31, 0.0  ;;  %v1916_v48 = vpop.f32.mrb[41].mxu0  ;;  %vm2070_vm0 = vcmp.ge.f32.partialorder %v2069_v41, 0.0 }
 0x2b1   : > { %v1936_v57 = vadd.f32 %v1934_v15, %v1859_v35  ;;  %v1935_v59 = vsel %vm1933_vm12, %v1916_v48, 0.0  ;;  %v1918_v37 = vpop.f32.mrb[42].mxu0  ;;  %v2073_v35 = vadd.f32 -6.0, %v3106_v42  ;;  %vm2071_vm12 = vcmp.le.f32.partialorder %v2069_v41, 15.0 }
 0x2b2   : > { %v1937_v62 = vadd.f32 %v1935_v59, %v1860_v16  ;;  %v1919_v56 = vpop.f32.mrb[43].mxu0  ;;  %v4102_v16 = vadd.f32 6.0, %v3106_v42  ;;  %v2514_v48 = vadd.f32 6.0, %v3105_v34 }
 0x2b3   : > { %v1945_v23 = vadd.f32 %v3488_v47, %v1936_v57 }
 0x2b4   : > { %v1946_v29 = vadd.f32 %v3488_v47, %v1937_v62  ;;  %v2105_v47 = vsel %vm374_vm1, %v3491_v50, 0  ;;  %v3023_v50 = vld [vmem:[%s4247_s3 + $0x2c] sm:$0x3] }
 0x2b5   : > { %v1951_v30 = vmul.f32 %v1950_v14, %v1945_v23  ;;  %vm1948_vm2 = vcmp.ge.f32.partialorder %v1945_v23, 0.0 }
 0x2b6   : > { %vm1949_vm15 = vcmp.ge.f32.partialorder %v1946_v29, 0.0  ;;  %v1952_v27 = vmul.f32 %v1950_v14, %v1946_v29 }
 0x2b7   : > { %v1953_v4 = vsel %vm1948_vm2, %v1945_v23, %v1951_v30  ;;  %v4023_v38 = vpop.f32.mrb[44].mxu0  ;;  %vm2072_vm2 = vmand %vm2070_vm0, %vm2071_vm12  ;;  %vm2515_vm12 = vcmp.ge.f32.partialorder %v2514_v48, 0.0 }
 0x2b8   : > { %v1954_v0 = vsel %vm1949_vm15, %v1946_v29, %v1952_v27  ;;  %v1955_v46 = vpack.c.bf16 %v1953_v4, %v1953_v4  ;;  %vm2074_vm15 = vcmp.ge.f32.partialorder %v2073_v35, 0.0 }
 0x2b9   : > { %v1956_v20 = vpack.c.bf16 %v1954_v0, %v1954_v0  ;;  %vm2310_vm0 = vmand %vm3589_vm10, %vm2074_vm15 }
 0x2ba   : > { %v1963_v39 = vsel %vm4321_vm9, %v1955_v46, 0 }
 0x2bb   : > { %3010 = vmatprep.subr.msk.bf16.mxu1 %vm4322_vm14, %v1956_v20  ;;  %vm2075_vm14 = vmand %vm2072_vm2, %vm2074_vm15 }
 0x2bc   : > { %1969 = vmatpush1.bf16.msra.mxu1 %v1963_v39 }
 0x2bd   : > { %3018 = vmatprep.subr.msk.bf16.mxu1 %vm374_vm1, %v3494_v52  ;;  %v2390_v52 = vsel %vm374_vm1, %v3506_v63, 0  ;;  %v3035_v63 = vld [vmem:[%s4247_s3 + $0x34] sm:$0x3] }
 0x2bf   : > { %3011 = vmatmul.mubr.msk.bf16.vlgmr.msra.gmra.mrb[40].mxu1 %vm4323_vm11, %v3009_v44  ;;  %vm2076_vm11 = vcmp.le.f32.partialorder %v2073_v35, 15.0 }
 0x2c0   : > { %2111 = vmatpush1.bf16.msra.mxu1 %v2105_v47  ;;  %2142 = vmatprep.mubr.bf16.mxu1 %v4269_v7 }
 0x2c1   : > { %3024 = vmatprep.subr.msk.bf16.mxu1 %vm374_vm1, %v3504_v60  ;;  %v4326_v60 = vld [vmem:[#allocation5_spill] sm:$0xff] }
 0x2c7   : > { %3019 = vmatmul.mubr.msk.bf16.vlgmr.msra.gmra.mrb[44].mxu1 %vm4324_vm3, %v3017_v45  ;;  %vm2151_vm3 = vmand %vm2072_vm2, %vm578_vm6 }
 0x2c8   : > { %2270 = vmatpush1.bf16.msra.mxu1 %v2264_v21  ;;  %2301 = vmatprep.mubr.bf16.mxu1 %v4269_v7 }
 0x2c9   : > { %3030 = vmatprep.subr.msk.bf16.mxu1 %vm374_vm1, %v3508_v1  ;;  %v2549_v1 = vsel %vm374_vm1, %v4326_v60, 0 }
 0x2cf   : > { %3025 = vmatmul.mubr.msk.bf16.vlgmr.msra.gmra.mrb[48].mxu1 %vm4325_vm4, %v3023_v50 }
 0x2d0   : > { %2396 = vmatpush1.bf16.msra.mxu1 %v2390_v52  ;;  %2427 = vmatprep.mubr.bf16.mxu1 %v4269_v7 }
 0x2d1   : > { %3036 = vmatprep.subr.msk.bf16.mxu1 %vm374_vm1, %v3522_v11  ;;  %v4068_v11 = vpop.f32.mrb[45].mxu0  ;;  %vm4329_vm1 = vmmov %vm4321_vm9  ;;  %vm2230_vm9 = vcmp.ge.f32.partialorder %v4102_v16, 0.0 }
 0x2d2   : > { %v2066_v36 = vpop.f32.mrb[46].mxu0  ;;  %3048 = vmatprep.subr.msk.bf16.mxu0 %vm4329_vm1, %v2774_v25  ;;  %vm4330_vm7 = vmmov %vm4329_vm1  ;;  %vm4332_vm1 = vcmp.le.f32.partialorder %v3532_v13, 15.0 }
 0x2d3   : > { %v2067_v43 = vpop.f32.mrb[47].mxu0  ;;  %v2779_v26 = vsel %vm4330_vm7, %v3047_v5, 0  ;;  %vm2231_vm4 = vmand %vm2072_vm2, %vm2230_vm9  ;;  %vm2516_vm2 = vcmp.le.f32.partialorder %v2514_v48, 15.0 }
 0x2d4   : > { %v4070_v33 = vpop.f32.mrb[48].mxu0  ;;  %2785 = vmatpush1.bf16.msra.mxu0 %v2779_v26  ;;  %vm2152_vm7 = vmand %vm2151_vm3, %vm4332_vm1 }
 0x2d5   : > { %v4072_v22 = vpop.f32.mrb[49].mxu0  ;;  %v2153_v15 = vsel %vm2152_vm7, 1, %v4269_v7  ;;  %vm4135_vm3 = vmand %vm2515_vm12, %vm2516_vm2 }
 0x2d6   : > { %v2226_v55 = vpop.f32.mrb[50].mxu0  ;;  %v2157_v23 = vrot.slane %v2153_v15, %v3565_v51  ;;  %v2161_v0 = vrot.slane %v2153_v15, %v3569_v61  ;;  %vm4159_vm12 = vmand %vm4135_vm3, %vm2074_vm15 }
 0x2d7   : > { %3031 = vmatmul.mubr.msk.bf16.vlgmr.msra.gmra.mrb[52].mxu1 %vm4327_vm8, %v3029_v58  ;;  %v2227_v53 = vpop.f32.mrb[51].mxu0  ;;  %3049 = vmatmul.mubr.msk.bf16.vlgmr.msra.gmra.mrb[64].mxu0 %vm4331_vm5, %v3046_v2  ;;  %vm2232_vm8 = vcmp.le.f32.partialorder %v4102_v16, 15.0  ;;  %vm2436_vm15 = vmand %vm3589_vm10, %vm2230_vm9 }
 0x2d8   : > { %2555 = vmatpush1.bf16.msra.mxu1 %v2549_v1  ;;  %2586 = vmatprep.mubr.bf16.mxu1 %v4269_v7  ;;  %v4074_v54 = vpop.f32.mrb[52].mxu0  ;;  %vm2233_vm5 = vmand %vm2231_vm4, %vm2232_vm8  ;;  %vm2162_vm7 = vcmp.eq.s32.totalorder %v2157_v23, 1 }
 0x2d9   : > { %v4076_v8 = vpop.f32.mrb[53].mxu0  ;;  %v2234_v57 = vsel %vm2233_vm5, 1, %v4269_v7  ;;  %vm2519_vm2 = vmand %vm4159_vm12, %vm2076_vm11 }
 0x2da   : > { %v2370_v17 = vpop.f32.mrb[54].mxu0  ;;  %v2238_v27 = vrot.slane %v2234_v57, %v3565_v51  ;;  %vm2437_vm10 = vmand %vm2436_vm15, %vm2232_vm8 }
 0x2db   : > { %v2371_v19 = vpop.f32.mrb[55].mxu0 }
 0x2dc   : > { %v4078_v32 = vpop.f32.mrb[56].mxu0  ;;  %vm4147_vm1 = vcmp.eq.s32.totalorder %v2238_v27, 1  ;;  %v2438_v19 = vsel %vm2437_vm10, 1, %v4269_v7 }
 0x2dd   : > { %v4080_v9 = vpop.f32.mrb[57].mxu0  ;;  %v2245_v58 = vsel %vm4147_vm1, %v4070_v33, 0.0  ;;  %v2442_v2 = vrot.slane %v2438_v19, %v3565_v51  ;;  %v2446_v35 = vrot.slane %v2438_v19, %v3569_v61  ;;  %vm4345_vm1 = vcmp.le.f32.partialorder %v3532_v13, 15.0 }
 0x2de   : > { %v2511_v24 = vpop.f32.mrb[58].mxu0 }
 0x2df   : > { %3037 = vmatmul.mubr.msk.bf16.vlgmr.msra.gmra.mrb[56].mxu1 %vm4328_vm13, %v3035_v63  ;;  %v2512_v3 = vpop.f32.mrb[59].mxu0  ;;  %vm2077_vm13 = vmand %vm2075_vm14, %vm2076_vm11 }
 0x2e0   : > { %2752 = vmatprep.mubr.bf16.mxu1 %v4269_v7  ;;  %v4082_v18 = vpop.f32.mrb[60].mxu0  ;;  %v2078_v31 = vsel %vm2077_vm13, 1, %v4269_v7  ;;  %vm2311_vm14 = vmand %vm2310_vm0, %vm2076_vm11  ;;  %vm2163_vm0 = vcmp.eq.s32.totalorder %v2161_v0, 1 }
 0x2e1   : > { %v4084_v12 = vpop.f32.mrb[61].mxu0  ;;  %v2082_v37 = vrot.slane %v2078_v31, %v3565_v51  ;;  %v2086_v62 = vrot.slane %v2078_v31, %v3569_v61  ;;  %v2312_v47 = vsel %vm2311_vm14, 1, %v4269_v7  ;;  %vm2595_vm11 = vmand %vm4135_vm3, %vm578_vm6 }
 0x2e2   : > { %v2670_v28 = vpop.f32.mrb[62].mxu0  ;;  %v2320_v33 = vrot.slane %v2312_v47, %v3569_v61 }
 0x2e3   : > { %v2671_v6 = vpop.f32.mrb[63].mxu0  ;;  %vm4139_vm4 = vcmp.eq.s32.totalorder %v2082_v37, 1  ;;  %vm4143_vm13 = vcmp.eq.s32.totalorder %v2086_v62, 1 }
 0x2e4   : > { %v2089_v50 = vsel %vm4139_vm4, %v4023_v38, 0.0  ;;  %v2090_v52 = vsel %vm4143_vm13, %v4068_v11, 0.0  ;;  %v2316_v11 = vrot.slane %v2312_v47, %v3565_v51  ;;  %vm2322_vm4 = vcmp.eq.s32.totalorder %v2320_v33, 1  ;;  %vm2673_vm13 = vmand %vm4135_vm3, %vm2230_vm9  ;;  %v3043_v33 = vld [vmem:[%s4249_s5 + $0xc] sm:$0xf] }
 0x2e5   : > { %vm2674_vm9 = vmand %vm2673_vm13, %vm2232_vm8  ;;  %vm2447_vm3 = vcmp.eq.s32.totalorder %v2442_v2, 1  ;;  %v2831_v2 = vpop.permute.xlu1 %2830 }
 0x2e6   : > { %vm2321_vm14 = vcmp.eq.s32.totalorder %v2316_v11, 1  ;;  %v2675_v16 = vsel %vm2674_vm9, 1, %v4269_v7 }
 0x2e7   : > { %v2679_v27 = vrot.slane %v2675_v16, %v3565_v51  ;;  %v2683_v0 = vrot.slane %v2675_v16, %v3569_v61 }
 0x2e9   : > { %vm2684_vm8 = vcmp.eq.s32.totalorder %v2679_v27, 1  ;;  %vm2685_vm15 = vcmp.eq.s32.totalorder %v2683_v0, 1 }
 0x392   : > { %v2002_v59 = vpop.f32.mrb[40].mxu1 }
 0x393   : > { %v4121_v14 = vadd.f32 %v2002_v59, %v3920_v40  ;;  %v2004_v56 = vpop.f32.mrb[41].mxu1  ;;  %v2242_v40 = vrot.slane %v2234_v57, %v3569_v61 }
 0x394   : > { %v4129_v29 = vadd.f32 %v2004_v56, %v3923_v10  ;;  %v2006_v30 = vpop.f32.mrb[42].mxu1  ;;  %v2686_v10 = vsel %vm2684_vm8, %v4082_v18, 0.0 }
 0x395   : > { %v2007_v4 = vpop.f32.mrb[43].mxu1  ;;  %vm4151_vm5 = vcmp.eq.s32.totalorder %v2242_v40, 1 }
 0x396   : > { %v2246_v38 = vsel %vm4151_vm5, %v4072_v22, 0.0  ;;  %v2520_v22 = vsel %vm2519_vm2, 1, %v4269_v7 }
 0x397   : > { %v2524_v6 = vrot.slane %v2520_v22, %v3565_v51  ;;  %v2528_v34 = vrot.slane %v2520_v22, %v3569_v61 }
 0x399   : > { %vm4206_vm6 = vcmp.eq.s32.totalorder %v2524_v6, 1  ;;  %vm4210_vm5 = vcmp.eq.s32.totalorder %v2528_v34, 1  ;;  %v2838_v34 = vstv %s3050_s19 }
 0x39a   : > { %v2144_v45 = vpop.f32.mrb[44].mxu1  ;;  %v2531_v13 = vsel %vm4206_vm6, %v4078_v32, 0.0  ;;  %v2532_v37 = vsel %vm4210_vm5, %v4080_v9, 0.0 }
 0x39b   : > { %v2164_v60 = vsel %vm2162_vm7, %v2144_v45, 0.0  ;;  %v2146_v1 = vpop.f32.mrb[45].mxu1  ;;  %vm2596_vm7 = vmand %vm2595_vm11, %vm4345_vm1  ;;  %vm4352_vm11 = vcmask 31744  }
 0x39c   : > { %v2166_v63 = vadd.f32 %v2164_v60, %v2089_v50  ;;  %v2165_v36 = vsel %vm2163_vm0, %v2146_v1, 0.0  ;;  %v2148_v43 = vpop.f32.mrb[46].mxu1  ;;  %vm2448_vm0 = vcmp.eq.s32.totalorder %v2446_v35, 1  ;;  %v2597_v59 = vsel %vm2596_vm7, 1, %v4269_v7 }
 0x39d   : > { %v2167_v55 = vadd.f32 %v2165_v36, %v2090_v52  ;;  %v2149_v53 = vpop.f32.mrb[47].mxu1  ;;  %v2601_v4 = vrot.slane %v2597_v59, %v3565_v51  ;;  %v2605_v46 = vrot.slane %v2597_v59, %v3569_v61  ;;  %v2687_v51 = vsel %vm2685_vm15, %v4084_v12, 0.0 }
 0x39e   : > { %v2247_v17 = vadd.f32 %v2245_v58, %v2166_v63  ;;  %v2695_v58 = vpop.permute.xlu0 %2694  ;;  %v2702_v60 = vstv %s3042_s15 }
 0x39f   : > { %v2248_v49 = vadd.f32 %v2246_v38, %v2167_v55  ;;  %vm2606_vm12 = vcmp.eq.s32.totalorder %v2601_v4, 1  ;;  %vm2607_vm2 = vcmp.eq.s32.totalorder %v2605_v46, 1 }
 0x3a2   : > { %v2303_v24 = vpop.f32.mrb[48].mxu1 }
 0x3a3   : > { %v2323_v3 = vsel %vm2321_vm14, %v2303_v24, 0.0  ;;  %v2305_v28 = vpop.f32.mrb[49].mxu1 }
 0x3a4   : > { %v2325_v5 = vadd.f32 %v2323_v3, %v2247_v17  ;;  %v2324_v25 = vsel %vm2322_vm4, %v2305_v28, 0.0  ;;  %v2307_v26 = vpop.f32.mrb[50].mxu1  ;;  %vm4350_vm4 = vcmask 1041408  }
 0x3a5   : > { %v2326_v41 = vadd.f32 %v2324_v25, %v2248_v49  ;;  %v2308_v42 = vpop.f32.mrb[51].mxu1  ;;  %vm4351_vm13 = vmmov %vm4350_vm4 }
 0x3a6   : > { %v2373_v31 = vadd.f32 %v4074_v54, %v2325_v5 }
 0x3a7   : > { %v2374_v15 = vadd.f32 %v4076_v8, %v2326_v41 }
 0x3aa   : > { %v2429_v54 = vpop.f32.mrb[52].mxu1  ;;  %v2818_v17 = vpop.f32.mrb[64].mxu0 }
 0x3ab   : > { %v2449_v8 = vsel %vm2447_vm3, %v2429_v54, 0.0  ;;  %v2431_v62 = vpop.f32.mrb[53].mxu1  ;;  %v2820_v49 = vpop.f32.mrb[65].mxu0 }
 0x3ac   : > { %v2451_v56 = vadd.f32 %v2449_v8, %v2373_v31  ;;  %v2450_v23 = vsel %vm2448_vm0, %v2431_v62, 0.0  ;;  %v2433_v30 = vpop.f32.mrb[54].mxu1  ;;  %v2822_v22 = vpop.f32.mrb[66].mxu0 }
 0x3ad   : > { %v2452_v40 = vadd.f32 %v2450_v23, %v2374_v15  ;;  %v2434_v7 = vpop.f32.mrb[55].mxu1  ;;  %v2823_v19 = vpop.f32.mrb[67].mxu0 }
 0x3ae   : > { %v2533_v32 = vadd.f32 %v2531_v13, %v2451_v56 }
 0x3af   : > { %v2534_v20 = vadd.f32 %v2532_v37, %v2452_v40 }
 0x3b2   : > { %v2588_v9 = vpop.f32.mrb[56].mxu1 }
 0x3b3   : > { %v2608_v39 = vsel %vm2606_vm12, %v2588_v9, 0.0  ;;  %v2590_v44 = vpop.f32.mrb[57].mxu1 }
 0x3b4   : > { %v2610_v47 = vadd.f32 %v2608_v39, %v2533_v32  ;;  %v2609_v45 = vsel %vm2607_vm2, %v2590_v44, 0.0  ;;  %v2592_v21 = vpop.f32.mrb[58].mxu1 }
 0x3b5   : > { %v2611_v50 = vadd.f32 %v2609_v45, %v2534_v20  ;;  %v2593_v52 = vpop.f32.mrb[59].mxu1 }
 0x3b6   : > { %v2688_v61 = vadd.f32 %v2686_v10, %v2610_v47 }
 0x3b7   : > { %v2689_v1 = vadd.f32 %v2687_v51, %v2611_v50 }
 0x3b8   : > { %v2697_v63 = vadd.f32 %v2695_v58, %v2688_v61 }
 0x3b9   : > { %v2698_v38 = vadd.f32 %v2695_v58, %v2689_v1 }
 0x3ba   : > { %v2703_v36 = vmul.f32 %v2702_v60, %v2697_v63  ;;  %vm2700_vm10 = vcmp.ge.f32.partialorder %v2697_v63, 0.0 }
 0x3bb   : > { %v2704_v43 = vmul.f32 %v2702_v60, %v2698_v38  ;;  %vm2701_vm14 = vcmp.ge.f32.partialorder %v2698_v38, 0.0 }
 0x3bc   : > { %v2705_v18 = vsel %vm2700_vm10, %v2697_v63, %v2703_v36 }
 0x3bd   : > { %v2706_v11 = vsel %vm2701_vm14, %v2698_v38, %v2704_v43  ;;  %v2707_v55 = vpack.c.bf16 %v2705_v18, %v2705_v18 }
 0x3be   : > { %v2708_v53 = vpack.c.bf16 %v2706_v11, %v2706_v11 }
 0x3bf   : > { %v2715_v12 = vsel %vm4350_vm4, %v2707_v55, 0 }
 0x3c0   : > { %3044 = vmatprep.subr.msk.bf16.mxu1 %vm4351_vm13, %v2708_v53 }
 0x3c1   : > { %2721 = vmatpush1.bf16.msra.mxu1 %v2715_v12 }
 0x3c4   : > { %3045 = vmatmul.mubr.msk.bf16.vlgmr.msra.gmra.mrb[60].mxu1 %vm4352_vm11, %v3043_v33 }
 0x497   : > { %v2754_v24 = vpop.f32.mrb[60].mxu1 }
 0x498   : > { %v2761_v3 = vadd.f32 %v2754_v24, %v4121_v14  ;;  %v2756_v28 = vpop.f32.mrb[61].mxu1 }
 0x499   : > { %v2762_v6 = vadd.f32 %v2756_v28, %v4129_v29  ;;  %v2758_v5 = vpop.f32.mrb[62].mxu1 }
 0x49a   : > { %v2825_v25 = vadd.f32 %v2818_v17, %v2761_v3  ;;  %v2759_v26 = vpop.f32.mrb[63].mxu1 }
 0x49b   : > { %v2826_v41 = vadd.f32 %v2820_v49, %v2762_v6 }
 0x49c   : > { %v2833_v42 = vadd.f32 %v2831_v2, %v2825_v25 }
 0x49d   : > { %v2834_v35 = vadd.f32 %v2831_v2, %v2826_v41 }
 0x49e   : > { %vm2836_vm9 = vcmp.ge.f32.partialorder %v2833_v42, 0.0  ;;  %v2839_v31 = vmul.f32 %v2838_v34, %v2833_v42 }
 0x49f   : > { %vm2837_vm1 = vcmp.ge.f32.partialorder %v2834_v35, 0.0  ;;  %v2840_v14 = vmul.f32 %v2838_v34, %v2834_v35 }
 0x4a0   : > { %v2841_v15 = vsel %vm2836_vm9, %v2833_v42, %v2839_v31 }
 0x4a1   : > { %2843 = vst [vmem:[%s339_s22] sm:$0xff] %v2841_v15  ;;  %v2842_v29 = vsel %vm2837_vm1, %v2834_v35, %v2840_v14 }
 0x4a2   : > { %2844 = vst [vmem:[%s339_s22 + $0x8] sm:$0xff] %v2842_v29 }
 0x4a3 PF: > { %s19_s27 = sadd.s32 1, %s3132_s27  }
 0x4a4   : > { %p16_p1 = scmp.ge.s32.totalorder %s19_s27, 4  }
 0x4a6   :  { %18 = sbr.rel (!%p16_p1) target bundleno = 1 (0x1), region = 125 }
 0x4ad   :  { %2866 = vsyncpa [#allocation3], 1 }
 0x4ae   :  { %2868 = vsyncpa [#allocation3 + $0x1], 1 }

</bundles_post_ra>
